<compile_context>
chip_gen: v5e
topology: v5e:2x2
jax: 0.10.0
libtpu: 0.0.40
codegen_flags: <defaults>
</compile_context>

<pallas_src>
import jax
import jax.numpy as jnp
from jax.experimental import pallas as pl
from jax.experimental.pallas import tpu as pltpu

F_PAD = 128                 # padded feature width (lane dimension)
DEFAULT_BLOCK_B = 512       # batch tile (sublane dimension); multiple of 8

# True (unpadded) layer sizes of the PyTorch Net.
LAYER_DIMS = [(2, 80), (80, 80), (80, 80), (80, 40), (40, 1)]


def _use_bf16_default():
    """bf16 MXU inputs on v6e/v7x; keep f32 on v5e and older (per perf review)."""
    try:
        kind = jax.devices()[0].device_kind.lower()
    except Exception:
        return False
    return not any(v in kind for v in ("v2", "v3", "v4", "v5"))


def init_params(key):
    """PyTorch nn.Linear default init: U(-1/sqrt(fan_in), 1/sqrt(fan_in))."""
    params = []
    for (fi, fo) in LAYER_DIMS:
        key, kw, kb = jax.random.split(key, 3)
        bound = 1.0 / jnp.sqrt(jnp.float32(fi))
        w = jax.random.uniform(kw, (fi, fo), jnp.float32, -bound, bound)
        b = jax.random.uniform(kb, (fo,), jnp.float32, -bound, bound)
        params.append((w, b))
    return params


def prepare_params(params, use_bf16):
    """Pad raw (fan_in, fan_out) params to kernel layout.

    Returns: w1(8,128) f32, b1(1,128), w2/w3/w4 (128,128) in the MXU dtype,
    b2/b3/b4 (1,128) f32, w5 as a (1,128) f32 row, b5 (1,1) f32.
    """
    (w1, b1), (w2, b2), (w3, b3), (w4, b4), (w5, b5) = params
    mxu_dtype = jnp.bfloat16 if use_bf16 else jnp.float32

    def pad_mat(w, rows, cols, dtype):
        fi, fo = w.shape
        wp = jnp.zeros((rows, cols), jnp.float32).at[:fi, :fo].set(w)
        return wp.astype(dtype)

    def pad_bias(b, cols):
        return jnp.zeros((1, cols), jnp.float32).at[0, :b.shape[0]].set(b)

    return (
        pad_mat(w1, 8, F_PAD, jnp.float32), pad_bias(b1, F_PAD),      # VPU layer
        pad_mat(w2, F_PAD, F_PAD, mxu_dtype), pad_bias(b2, F_PAD),
        pad_mat(w3, F_PAD, F_PAD, mxu_dtype), pad_bias(b3, F_PAD),
        pad_mat(w4, F_PAD, F_PAD, mxu_dtype), pad_bias(b4, F_PAD),
        pad_mat(w5.T, 1, F_PAD, jnp.float32),                         # lane-reduce layer
        b5.reshape(1, 1).astype(jnp.float32),
    )


def _mlp_kernel(x_ref, t_ref,
                w1_ref, b1_ref, w2_ref, b2_ref, w3_ref, b3_ref,
                w4_ref, b4_ref, w5_ref, b5_ref, o_ref):
    """Whole forward pass for one (TB, 1)+(TB, 1) batch tile."""
    x = x_ref[...]                                   # (TB, 1) f32
    t = t_ref[...]                                   # (TB, 1) f32

    # Layer 1 (2 -> 80): VPU broadcast outer product; avoids a wasted K=128
    # MXU pass over a weight matrix with only two nonzero rows.
    h = x * w1_ref[0:1, :] + t * w1_ref[1:2, :] + b1_ref[...]        # (TB, 128)

    dt = w2_ref.dtype                                # bf16 on v6e/v7x, else f32
    h = jnp.dot(jnp.tanh(h).astype(dt), w2_ref[...],
                preferred_element_type=jnp.float32) + b2_ref[...]
    h = jnp.dot(jnp.tanh(h).astype(dt), w3_ref[...],
                preferred_element_type=jnp.float32) + b3_ref[...]
    h = jnp.dot(jnp.tanh(h).astype(dt), w4_ref[...],
                preferred_element_type=jnp.float32) + b4_ref[...]

    # Layer 5 (40 -> 1): lane reduction; writes only the useful column.
    h = jnp.tanh(h)
    out = jnp.sum(h * w5_ref[...], axis=-1, keepdims=True) + b5_ref[...]
    o_ref[...] = out.astype(o_ref.dtype)             # (TB, 1)


def net_forward(x, t, params, *, block_b=DEFAULT_BLOCK_B, use_bf16=None):
    """x: (N, 1), t: (N, 1) float32 -> (N, 1) float32."""
    if use_bf16 is None:
        use_bf16 = _use_bf16_default()

    n = x.shape[0]
    n_pad = pl.cdiv(n, block_b) * block_b            # handle N % block_b != 0
    if n_pad != n:
        x = jnp.pad(x, ((0, n_pad - n), (0, 0)))
        t = jnp.pad(t, ((0, n_pad - n), (0, 0)))

    kparams = prepare_params(params, use_bf16)

    data_spec = pl.BlockSpec((block_b, 1), lambda i: (i, 0))
    # Weights/biases: whole-array, VMEM-resident for the entire kernel (no
    # per-step double-buffering).
    w_spec = pl.BlockSpec(memory_space=pltpu.MemorySpace.VMEM)

    out = pl.pallas_call(
        _mlp_kernel,
        out_shape=jax.ShapeDtypeStruct((n_pad, 1), jnp.float32),
        grid_spec=pltpu.PrefetchScalarGridSpec(
            num_scalar_prefetch=0,
            grid=(n_pad // block_b,),
            in_specs=[data_spec, data_spec] + [w_spec] * len(kparams),
            out_specs=pl.BlockSpec((block_b, 1), lambda i: (i, 0)),
        ),
        compiler_params=pltpu.CompilerParams(
            dimension_semantics=("parallel",)),       # megacore sharding on v7x
    )(x, t, *kparams)

    return out[:n]                                    # drop batch padding rows


def net_forward_ref(x, t, params, use_bf16=False):
    """Pure-JAX reference of the PyTorch forward.

    With use_bf16=False this is the exact f32 forward; with use_bf16=True the
    MXU-layer operands are rounded to bf16 exactly as the kernel does.
    """
    dt = jnp.bfloat16 if use_bf16 else jnp.float32
    (w1, b1), (w2, b2), (w3, b3), (w4, b4), (w5, b5) = params
    u = jnp.concatenate([x, t], axis=1)
    h = u @ w1 + b1
    for (w, b) in ((w2, b2), (w3, b3), (w4, b4)):
        h = jnp.dot(jnp.tanh(h).astype(dt), w.astype(dt),
                    preferred_element_type=jnp.float32) + b
    return jnp.tanh(h) @ w5 + b5


if __name__ == "__main__":
    key = jax.random.PRNGKey(0)
    kp, kx, kt = jax.random.split(key, 3)

    params = init_params(kp)

    # N deliberately not a multiple of the batch tile -> exercises padding path;
    # padded N=1024 gives 2 grid steps (both TensorCores used on v7x).
    N = 1000
    x = jax.random.normal(kx, (N, 1), jnp.float32)
    t = jax.random.normal(kt, (N, 1), jnp.float32)

    use_bf16 = _use_bf16_default()
    out = jax.block_until_ready(net_forward(x, t, params, use_bf16=use_bf16))

    ref = net_forward_ref(x, t, params, use_bf16=use_bf16)
    assert out.shape == (N, 1), out.shape
    tol = 5e-3 if use_bf16 else 1e-4
    assert jnp.allclose(out, ref, atol=tol, rtol=tol), (out[:4], ref[:4])

    print("KERNEL_OK")
</pallas_src>

<mosaic_0001>
module attributes {stable_mosaic.version = 11 : i64} {
  func.func @_mlp_kernel(%arg0: i32, %arg1: memref<512x1xf32, #tpu.memory_space<vmem>>, %arg2: memref<512x1xf32, #tpu.memory_space<vmem>>, %arg3: memref<8x128xf32, #tpu.memory_space<vmem>>, %arg4: memref<1x128xf32, #tpu.memory_space<vmem>>, %arg5: memref<128x128xbf16, #tpu.memory_space<vmem>>, %arg6: memref<1x128xf32, #tpu.memory_space<vmem>>, %arg7: memref<128x128xbf16, #tpu.memory_space<vmem>>, %arg8: memref<1x128xf32, #tpu.memory_space<vmem>>, %arg9: memref<128x128xbf16, #tpu.memory_space<vmem>>, %arg10: memref<1x128xf32, #tpu.memory_space<vmem>>, %arg11: memref<1x128xf32, #tpu.memory_space<vmem>>, %arg12: memref<1x1xf32, #tpu.memory_space<vmem>>, %arg13: memref<512x1xf32, #tpu.memory_space<vmem>>) attributes {dimension_semantics = [#tpu.dimension_semantics<parallel>], iteration_bounds = array<i64: 2>, scalar_prefetch = 0 : i64, scratch_operands = 0 : i64, tpu.core_type = #tpu.core_type<tc>, window_params = [{transform_indices = @transform_0, window_bounds = array<i64: 512, 1>}, {transform_indices = @transform_1, window_bounds = array<i64: 512, 1>}, {pipeline_mode = #tpu.pipeline_mode<synchronous>, transform_indices = @transform_2, window_bounds = array<i64: 8, 128>}, {pipeline_mode = #tpu.pipeline_mode<synchronous>, transform_indices = @transform_3, window_bounds = array<i64: 1, 128>}, {pipeline_mode = #tpu.pipeline_mode<synchronous>, transform_indices = @transform_4, window_bounds = array<i64: 128, 128>}, {pipeline_mode = #tpu.pipeline_mode<synchronous>, transform_indices = @transform_5, window_bounds = array<i64: 1, 128>}, {pipeline_mode = #tpu.pipeline_mode<synchronous>, transform_indices = @transform_6, window_bounds = array<i64: 128, 128>}, {pipeline_mode = #tpu.pipeline_mode<synchronous>, transform_indices = @transform_7, window_bounds = array<i64: 1, 128>}, {pipeline_mode = #tpu.pipeline_mode<synchronous>, transform_indices = @transform_8, window_bounds = array<i64: 128, 128>}, {pipeline_mode = #tpu.pipeline_mode<synchronous>, transform_indices = @transform_9, window_bounds = array<i64: 1, 128>}, {pipeline_mode = #tpu.pipeline_mode<synchronous>, transform_indices = @transform_10, window_bounds = array<i64: 1, 128>}, {pipeline_mode = #tpu.pipeline_mode<synchronous>, transform_indices = @transform_11, window_bounds = array<i64: 1, 1>}, {transform_indices = @transform_12, window_bounds = array<i64: 512, 1>}]} {
    %c0 = arith.constant 0 : index
    %c0_0 = arith.constant 0 : index
    %0 = vector.load %arg1[%c0, %c0_0] : memref<512x1xf32, #tpu.memory_space<vmem>>, vector<512x1xf32>
    %c0_1 = arith.constant 0 : index
    %c0_2 = arith.constant 0 : index
    %1 = vector.load %arg2[%c0_1, %c0_2] : memref<512x1xf32, #tpu.memory_space<vmem>>, vector<512x1xf32>
    %c0_3 = arith.constant 0 : index
    %c0_4 = arith.constant 0 : index
    %2 = vector.load %arg3[%c0_3, %c0_4] : memref<8x128xf32, #tpu.memory_space<vmem>>, vector<1x128xf32>
    %3 = vector.broadcast %0 : vector<512x1xf32> to vector<512x128xf32>
    %4 = vector.broadcast %2 : vector<1x128xf32> to vector<512x128xf32>
    %5 = arith.mulf %3, %4 : vector<512x128xf32>
    %c1 = arith.constant 1 : index
    %c0_5 = arith.constant 0 : index
    %6 = vector.load %arg3[%c1, %c0_5] : memref<8x128xf32, #tpu.memory_space<vmem>>, vector<1x128xf32>
    %7 = vector.broadcast %1 : vector<512x1xf32> to vector<512x128xf32>
    %8 = vector.broadcast %6 : vector<1x128xf32> to vector<512x128xf32>
    %9 = arith.mulf %7, %8 : vector<512x128xf32>
    %10 = arith.addf %5, %9 : vector<512x128xf32>
    %c0_6 = arith.constant 0 : index
    %c0_7 = arith.constant 0 : index
    %11 = vector.load %arg4[%c0_6, %c0_7] : memref<1x128xf32, #tpu.memory_space<vmem>>, vector<1x128xf32>
    %12 = vector.broadcast %11 : vector<1x128xf32> to vector<512x128xf32>
    %13 = arith.addf %10, %12 : vector<512x128xf32>
    %14 = math.tanh %13 : vector<512x128xf32>
    %15 = arith.truncf %14 : vector<512x128xf32> to vector<512x128xbf16>
    %c0_8 = arith.constant 0 : index
    %c0_9 = arith.constant 0 : index
    %16 = vector.load %arg5[%c0_8, %c0_9] : memref<128x128xbf16, #tpu.memory_space<vmem>>, vector<128x128xbf16>
    %cst = arith.constant dense<0.000000e+00> : vector<512x128xf32>
    %17 = tpu.matmul %15, %16, %cst {dimension_numbers = #tpu.dot_dimension_numbers<[1], [0], [0], [1], [0, 0, 1, 1], [], []>} : vector<512x128xbf16>, vector<128x128xbf16>, vector<512x128xf32> -> vector<512x128xf32>
    %c0_10 = arith.constant 0 : index
    %c0_11 = arith.constant 0 : index
    %18 = vector.load %arg6[%c0_10, %c0_11] : memref<1x128xf32, #tpu.memory_space<vmem>>, vector<1x128xf32>
    %19 = vector.broadcast %18 : vector<1x128xf32> to vector<512x128xf32>
    %20 = arith.addf %17, %19 : vector<512x128xf32>
    %21 = math.tanh %20 : vector<512x128xf32>
    %22 = arith.truncf %21 : vector<512x128xf32> to vector<512x128xbf16>
    %c0_12 = arith.constant 0 : index
    %c0_13 = arith.constant 0 : index
    %23 = vector.load %arg7[%c0_12, %c0_13] : memref<128x128xbf16, #tpu.memory_space<vmem>>, vector<128x128xbf16>
    %cst_14 = arith.constant dense<0.000000e+00> : vector<512x128xf32>
    %24 = tpu.matmul %22, %23, %cst_14 {dimension_numbers = #tpu.dot_dimension_numbers<[1], [0], [0], [1], [0, 0, 1, 1], [], []>} : vector<512x128xbf16>, vector<128x128xbf16>, vector<512x128xf32> -> vector<512x128xf32>
    %c0_15 = arith.constant 0 : index
    %c0_16 = arith.constant 0 : index
    %25 = vector.load %arg8[%c0_15, %c0_16] : memref<1x128xf32, #tpu.memory_space<vmem>>, vector<1x128xf32>
    %26 = vector.broadcast %25 : vector<1x128xf32> to vector<512x128xf32>
    %27 = arith.addf %24, %26 : vector<512x128xf32>
    %28 = math.tanh %27 : vector<512x128xf32>
    %29 = arith.truncf %28 : vector<512x128xf32> to vector<512x128xbf16>
    %c0_17 = arith.constant 0 : index
    %c0_18 = arith.constant 0 : index
    %30 = vector.load %arg9[%c0_17, %c0_18] : memref<128x128xbf16, #tpu.memory_space<vmem>>, vector<128x128xbf16>
    %cst_19 = arith.constant dense<0.000000e+00> : vector<512x128xf32>
    %31 = tpu.matmul %29, %30, %cst_19 {dimension_numbers = #tpu.dot_dimension_numbers<[1], [0], [0], [1], [0, 0, 1, 1], [], []>} : vector<512x128xbf16>, vector<128x128xbf16>, vector<512x128xf32> -> vector<512x128xf32>
    %c0_20 = arith.constant 0 : index
    %c0_21 = arith.constant 0 : index
    %32 = vector.load %arg10[%c0_20, %c0_21] : memref<1x128xf32, #tpu.memory_space<vmem>>, vector<1x128xf32>
    %33 = vector.broadcast %32 : vector<1x128xf32> to vector<512x128xf32>
    %34 = arith.addf %31, %33 : vector<512x128xf32>
    %35 = math.tanh %34 : vector<512x128xf32>
    %c0_22 = arith.constant 0 : index
    %c0_23 = arith.constant 0 : index
    %36 = vector.load %arg11[%c0_22, %c0_23] : memref<1x128xf32, #tpu.memory_space<vmem>>, vector<1x128xf32>
    %37 = vector.broadcast %36 : vector<1x128xf32> to vector<512x128xf32>
    %38 = arith.mulf %35, %37 : vector<512x128xf32>
    %cst_24 = arith.constant dense<0.000000e+00> : vector<512xf32>
    %39 = vector.multi_reduction <add>, %38, %cst_24 [1] : vector<512x128xf32> to vector<512xf32>
    %40 = vector.shape_cast %39 : vector<512xf32> to vector<512x1xf32>
    %c0_25 = arith.constant 0 : index
    %c0_26 = arith.constant 0 : index
    %41 = vector.load %arg12[%c0_25, %c0_26] : memref<1x1xf32, #tpu.memory_space<vmem>>, vector<1x1xf32>
    %42 = vector.broadcast %41 : vector<1x1xf32> to vector<512x1xf32>
    %43 = arith.addf %40, %42 : vector<512x1xf32>
    %c0_27 = arith.constant 0 : index
    %c0_28 = arith.constant 0 : index
    %44 = vector.load %arg13[%c0_27, %c0_28] : memref<512x1xf32, #tpu.memory_space<vmem>>, vector<512x1xf32>
    tpu.vector_store %arg13[%c0_27, %c0_28], %43 {strides = array<i32>} : memref<512x1xf32, #tpu.memory_space<vmem>>, vector<512x1xf32>,
    return
  }
  func.func @transform_0(%arg0: i32) -> (i32, i32) {
    %c0_i32 = arith.constant 0 : i32
    %c0_i32_0 = arith.constant 0 : i32
    return %arg0, %c0_i32 : i32, i32
  }
  func.func @transform_1(%arg0: i32) -> (i32, i32) {
    %c0_i32 = arith.constant 0 : i32
    %c0_i32_0 = arith.constant 0 : i32
    return %arg0, %c0_i32 : i32, i32
  }
  func.func @transform_2(%arg0: i32) -> (i32, i32) {
    %c0_i32 = arith.constant 0 : i32
    %c0_i32_0 = arith.constant 0 : i32
    %c0_i32_1 = arith.constant 0 : i32
    return %c0_i32, %c0_i32_0 : i32, i32
  }
  func.func @transform_3(%arg0: i32) -> (i32, i32) {
    %c0_i32 = arith.constant 0 : i32
    %c0_i32_0 = arith.constant 0 : i32
    %c0_i32_1 = arith.constant 0 : i32
    return %c0_i32, %c0_i32_0 : i32, i32
  }
  func.func @transform_4(%arg0: i32) -> (i32, i32) {
    %c0_i32 = arith.constant 0 : i32
    %c0_i32_0 = arith.constant 0 : i32
    %c0_i32_1 = arith.constant 0 : i32
    return %c0_i32, %c0_i32_0 : i32, i32
  }
  func.func @transform_5(%arg0: i32) -> (i32, i32) {
    %c0_i32 = arith.constant 0 : i32
    %c0_i32_0 = arith.constant 0 : i32
    %c0_i32_1 = arith.constant 0 : i32
    return %c0_i32, %c0_i32_0 : i32, i32
  }
  func.func @transform_6(%arg0: i32) -> (i32, i32) {
    %c0_i32 = arith.constant 0 : i32
    %c0_i32_0 = arith.constant 0 : i32
    %c0_i32_1 = arith.constant 0 : i32
    return %c0_i32, %c0_i32_0 : i32, i32
  }
  func.func @transform_7(%arg0: i32) -> (i32, i32) {
    %c0_i32 = arith.constant 0 : i32
    %c0_i32_0 = arith.constant 0 : i32
    %c0_i32_1 = arith.constant 0 : i32
    return %c0_i32, %c0_i32_0 : i32, i32
  }
  func.func @transform_8(%arg0: i32) -> (i32, i32) {
    %c0_i32 = arith.constant 0 : i32
    %c0_i32_0 = arith.constant 0 : i32
    %c0_i32_1 = arith.constant 0 : i32
    return %c0_i32, %c0_i32_0 : i32, i32
  }
  func.func @transform_9(%arg0: i32) -> (i32, i32) {
    %c0_i32 = arith.constant 0 : i32
    %c0_i32_0 = arith.constant 0 : i32
    %c0_i32_1 = arith.constant 0 : i32
    return %c0_i32, %c0_i32_0 : i32, i32
  }
  func.func @transform_10(%arg0: i32) -> (i32, i32) {
    %c0_i32 = arith.constant 0 : i32
    %c0_i32_0 = arith.constant 0 : i32
    %c0_i32_1 = arith.constant 0 : i32
    return %c0_i32, %c0_i32_0 : i32, i32
  }
  func.func @transform_11(%arg0: i32) -> (i32, i32) {
    %c0_i32 = arith.constant 0 : i32
    %c0_i32_0 = arith.constant 0 : i32
    %c0_i32_1 = arith.constant 0 : i32
    return %c0_i32, %c0_i32_0 : i32, i32
  }
  func.func @transform_12(%arg0: i32) -> (i32, i32) {
    %c0_i32 = arith.constant 0 : i32
    %c0_i32_0 = arith.constant 0 : i32
    return %arg0, %c0_i32 : i32, i32
  }
}

</mosaic_0001>

<bundles_post_ra>
// kernel: tpu_custom_call.1
= control target key start
LH: loop header
LB: loop body
LE: loop exit
PB: predicated region body
PF: predicated region fallthrough
CT: control target
= control target key end

     0   :  { %s3707_s23 = smov 0   ;;  %s5030_s0 = inlined_call_operand.vmem [shape: f32[1024,1], index: 0, kind: input, shape index: {}]   ;;  %s5031_s1 = inlined_call_operand.vmem [shape: f32[1024,1], index: 1, kind: input, shape index: {}]   ;;  %s5032_s2 = inlined_call_operand.vmem [shape: f32[8,128], index: 2, kind: input, shape index: {}]   ;;  %s5033_s3 = inlined_call_operand.vmem [shape: f32[1,128], index: 3, kind: input, shape index: {}]   ;;  %s5034_s4 = inlined_call_operand.vmem [shape: bf16[128,128], index: 4, kind: input, shape index: {}]   ;;  %s5035_s5 = inlined_call_operand.vmem [shape: f32[1,128], index: 5, kind: input, shape index: {}]   ;;  %s5036_s6 = inlined_call_operand.vmem [shape: bf16[128,128], index: 6, kind: input, shape index: {}]   ;;  %s5037_s7 = inlined_call_operand.vmem [shape: f32[1,128], index: 7, kind: input, shape index: {}]   ;;  %s5038_s8 = inlined_call_operand.vmem [shape: bf16[128,128], index: 8, kind: input, shape index: {}]   ;;  %s5039_s9 = inlined_call_operand.vmem [shape: f32[1,128], index: 9, kind: input, shape index: {}]   ;;  %s5040_s10 = inlined_call_operand.vmem [shape: f32[1,128], index: 10, kind: input, shape index: {}]   ;;  %s5041_s11 = inlined_call_operand.<no memory space> [shape: f32[1,1], index: 11, kind: input, shape index: {}]   ;;  %s5042_s12 = inlined_call_operand.vmem [shape: f32[1024,1], index: 12, kind: output, shape index: {}]  }
   0x1   :  { %v17_v0 = vstv %s5041_s11 }
   0x2   :  { %18 = vst [vmem:[#allocation2] sm:$0x1] %v17_v0 }
   0x3 LB: > { %s2933_s24 = sadd.s32 4294967295, %s3636_s23   ;;  %p2937_p0 = scmp.ge.s32.totalorder %s3636_s23, 1  ;;  %s3636_s23 = sphi %s3707_s23, %s24_s23  }
   0x4   : > { %p376_p1 = scmp.lt.s32.totalorder %s3636_s23, 3 }
   0x6   : > { %p377_p2 = pnand %p2937_p0, %p376_p1 }
   0x7   : > { %s2938_s25 = sshll.u32 (!%p377_p2), %s2933_s24, 6 }
   0x8   : > { %380 = sbr.rel (%p377_p2) target bundleno = 1117 (0x45d), region = 68  ;;  %p424_p3 = scmp.lt.s32.totalorder (!%p377_p2), %s2938_s25, 127 }
   0xd   : > { %v3638_v1 = vmov 0   ;;  %s5044_s25 = smov (!%p424_p3, %s2938_s25), 127  ;;  %v3049_v43 = vld [vmem:[%s5034_s4 + $0x38] sm:$0xff]  ;;  %v3048_v47 = vld [vmem:[%s5034_s4 + $0x30] sm:$0xff]  ;;  %v3047_v49 = vld [vmem:[%s5034_s4 + $0x28] sm:$0xff]  ;;  %vm2800_vm0 = vcmask 7168  }
   0xe   : > { %3101 = vset.pattern.permute.xlu2 %v3638_v1  ;;  %3100 = vset.pattern.permute.xlu1 %v3638_v1  ;;  %s3715_s11 = sshll.u32 %s5044_s25, 3  ;;  %v3046_v53 = vld [vmem:[%s5034_s4 + $0x20] sm:$0xff]  ;;  %v3045_v56 = vld [vmem:[%s5034_s4 + $0x18] sm:$0xff]  ;;  %v3044_v61 = vld [vmem:[%s5034_s4 + $0x10] sm:$0xff] }
   0xf   : > { %3099 = vset.pattern.permute.xlu0 %v3638_v1  ;;  %s3721_s28 = scalar_lea.vmem %s5030_s0, %s3715_s11  ;;  %s3736_s13 = scalar_lea.vmem %s5031_s1, %s3715_s11  ;;  %1637 = vmatpush.bf16.msra.mxu0 %v3049_v43  ;;  %v3043_v0 = vld [vmem:[%s5034_s4 + $0x8] sm:$0xff] }
  0x10   : > { %v445_v2 = vld [vmem:[%s3721_s28 + $0x20] sm:$0xff]  ;;  %v443_v3 = vld [vmem:[%s3721_s28 + $0x10] sm:$0xff]  ;;  %v446_v5 = vld [vmem:[%s3721_s28 + $0x28] sm:$0xff]  ;;  %3066 = vmatpush.bf16.msra.mxu3 %v3049_v43  ;;  %s4591_s25 = scalar_lea.vmem %s5042_s12, %s3715_s11 }
  0x11   : > { %v441_v4 = vld [vmem:[%s3721_s28] sm:$0xff]  ;;  %592 = vperm.xlu2 %3101, %v445_v2   ;;  %582 = vperm.xlu1 %3100, %v443_v3   ;;  %v444_v6 = vld [vmem:[%s3721_s28 + $0x18] sm:$0xff]  ;;  %v442_v7 = vld [vmem:[%s3721_s28 + $0x8] sm:$0xff] }
  0x12   : > { %572 = vperm.xlu0 %3099, %v441_v4   ;;  %v449_v8 = vld [vmem:[%s3721_s28 + $0x40] sm:$0xff]  ;;  %v448_v9 = vld [vmem:[%s3721_s28 + $0x38] sm:$0xff]  ;;  %v447_v10 = vld [vmem:[%s3721_s28 + $0x30] sm:$0xff] }
  0x13   : > { %v505_v11 = vld [vmem:[%s3736_s13] sm:$0xff]  ;;  %v451_v12 = vld [vmem:[%s3721_s28 + $0x50] sm:$0xff]  ;;  %v450_v13 = vld [vmem:[%s3721_s28 + $0x48] sm:$0xff]  ;;  %1638 = vmatpush.bf16.msra.mxu0 %v3048_v47 }
  0x14   : > { %v507_v14 = vld [vmem:[%s3736_s13 + $0x10] sm:$0xff]  ;;  %v452_v15 = vld [vmem:[%s3721_s28 + $0x58] sm:$0xff]  ;;  %v506_v16 = vld [vmem:[%s3736_s13 + $0x8] sm:$0xff]  ;;  %3067 = vmatpush.bf16.msra.mxu3 %v3048_v47 }
  0x15   : > { %v509_v17 = vld [vmem:[%s3736_s13 + $0x20] sm:$0xff]  ;;  %v508_v19 = vld [vmem:[%s3736_s13 + $0x18] sm:$0xff]  ;;  %v511_v21 = vld [vmem:[%s3736_s13 + $0x30] sm:$0xff] }
  0x16   : > { %v453_v18 = vld [vmem:[%s3721_s28 + $0x60] sm:$0xff]  ;;  %v512_v20 = vld [vmem:[%s3736_s13 + $0x38] sm:$0xff]  ;;  %v510_v22 = vld [vmem:[%s3736_s13 + $0x28] sm:$0xff] }
  0x17   : > { %v514_v23 = vld [vmem:[%s3736_s13 + $0x48] sm:$0xff]  ;;  %v513_v24 = vld [vmem:[%s3736_s13 + $0x40] sm:$0xff]  ;;  %v516_v26 = vld [vmem:[%s3736_s13 + $0x58] sm:$0xff]  ;;  %1639 = vmatpush.bf16.msra.mxu0 %v3047_v49 }
  0x18   : > { %v454_v25 = vld [vmem:[%s3721_s28 + $0x68] sm:$0xff]  ;;  %v515_v27 = vld [vmem:[%s3736_s13 + $0x50] sm:$0xff]  ;;  %v456_v29 = vld [vmem:[%s3721_s28 + $0x78] sm:$0xff]  ;;  %3068 = vmatpush.bf16.msra.mxu3 %v3047_v49 }
  0x19   : > { %597 = vperm.xlu2 %3101, %v446_v5   ;;  %587 = vperm.xlu1 %3100, %v444_v6   ;;  %v455_v28 = vld [vmem:[%s3721_s28 + $0x70] sm:$0xff]  ;;  %v518_v30 = vld [vmem:[%s3736_s13 + $0x68] sm:$0xff]  ;;  %v517_v31 = vld [vmem:[%s3736_s13 + $0x60] sm:$0xff] }
  0x1a   : > { %577 = vperm.xlu0 %3099, %v442_v7   ;;  %v457_v32 = vld [vmem:[%s3721_s28 + $0x80] sm:$0xff]  ;;  %v520_v33 = vld [vmem:[%s3736_s13 + $0x78] sm:$0xff]  ;;  %v519_v34 = vld [vmem:[%s3736_s13 + $0x70] sm:$0xff] }
  0x1b   : > { %v522_v35 = vld [vmem:[%s3736_s13 + $0x88] sm:$0xff]  ;;  %v521_v36 = vld [vmem:[%s3736_s13 + $0x80] sm:$0xff]  ;;  %v523_v39 = vld [vmem:[%s3736_s13 + $0x90] sm:$0xff]  ;;  %1640 = vmatpush.bf16.msra.mxu0 %v3046_v53 }
  0x1c   : > { %v458_v37 = vld [vmem:[%s3721_s28 + $0x88] sm:$0xff]  ;;  %v460_v40 = vld [vmem:[%s3721_s28 + $0x98] sm:$0xff]  ;;  %v459_v41 = vld [vmem:[%s3721_s28 + $0x90] sm:$0xff]  ;;  %3069 = vmatpush.bf16.msra.mxu3 %v3046_v53 }
  0x1d   : > { %v462_v44 = vld [vmem:[%s3721_s28 + $0xa8] sm:$0xff]  ;;  %v461_v45 = vld [vmem:[%s3721_s28 + $0xa0] sm:$0xff]  ;;  %v524_v46 = vld [vmem:[%s3736_s13 + $0x98] sm:$0xff] }
  0x1e   : > { %v463_v50 = vld [vmem:[%s3721_s28 + $0xb0] sm:$0xff]  ;;  %v526_v51 = vld [vmem:[%s3736_s13 + $0xa8] sm:$0xff]  ;;  %v525_v52 = vld [vmem:[%s3736_s13 + $0xa0] sm:$0xff] }
  0x1f   : > { %v528_v58 = vld [vmem:[%s3736_s13 + $0xb8] sm:$0xff]  ;;  %v527_v59 = vld [vmem:[%s3736_s13 + $0xb0] sm:$0xff]  ;;  %1641 = vmatpush.bf16.msra.mxu0 %v3045_v56  ;;  %v529_v2 = vld [vmem:[%s3736_s13 + $0xc0] sm:$0xff] }
  0x20   : > { %v464_v60 = vld [vmem:[%s3721_s28 + $0xb8] sm:$0xff]  ;;  %3070 = vmatpush.bf16.msra.mxu3 %v3045_v56  ;;  %v466_v3 = vld [vmem:[%s3721_s28 + $0xc8] sm:$0xff]  ;;  %v465_v4 = vld [vmem:[%s3721_s28 + $0xc0] sm:$0xff] }
  0x21   : > { %612 = vperm.xlu2 %3101, %v449_v8   ;;  %607 = vperm.xlu1 %3100, %v448_v9   ;;  %v3042_v5 = vld [vmem:[%s5034_s4] sm:$0xff]  ;;  %v468_v9 = vld [vmem:[%s3721_s28 + $0xd8] sm:$0xff] }
  0x22   : > { %602 = vperm.xlu0 %3099, %v447_v10   ;;  %v467_v10 = vld [vmem:[%s3721_s28 + $0xd0] sm:$0xff] }
  0x23   : > { %1642 = vmatpush.bf16.msra.mxu0 %v3044_v61 }
  0x24   : > { %3071 = vmatpush.bf16.msra.mxu3 %v3044_v61 }
  0x27   : > { %1643 = vmatpush.bf16.msra.mxu0 %v3043_v0 }
  0x28   : > { %3072 = vmatpush.bf16.msra.mxu3 %v3043_v0 }
  0x29   : > { %958 = vperm.xlu2 %3101, %v505_v11   ;;  %622 = vperm.xlu1 %3100, %v451_v12   ;;  %v530_v11 = vld [vmem:[%s3736_s13 + $0xc8] sm:$0xff]  ;;  %v3824_v12 = vld [vmem:[%s5032_s2] ss:$0 sm:$0xff] }
  0x2a   : > { %617 = vperm.xlu0 %3099, %v450_v13   ;;  %v3829_v13 = vld [vmem:[%s5032_s2 + $0x1] ss:$0 sm:$0xff] }
  0x2b   : > { %1644 = vmatpush.bf16.msra.mxu0 %v3042_v5 }
  0x2c   : > { %3073 = vmatpush.bf16.msra.mxu3 %v3042_v5 }
  0x31   : > { %968 = vperm.xlu2 %3101, %v507_v14   ;;  %627 = vperm.xlu1 %3100, %v452_v15  }
  0x32   : > { %963 = vperm.xlu0 %3099, %v506_v16  }
  0x39   : > { %978 = vperm.xlu2 %3101, %v509_v17   ;;  %632 = vperm.xlu1 %3100, %v453_v18  }
  0x3a   : > { %973 = vperm.xlu0 %3099, %v508_v19   ;;  %v469_v19 = vld [vmem:[%s3721_s28 + $0xe0] sm:$0xff] }
  0x41   : > { %993 = vperm.xlu2 %3101, %v512_v20   ;;  %988 = vperm.xlu1 %3100, %v511_v21   ;;  %v532_v20 = vld [vmem:[%s3736_s13 + $0xd8] sm:$0xff]  ;;  %v531_v21 = vld [vmem:[%s3736_s13 + $0xd0] sm:$0xff] }
  0x42   : > { %983 = vperm.xlu0 %3099, %v510_v22   ;;  %v3845_v22 = vld [vmem:[%s5033_s3] ss:$0 sm:$0xff] }
  0x49   : > { %1003 = vperm.xlu2 %3101, %v514_v23   ;;  %998 = vperm.xlu1 %3100, %v513_v24  }
  0x4a   : > { %637 = vperm.xlu0 %3099, %v454_v25  }
  0x51   : > { %1013 = vperm.xlu2 %3101, %v516_v26   ;;  %1008 = vperm.xlu1 %3100, %v515_v27  }
  0x52   : > { %642 = vperm.xlu0 %3099, %v455_v28  }
  0x59   : > { %647 = vperm.xlu2 %3101, %v456_v29   ;;  %1023 = vperm.xlu1 %3100, %v518_v30   ;;  %v534_v30 = vld [vmem:[%s3736_s13 + $0xe8] sm:$0xff] }
  0x5a   : > { %1018 = vperm.xlu0 %3099, %v517_v31   ;;  %v533_v31 = vld [vmem:[%s3736_s13 + $0xe0] sm:$0xff] }
  0x61   : > { %652 = vperm.xlu2 %3101, %v457_v32   ;;  %1033 = vperm.xlu1 %3100, %v520_v33   ;;  %v470_v33 = vld [vmem:[%s3721_s28 + $0xe8] sm:$0xff] }
  0x62   : > { %1028 = vperm.xlu0 %3099, %v519_v34  }
  0x69   : > { %1043 = vperm.xlu2 %3101, %v522_v35   ;;  %1038 = vperm.xlu1 %3100, %v521_v36  }
  0x6a   : > { %657 = vperm.xlu0 %3099, %v458_v37  }
  0x6b   : > { %v3765_v38 = vpop.permute.xlu2 %592 }
  0x71   : > { %1048 = vperm.xlu2 %3101, %v523_v39   ;;  %667 = vperm.xlu1 %3100, %v460_v40   ;;  %v535_v40 = vld [vmem:[%s3736_s13 + $0xf0] sm:$0xff] }
  0x72   : > { %662 = vperm.xlu0 %3099, %v459_v41   ;;  %v472_v41 = vld [vmem:[%s3721_s28 + $0xf8] sm:$0xff] }
  0x73   : > { %v3770_v42 = vpop.permute.xlu2 %597 }
  0x79   : > { %677 = vperm.xlu2 %3101, %v462_v44   ;;  %672 = vperm.xlu1 %3100, %v461_v45   ;;  %v471_v45 = vld [vmem:[%s3721_s28 + $0xf0] sm:$0xff] }
  0x7a   : > { %1053 = vperm.xlu0 %3099, %v524_v46  }
  0x7b   : > { %v3781_v48 = vpop.permute.xlu2 %612 }
  0x81   : > { %682 = vperm.xlu2 %3101, %v463_v50   ;;  %1063 = vperm.xlu1 %3100, %v526_v51  }
  0x82   : > { %1058 = vperm.xlu0 %3099, %v525_v52  }
  0x83   : > { %v959_v54 = vpop.permute.xlu2 %958  ;;  %v3792_v55 = vpop.permute.xlu1 %582 }
  0x84   : > { %v573_v57 = vpop.permute.xlu0 %572  ;;  %v1277_v17 = vmul.f32 %v3829_v13, %v959_v54  ;;  %v893_v49 = vmul.f32 %v3824_v12, %v3792_v55  ;;  %v536_v55 = vld [vmem:[%s3736_s13 + $0xf8] sm:$0xff] }
  0x85   : > { %v891_v18 = vmul.f32 %v3824_v12, %v573_v57 }
  0x87   : > { %v1341_v23 = vadd.f32 %v1277_v17, %v891_v18 }
  0x89   : > { %1073 = vperm.xlu2 %3101, %v528_v58   ;;  %1068 = vperm.xlu1 %3100, %v527_v59   ;;  %v1409_v29 = vadd.f32 %v3845_v22, %v1341_v23  ;;  %v490_v58 = vld [vmem:[%s3721_s28 + $0x188] sm:$0xff]  ;;  %v489_v59 = vld [vmem:[%s3721_s28 + $0x180] sm:$0xff] }
  0x8a   : > { %687 = vperm.xlu0 %3099, %v464_v60   ;;  %v538_v23 = vld [vmem:[%s3736_s13 + $0x108] sm:$0xff] }
  0x8b   : > { %v969_v62 = vpop.permute.xlu2 %968  ;;  %v588_v63 = vpop.permute.xlu1 %587  ;;  %3110 = vtanh.f32 %v1409_v29 }
  0x8c   : > { %v578_v1 = vpop.permute.xlu0 %577  ;;  %v1279_v43 = vmul.f32 %v3829_v13, %v969_v62  ;;  %v894_v44 = vmul.f32 %v3824_v12, %v588_v63 }
  0x8d   : > { %v892_v27 = vmul.f32 %v3824_v12, %v578_v1  ;;  %v473_v1 = vld [vmem:[%s3721_s28 + $0x100] sm:$0xff] }
  0x8e   : > { %v1343_v52 = vadd.f32 %v1279_v43, %v893_v49 }
  0x90   : > { %v1411_v60 = vadd.f32 %v3845_v22, %v1343_v52  ;;  %v556_v52 = vld [vmem:[%s3736_s13 + $0x198] sm:$0xff] }
  0x91   : > { %1078 = vperm.xlu2 %3101, %v529_v2   ;;  %697 = vperm.xlu1 %3100, %v466_v3   ;;  %v3111_v46 = vpop.eup %3110  ;;  %v554_v2 = vld [vmem:[%s3736_s13 + $0x188] sm:$0xff] }
  0x92   : > { %692 = vperm.xlu0 %3099, %v465_v4   ;;  %v896_v4 = vmul.f32 %v3824_v12, %v3770_v42 }
  0x93   : > { %v3812_v6 = vpop.permute.xlu2 %978  ;;  %v3814_v7 = vpop.permute.xlu1 %607 }
  0x94   : > { %v3816_v8 = vpop.permute.xlu0 %602  ;;  %v1281_v5 = vmul.f32 %v3829_v13, %v3812_v6  ;;  %v898_v43 = vmul.f32 %v3824_v12, %v3814_v7 }
  0x99   : > { %707 = vperm.xlu2 %3101, %v468_v9   ;;  %702 = vperm.xlu1 %3100, %v467_v10   ;;  %v553_v9 = vld [vmem:[%s3736_s13 + $0x180] sm:$0xff] }
  0x9a   : > { %1083 = vperm.xlu0 %3099, %v530_v11   ;;  %v895_v11 = vmul.f32 %v3824_v12, %v3765_v38 }
  0x9b   : > { %v3831_v14 = vpop.permute.xlu2 %993  ;;  %v3833_v15 = vpop.permute.xlu1 %622 }
  0x9c   : > { %v3835_v16 = vpop.permute.xlu0 %617 }
  0xa1   : > { %712 = vperm.xlu2 %3101, %v469_v19   ;;  %1093 = vperm.xlu1 %3100, %v532_v20   ;;  %v1345_v19 = vadd.f32 %v1281_v5, %v895_v11 }
  0xa2   : > { %1088 = vperm.xlu0 %3099, %v531_v21  }
  0xa3   : > { %v3847_v24 = vpop.permute.xlu2 %1003  ;;  %v3849_v25 = vpop.permute.xlu1 %627  ;;  %v1413_v38 = vadd.f32 %v3845_v22, %v1345_v19  ;;  %v494_v19 = vld [vmem:[%s3721_s28 + $0x1a8] sm:$0xff] }
  0xa4   : > { %v964_v26 = vpop.permute.xlu0 %963 }
  0xa5   : > { %v1278_v28 = vmul.f32 %v3829_v13, %v964_v26  ;;  %v537_v26 = vld [vmem:[%s3736_s13 + $0x100] sm:$0xff] }
  0xa7   : > { %v1342_v32 = vadd.f32 %v1278_v28, %v892_v27  ;;  %v474_v27 = vld [vmem:[%s3721_s28 + $0x108] sm:$0xff] }
  0xa9   : > { %v1410_v34 = vadd.f32 %v3845_v22, %v1342_v32  ;;  %1103 = vperm.xlu2 %3101, %v534_v30   ;;  %1098 = vperm.xlu1 %3100, %v533_v31   ;;  %v555_v32 = vld [vmem:[%s3736_s13 + $0x190] sm:$0xff] }
  0xaa   : > { %717 = vperm.xlu0 %3099, %v470_v33   ;;  %v492_v33 = vld [vmem:[%s3721_s28 + $0x198] sm:$0xff] }
  0xab   : > { %3112 = vtanh.f32 %v1410_v34  ;;  %v3858_v35 = vpop.permute.xlu2 %1013  ;;  %v3860_v36 = vpop.permute.xlu1 %632 }
  0xac   : > { %v974_v37 = vpop.permute.xlu0 %973 }
  0xad   : > { %v1280_v39 = vmul.f32 %v3829_v13, %v974_v37  ;;  %v897_v37 = vmul.f32 %v3824_v12, %v3816_v8 }
  0xaf   : > { %v1344_v50 = vadd.f32 %v1280_v39, %v894_v44  ;;  %v1284_v39 = vmul.f32 %v3829_v13, %v3831_v14 }
  0xb1   : > { %v3113_v47 = vpop.eup %3112  ;;  %1108 = vperm.xlu2 %3101, %v535_v40   ;;  %727 = vperm.xlu1 %3100, %v472_v41   ;;  %v1412_v57 = vadd.f32 %v3845_v22, %v1344_v50  ;;  %v491_v40 = vld [vmem:[%s3721_s28 + $0x190] sm:$0xff]  ;;  %v476_v50 = vld [vmem:[%s3721_s28 + $0x118] sm:$0xff] }
  0xb2   : > { %722 = vperm.xlu0 %3099, %v471_v45   ;;  %v1537_v51 = vpack.c.bf16 %v3113_v47, %v3111_v46  ;;  %v1348_v46 = vadd.f32 %v1284_v39, %v898_v43 }
  0xb3   : > { %v3870_v53 = vpop.permute.xlu2 %647  ;;  %v989_v54 = vpop.permute.xlu1 %988  ;;  %3114 = vtanh.f32 %v1412_v57 }
  0xb4   : > { %1645 = vmatmul.bf16.vlgmr.msra.gmra.mxu0 %v1537_v51  ;;  %v984_v56 = vpop.permute.xlu0 %983  ;;  %3116 = vtanh.f32 %v1411_v60  ;;  %v1283_v31 = vmul.f32 %v3829_v13, %v989_v54  ;;  %v475_v51 = vld [vmem:[%s3721_s28 + $0x110] sm:$0xff]  ;;  %v1416_v7 = vadd.f32 %v3845_v22, %v1348_v46  ;;  %v540_v60 = vld [vmem:[%s3736_s13 + $0x118] sm:$0xff] }
  0xb5   : > { %v1282_v0 = vmul.f32 %v3829_v13, %v984_v56  ;;  %v496_v46 = vld [vmem:[%s3721_s28 + $0x1b8] sm:$0xff] }
  0xb6   : > { %v1347_v44 = vadd.f32 %v1283_v31, %v897_v37  ;;  %v478_v31 = vld [vmem:[%s3721_s28 + $0x128] sm:$0xff]  ;;  %v477_v37 = vld [vmem:[%s3721_s28 + $0x120] sm:$0xff] }
  0xb7   : > { %v1346_v17 = vadd.f32 %v1282_v0, %v896_v4  ;;  %v899_v0 = vmul.f32 %v3824_v12, %v3781_v48  ;;  %v900_v4 = vmul.f32 %v3824_v12, %v3835_v16 }
  0xb8   : > { %v1415_v49 = vadd.f32 %v3845_v22, %v1347_v44 }
  0xb9   : > { %817 = vperm.xlu2 %3101, %v490_v58   ;;  %812 = vperm.xlu1 %3100, %v489_v59   ;;  %v3115_v3 = vpop.eup %3114  ;;  %v1414_v21 = vadd.f32 %v3845_v22, %v1346_v17  ;;  %v493_v59 = vld [vmem:[%s3721_s28 + $0x1a0] sm:$0xff]  ;;  %v558_v17 = vld [vmem:[%s3736_s13 + $0x1a8] sm:$0xff] }
  0xba   : > { %1113 = vperm.xlu0 %3099, %v536_v55   ;;  %v3117_v10 = vpop.eup %3116 }
  0xbb   : > { %v3877_v61 = vpop.permute.xlu2 %652  ;;  %v3879_v62 = vpop.permute.xlu1 %998  ;;  %v1538_v18 = vpack.c.bf16 %v3115_v3, %v3117_v10  ;;  %3118 = vtanh.f32 %v1414_v21 }
  0xbc   : > { %v3881_v63 = vpop.permute.xlu0 %637  ;;  %3120 = vtanh.f32 %v1413_v38  ;;  %v1285_v58 = vmul.f32 %v3829_v13, %v3879_v62 }
  0xbd   : > { %3122 = vtanh.f32 %v1415_v49  ;;  %v495_v49 = vld [vmem:[%s3721_s28 + $0x1b0] sm:$0xff] }
  0xbe   : > { %3124 = vtanh.f32 %v1416_v7  ;;  %v1349_v5 = vadd.f32 %v1285_v58, %v899_v0 }
  0xc1   : > { %732 = vperm.xlu2 %3101, %v473_v1   ;;  %1203 = vperm.xlu1 %3100, %v554_v2   ;;  %v3119_v34 = vpop.eup %3118  ;;  %v1286_v1 = vmul.f32 %v3829_v13, %v3847_v24  ;;  %v539_v2 = vld [vmem:[%s3736_s13 + $0x110] sm:$0xff]  ;;  %v1417_v24 = vadd.f32 %v3845_v22, %v1349_v5  ;;  %v560_v5 = vld [vmem:[%s3736_s13 + $0x1b8] sm:$0xff] }
  0xc2   : > { %1198 = vperm.xlu0 %3099, %v553_v9   ;;  %v3121_v41 = vpop.eup %3120 }
  0xc3   : > { %v3893_v20 = vpop.permute.xlu2 %1043  ;;  %v3895_v42 = vpop.permute.xlu1 %1008  ;;  %v1539_v45 = vpack.c.bf16 %v3119_v34, %v3121_v41  ;;  %v1350_v9 = vadd.f32 %v1286_v1, %v900_v4  ;;  %3126 = vtanh.f32 %v1417_v24  ;;  %v1288_v34 = vmul.f32 %v3829_v13, %v3858_v35  ;;  %v479_v4 = vld [vmem:[%s3721_s28 + $0x130] sm:$0xff] }
  0xc4   : > { %1650 = vmatmul.bf16.gmra.mxu0 %v1538_v18  ;;  %v3897_v6 = vpop.permute.xlu0 %642  ;;  %v3123_v55 = vpop.eup %3122  ;;  %v557_v18 = vld [vmem:[%s3736_s13 + $0x1a0] sm:$0xff]  ;;  %v1287_v38 = vmul.f32 %v3829_v13, %v3895_v42 }
  0xc5   : > { %v3125_v3 = vpop.eup %3124  ;;  %v1418_v16 = vadd.f32 %v3845_v22, %v1350_v9  ;;  %v559_v9 = vld [vmem:[%s3736_s13 + $0x1b0] sm:$0xff] }
  0xc6   : > { %v1540_v62 = vpack.c.bf16 %v3125_v3, %v3123_v55 }
  0xc7   : > { %3128 = vtanh.f32 %v1418_v16 }
  0xc9   : > { %1123 = vperm.xlu2 %3101, %v538_v23   ;;  %1118 = vperm.xlu1 %3100, %v537_v26  }
  0xca   : > { %737 = vperm.xlu0 %3099, %v474_v27   ;;  %v541_v27 = vld [vmem:[%s3736_s13 + $0x120] sm:$0xff] }
  0xcb   : > { %v3904_v28 = vpop.permute.xlu2 %1048  ;;  %v3906_v29 = vpop.permute.xlu1 %1023 }
  0xcc   : > { %v3908_v30 = vpop.permute.xlu0 %1018 }
  0xcd   : > { %v1289_v55 = vmul.f32 %v3829_v13, %v3908_v30 }
  0xd1   : > { %1208 = vperm.xlu2 %3101, %v555_v32   ;;  %827 = vperm.xlu1 %3100, %v492_v33   ;;  %v3127_v32 = vpop.eup %3126  ;;  %v901_v33 = vmul.f32 %v3824_v12, %v3833_v15 }
  0xd2   : > { %822 = vperm.xlu0 %3099, %v491_v40   ;;  %v3129_v39 = vpop.eup %3128  ;;  %v902_v40 = vmul.f32 %v3824_v12, %v3849_v25  ;;  %v542_v25 = vld [vmem:[%s3736_s13 + $0x128] sm:$0xff] }
  0xd3   : > { %v3920_v47 = vpop.permute.xlu2 %677  ;;  %v3922_v8 = vpop.permute.xlu1 %1033  ;;  %v1351_v41 = vadd.f32 %v1287_v38, %v901_v33  ;;  %v1541_v42 = vpack.c.bf16 %v3129_v39, %v3127_v32 }
  0xd4   : > { %1655 = vmatmul.bf16.gmra.mxu0 %v1539_v45  ;;  %v3924_v14 = vpop.permute.xlu0 %1028  ;;  %v1352_v43 = vadd.f32 %v1288_v34, %v902_v40  ;;  %v544_v34 = vld [vmem:[%s3736_s13 + $0x138] sm:$0xff] }
  0xd5   : > { %v1419_v35 = vadd.f32 %v3845_v22, %v1351_v41  ;;  %v480_v40 = vld [vmem:[%s3721_s28 + $0x138] sm:$0xff] }
  0xd7   : > { %3130 = vtanh.f32 %v1419_v35 }
  0xd9   : > { %747 = vperm.xlu2 %3101, %v476_v50   ;;  %742 = vperm.xlu1 %3100, %v475_v51   ;;  %v1420_v50 = vadd.f32 %v3845_v22, %v1352_v43 }
  0xda   : > { %1213 = vperm.xlu0 %3099, %v556_v52   ;;  %v1290_v52 = vmul.f32 %v3829_v13, %v3906_v29 }
  0xdb   : > { %v3931_v54 = vpop.permute.xlu2 %682  ;;  %v3933_v56 = vpop.permute.xlu1 %1038  ;;  %3132 = vtanh.f32 %v1420_v50 }
  0xdc   : > { %v3935_v57 = vpop.permute.xlu0 %657  ;;  %v913_v58 = vmul.f32 %v3824_v12, %v3931_v54  ;;  %v903_v54 = vmul.f32 %v3824_v12, %v3860_v36 }
  0xdd   : > { %v3131_v29 = vpop.eup %3130 }
  0xe1   : > { %832 = vperm.xlu2 %3101, %v493_v59   ;;  %1133 = vperm.xlu1 %3100, %v540_v60   ;;  %v3133_v30 = vpop.eup %3132 }
  0xe2   : > { %1128 = vperm.xlu0 %3099, %v539_v2   ;;  %v904_v2 = vmul.f32 %v3824_v12, %v3881_v63  ;;  %v1542_v63 = vpack.c.bf16 %v3133_v30, %v3131_v29 }
  0xe3   : > { %v1074_v10 = vpop.permute.xlu2 %1073  ;;  %v3948_v11 = vpop.permute.xlu1 %667 }
  0xe4   : > { %1660 = vmatmul.bf16.gmra.mxu0 %v1540_v62  ;;  %v3950_v48 = vpop.permute.xlu0 %662  ;;  %v1300_v0 = vmul.f32 %v3829_v13, %v1074_v10  ;;  %v1354_v24 = vadd.f32 %v1290_v52, %v904_v2  ;;  %v905_v2 = vmul.f32 %v3824_v12, %v3897_v6 }
  0xe9   : > { %1223 = vperm.xlu2 %3101, %v558_v17   ;;  %1218 = vperm.xlu1 %3100, %v557_v18   ;;  %v1353_v18 = vadd.f32 %v1289_v55, %v903_v54 }
  0xea   : > { %837 = vperm.xlu0 %3099, %v494_v19   ;;  %v1422_v19 = vadd.f32 %v3845_v22, %v1354_v24 }
  0xeb   : > { %v3957_v21 = vpop.permute.xlu2 %1078  ;;  %v3959_v23 = vpop.permute.xlu1 %672 }
  0xec   : > { %v3961_v26 = vpop.permute.xlu0 %1053  ;;  %v1301_v32 = vmul.f32 %v3829_v13, %v3957_v21 }
  0xf1   : > { %1138 = vperm.xlu2 %3101, %v541_v27   ;;  %757 = vperm.xlu1 %3100, %v478_v31   ;;  %v3057_v27 = vld [vmem:[%s5036_s6 + $0x38] sm:$0xff]  ;;  %v1421_v31 = vadd.f32 %v3845_v22, %v1353_v18 }
  0xf2   : > { %752 = vperm.xlu0 %3099, %v477_v37   ;;  %v543_v37 = vld [vmem:[%s3736_s13 + $0x130] sm:$0xff]  ;;  %1970 = vmatpush.bf16.msra.mxu1 %v3057_v27  ;;  %v3053_v18 = vld [vmem:[%s5036_s6 + $0x18] sm:$0xff] }
  0xf3   : > { %v3974_v44 = vpop.permute.xlu2 %707  ;;  %v3976_v15 = vpop.permute.xlu1 %1063  ;;  %3074 = vmatpush.bf16.msrb.mxu3 %v3057_v27  ;;  %v481_v27 = vld [vmem:[%s3721_s28 + $0x140] sm:$0xff] }
  0xf4   : > { %1665 = vmatmul.bf16.gmra.mxu0 %v1541_v42  ;;  %v3978_v45 = vpop.permute.xlu0 %1058  ;;  %v3056_v42 = vld [vmem:[%s5036_s6 + $0x30] sm:$0xff]  ;;  %v918_v24 = vmul.f32 %v3824_v12, %v3974_v44  ;;  %v562_v44 = vld [vmem:[%s3736_s13 + $0x1c8] sm:$0xff] }
  0xf6   : > { %1971 = vmatpush.bf16.msra.mxu1 %v3056_v42 }
  0xf7   : > { %3075 = vmatpush.bf16.msrb.mxu3 %v3056_v42 }
  0xf9   : > { %847 = vperm.xlu2 %3101, %v496_v46   ;;  %842 = vperm.xlu1 %3100, %v495_v49   ;;  %v1292_v49 = vmul.f32 %v3829_v13, %v3922_v8  ;;  %v498_v8 = vld [vmem:[%s3721_s28 + $0x1c8] sm:$0xff] }
  0xfa   : > { %1143 = vperm.xlu0 %3099, %v542_v25   ;;  %v3055_v25 = vld [vmem:[%s5036_s6 + $0x28] sm:$0xff] }
  0xfb   : > { %v3985_v51 = vpop.permute.xlu2 %712  ;;  %v1069_v7 = vpop.permute.xlu1 %1068  ;;  %1972 = vmatpush.bf16.msra.mxu1 %v3055_v25  ;;  %3076 = vmatpush.bf16.msrb.mxu3 %v3055_v25 }
  0xfc   : > { %v1299_v59 = vmul.f32 %v3829_v13, %v1069_v7  ;;  %v688_v60 = vpop.permute.xlu0 %687  ;;  %v1291_v7 = vmul.f32 %v3829_v13, %v3924_v14 }
  0xfd   : > { %v914_v1 = vmul.f32 %v3824_v12, %v688_v60  ;;  %v906_v60 = vmul.f32 %v3824_v12, %v3870_v53 }
  0xfe   : > { %v1363_v3 = vadd.f32 %v1299_v59, %v913_v58  ;;  %v1355_v29 = vadd.f32 %v1291_v7, %v905_v2  ;;  %v1294_v2 = vmul.f32 %v3829_v13, %v3893_v20 }
  0xff   : > { %v1364_v62 = vadd.f32 %v1300_v0, %v914_v1  ;;  %v561_v0 = vld [vmem:[%s3736_s13 + $0x1c0] sm:$0xff]  ;;  %v1356_v14 = vadd.f32 %v1292_v49, %v906_v60  ;;  %v1293_v49 = vmul.f32 %v3829_v13, %v3933_v56 }
 0x100   : > { %v1431_v17 = vadd.f32 %v3845_v22, %v1363_v3 }
 0x101   : > { %v1432_v10 = vadd.f32 %v3845_v22, %v1364_v62  ;;  %762 = vperm.xlu2 %3101, %v479_v4   ;;  %1233 = vperm.xlu1 %3100, %v560_v5   ;;  %v497_v4 = vld [vmem:[%s3721_s28 + $0x1c0] sm:$0xff] }
 0x102   : > { %3134 = vtanh.f32 %v1431_v17  ;;  %1228 = vperm.xlu0 %3099, %v559_v9   ;;  %v3054_v5 = vld [vmem:[%s5036_s6 + $0x20] sm:$0xff]  ;;  %v1424_v9 = vadd.f32 %v3845_v22, %v1356_v14 }
 0x103   : > { %3136 = vtanh.f32 %v1432_v10  ;;  %v4005_v16 = vpop.permute.xlu2 %1103  ;;  %v698_v36 = vpop.permute.xlu1 %697  ;;  %1973 = vmatpush.bf16.msra.mxu1 %v3054_v5  ;;  %3077 = vmatpush.bf16.msrb.mxu3 %v3054_v5  ;;  %v1423_v10 = vadd.f32 %v3845_v22, %v1355_v29 }
 0x104   : > { %1670 = vmatmul.bf16.gmra.mxu0 %v1542_v63  ;;  %v693_v38 = vpop.permute.xlu0 %692  ;;  %3138 = vtanh.f32 %v1422_v19  ;;  %v916_v52 = vmul.f32 %v3824_v12, %v698_v36 }
 0x105   : > { %v915_v33 = vmul.f32 %v3824_v12, %v693_v38  ;;  %3140 = vtanh.f32 %v1421_v31  ;;  %v482_v38 = vld [vmem:[%s3721_s28 + $0x148] sm:$0xff] }
 0x107   : > { %v1365_v39 = vadd.f32 %v1301_v32, %v915_v33  ;;  %1974 = vmatpush.bf16.msra.mxu1 %v3053_v18  ;;  %3078 = vmatpush.bf16.msrb.mxu3 %v3053_v18 }
 0x108   : > { %v4018_v41 = vpop.eup %3134 }
 0x109   : > { %v4023_v43 = vpop.eup %3136  ;;  %1153 = vperm.xlu2 %3101, %v544_v34   ;;  %1148 = vperm.xlu1 %3100, %v543_v37   ;;  %v1433_v55 = vadd.f32 %v3845_v22, %v1365_v39  ;;  %v3052_v34 = vld [vmem:[%s5036_s6 + $0x10] sm:$0xff] }
 0x10a   : > { %767 = vperm.xlu0 %3099, %v480_v40   ;;  %v1548_v21 = vpack.c.bf16 %v4023_v43, %v4018_v41  ;;  %v3139_v59 = vpop.eup %3138 }
 0x10b   : > { %v4027_v35 = vpop.permute.xlu2 %1108  ;;  %v703_v46 = vpop.permute.xlu1 %702  ;;  %3142 = vtanh.f32 %v1433_v55  ;;  %1975 = vmatpush.bf16.msra.mxu1 %v3052_v34  ;;  %3079 = vmatpush.bf16.msrb.mxu3 %v3052_v34 }
 0x10c   : > { %v1084_v50 = vpop.permute.xlu0 %1083  ;;  %v3141_v1 = vpop.eup %3140  ;;  %v917_v63 = vmul.f32 %v3824_v12, %v703_v46  ;;  %v1307_v18 = vmul.f32 %v3829_v13, %v4027_v35 }
 0x10d   : > { %v1302_v58 = vmul.f32 %v3829_v13, %v1084_v50  ;;  %v1543_v54 = vpack.c.bf16 %v3139_v59, %v3141_v1  ;;  %v919_v50 = vmul.f32 %v3824_v12, %v3985_v51  ;;  %v1306_v59 = vmul.f32 %v3829_v13, %v4005_v16 }
 0x10e   : > { %v907_v51 = vmul.f32 %v3824_v12, %v3877_v61  ;;  %v3050_v61 = vld [vmem:[%s5036_s6] sm:$0xff] }
 0x10f   : > { %v1366_v3 = vadd.f32 %v1302_v58, %v916_v52  ;;  %v3051_v52 = vld [vmem:[%s5036_s6 + $0x8] sm:$0xff]  ;;  %v908_v58 = vmul.f32 %v3824_v12, %v3935_v57 }
 0x110   : > { %1976 = vmatpush.bf16.msra.mxu1 %v3051_v52  ;;  %3080 = vmatpush.bf16.msrb.mxu3 %v3051_v52  ;;  %v1357_v16 = vadd.f32 %v1293_v49, %v907_v51  ;;  %v1295_v49 = vmul.f32 %v3829_v13, %v3904_v28  ;;  %v910_v52 = vmul.f32 %v3824_v12, %v3948_v11  ;;  %v4145_v28 = vld [vmem:[%s5035_s5] ss:$0 sm:$0xff] }
 0x111   : > { %v1434_v53 = vadd.f32 %v3845_v22, %v1366_v3  ;;  %1238 = vperm.xlu2 %3101, %v561_v0   ;;  %857 = vperm.xlu1 %3100, %v498_v8   ;;  %v4065_v32 = vpop.eup %3142  ;;  %v499_v0 = vld [vmem:[%s3721_s28 + $0x1d0] sm:$0xff]  ;;  %v546_v8 = vld [vmem:[%s3736_s13 + $0x148] sm:$0xff]  ;;  %v1358_v29 = vadd.f32 %v1294_v2, %v908_v58 }
 0x112   : > { %852 = vperm.xlu0 %3099, %v497_v4   ;;  %v545_v4 = vld [vmem:[%s3736_s13 + $0x140] sm:$0xff]  ;;  %v547_v58 = vld [vmem:[%s3736_s13 + $0x150] sm:$0xff] }
 0x113   : > { %3144 = vtanh.f32 %v1434_v53  ;;  %v4050_v6 = vpop.permute.xlu2 %817  ;;  %v1094_v62 = vpop.permute.xlu1 %1093 }
 0x114   : > { %v1304_v17 = vmul.f32 %v3829_v13, %v1094_v62  ;;  %1675 = vmatmul.bf16.gmra.mxu0 %v1543_v54  ;;  %v1089_v30 = vpop.permute.xlu0 %1088  ;;  %3146 = vtanh.f32 %v1424_v9  ;;  %1977 = vmatpush.bf16.msra.mxu1 %v3050_v61 }
 0x115   : > { %v1303_v36 = vmul.f32 %v3829_v13, %v1089_v30  ;;  %3148 = vtanh.f32 %v1423_v10  ;;  %3081 = vmatpush.bf16.msrb.mxu3 %v3050_v61  ;;  %v1426_v30 = vadd.f32 %v3845_v22, %v1358_v29 }
 0x116   : > { %v1368_v19 = vadd.f32 %v1304_v17, %v918_v24  ;;  %v1425_v24 = vadd.f32 %v3845_v22, %v1357_v16  ;;  %v940_v16 = vmul.f32 %v3824_v12, %v4050_v6 }
 0x117   : > { %v1367_v31 = vadd.f32 %v1303_v36, %v917_v63  ;;  %v564_v63 = vld [vmem:[%s3736_s13 + $0x1d8] sm:$0xff]  ;;  %v563_v36 = vld [vmem:[%s3736_s13 + $0x1d0] sm:$0xff] }
 0x118   : > { %v1436_v33 = vadd.f32 %v3845_v22, %v1368_v19 }
 0x119   : > { %v4071_v37 = vpop.eup %3144  ;;  %v1435_v39 = vadd.f32 %v3845_v22, %v1367_v31  ;;  %777 = vperm.xlu2 %3101, %v482_v38   ;;  %772 = vperm.xlu1 %3100, %v481_v27   ;;  %v500_v38 = vld [vmem:[%s3721_s28 + $0x1d8] sm:$0xff] }
 0x11a   : > { %3150 = vtanh.f32 %v1436_v33  ;;  %1243 = vperm.xlu0 %3099, %v562_v44   ;;  %v1549_v40 = vpack.c.bf16 %v4071_v37, %v4065_v32  ;;  %v3147_v56 = vpop.eup %3146  ;;  %v909_v44 = vmul.f32 %v3824_v12, %v3950_v48 }
 0x11b   : > { %3152 = vtanh.f32 %v1435_v39  ;;  %v4076_v42 = vpop.permute.xlu2 %732  ;;  %v1099_v46 = vpop.permute.xlu1 %1098  ;;  %v1296_v39 = vmul.f32 %v3829_v13, %v3961_v26  ;;  %v483_v26 = vld [vmem:[%s3721_s28 + $0x150] sm:$0xff] }
 0x11c   : > { %v1305_v25 = vmul.f32 %v3829_v13, %v1099_v46  ;;  %v718_v7 = vpop.permute.xlu0 %717  ;;  %v3149_v1 = vpop.eup %3148 }
 0x11d   : > { %v920_v60 = vmul.f32 %v3824_v12, %v718_v7  ;;  %v1544_v20 = vpack.c.bf16 %v3147_v56, %v3149_v1  ;;  %v1359_v56 = vadd.f32 %v1295_v49, %v909_v44  ;;  %v923_v49 = vmul.f32 %v3824_v12, %v4076_v42  ;;  %v485_v42 = vld [vmem:[%s3721_s28 + $0x160] sm:$0xff] }
 0x11e   : > { %v1369_v55 = vadd.f32 %v1305_v25, %v919_v50 }
 0x11f   : > { %v1370_v3 = vadd.f32 %v1306_v59, %v920_v60  ;;  %v484_v59 = vld [vmem:[%s3721_s28 + $0x158] sm:$0xff]  ;;  %v1427_v1 = vadd.f32 %v3845_v22, %v1359_v56  ;;  %v566_v56 = vld [vmem:[%s3736_s13 + $0x1e8] sm:$0xff] }
 0x120   : > { %v4098_v57 = vpop.eup %3150  ;;  %v1437_v14 = vadd.f32 %v3845_v22, %v1369_v55  ;;  %v1360_v55 = vadd.f32 %v1296_v39, %v910_v52  ;;  %v1297_v52 = vmul.f32 %v3829_v13, %v3978_v45 }
 0x121   : > { %v4104_v5 = vpop.eup %3152  ;;  %v1438_v53 = vadd.f32 %v3845_v22, %v1370_v3  ;;  %862 = vperm.xlu2 %3101, %v499_v0   ;;  %1163 = vperm.xlu1 %3100, %v546_v8  }
 0x122   : > { %3154 = vtanh.f32 %v1437_v14  ;;  %1158 = vperm.xlu0 %3099, %v545_v4   ;;  %v1550_v54 = vpack.c.bf16 %v4098_v57, %v4104_v5  ;;  %v1428_v4 = vadd.f32 %v3845_v22, %v1360_v55 }
 0x123   : > { %3156 = vtanh.f32 %v1438_v53  ;;  %v4109_v62 = vpop.permute.xlu2 %1123  ;;  %v728_v9 = vpop.permute.xlu1 %727 }
 0x124   : > { %1680 = vmatmul.bf16.gmra.mxu0 %v1544_v20  ;;  %v723_v17 = vpop.permute.xlu0 %722  ;;  %3158 = vtanh.f32 %v1425_v24  ;;  %v922_v50 = vmul.f32 %v3824_v12, %v728_v9  ;;  %v502_v24 = vld [vmem:[%s3721_s28 + $0x1e8] sm:$0xff] }
 0x125   : > { %v921_v10 = vmul.f32 %v3824_v12, %v723_v17  ;;  %3160 = vtanh.f32 %v1426_v30  ;;  %v501_v17 = vld [vmem:[%s3721_s28 + $0x1e0] sm:$0xff] }
 0x127   : > { %v1371_v19 = vadd.f32 %v1307_v18, %v921_v10  ;;  %v548_v18 = vld [vmem:[%s3736_s13 + $0x158] sm:$0xff] }
 0x128   : > { %v4119_v27 = vpop.eup %3154 }
 0x129   : > { %v4121_v31 = vpop.eup %3156  ;;  %1253 = vperm.xlu2 %3101, %v564_v63   ;;  %1248 = vperm.xlu1 %3100, %v563_v36   ;;  %v1439_v48 = vadd.f32 %v3845_v22, %v1371_v19 }
 0x12a   : > { %867 = vperm.xlu0 %3099, %v500_v38   ;;  %v1551_v35 = vpack.c.bf16 %v4121_v31, %v4119_v27  ;;  %v3159_v7 = vpop.eup %3158 }
 0x12b   : > { %v4127_v33 = vpop.permute.xlu2 %1208  ;;  %v813_v34 = vpop.permute.xlu1 %812  ;;  %3162 = vtanh.f32 %v1439_v48  ;;  %v1310_v48 = vmul.f32 %v3829_v13, %v4109_v62 }
 0x12c   : > { %v1114_v46 = vpop.permute.xlu0 %1113  ;;  %v3161_v60 = vpop.eup %3160  ;;  %v939_v29 = vmul.f32 %v3824_v12, %v813_v34 }
 0x12d   : > { %v1308_v25 = vmul.f32 %v3829_v13, %v1114_v46  ;;  %v1545_v11 = vpack.c.bf16 %v3161_v60, %v3159_v7  ;;  %v1298_v46 = vmul.f32 %v3829_v13, %v3976_v15  ;;  %v912_v15 = vmul.f32 %v3824_v12, %v3920_v47 }
 0x12f   : > { %v1372_v51 = vadd.f32 %v1308_v25, %v922_v50  ;;  %v1362_v45 = vadd.f32 %v1298_v46, %v912_v15  ;;  %v567_v15 = vld [vmem:[%s3736_s13 + $0x1f0] sm:$0xff] }
 0x131   : > { %v1440_v0 = vadd.f32 %v3845_v22, %v1372_v51  ;;  %v1646_v8 = vpop.f32.mrf.mxu0  ;;  %1168 = vperm.xlu2 %3101, %v547_v58   ;;  %787 = vperm.xlu1 %3100, %v484_v59   ;;  %v4160_v10 = vpop.eup %3162 }
 0x132   : > { %782 = vperm.xlu0 %3099, %v483_v26   ;;  %v1647_v53 = vadd.f32 %v4145_v28, %v1646_v8  ;;  %v911_v26 = vmul.f32 %v3824_v12, %v3959_v23 }
 0x133   : > { %3164 = vtanh.f32 %v1440_v0  ;;  %v4148_v2 = vpop.permute.xlu2 %747  ;;  %v1204_v3 = vpop.permute.xlu1 %1203  ;;  %v565_v0 = vld [vmem:[%s3736_s13 + $0x1e0] sm:$0xff] }
 0x134   : > { %v1326_v14 = vmul.f32 %v3829_v13, %v1204_v3  ;;  %1685 = vmatmul.bf16.gmra.mxu0 %v1545_v11  ;;  %v1199_v61 = vpop.permute.xlu0 %1198  ;;  %3166 = vtanh.f32 %v1427_v1  ;;  %v1361_v1 = vadd.f32 %v1297_v52, %v911_v26 }
 0x135   : > { %v1325_v20 = vmul.f32 %v3829_v13, %v1199_v61  ;;  %3168 = vtanh.f32 %v1428_v4 }
 0x136   : > { %v1390_v9 = vadd.f32 %v1326_v14, %v940_v16  ;;  %3170 = vtanh.f32 %v1647_v53  ;;  %v1430_v53 = vadd.f32 %v3845_v22, %v1362_v45 }
 0x137   : > { %v1389_v30 = vadd.f32 %v1325_v20, %v939_v29 }
 0x138   : > { %v1458_v6 = vadd.f32 %v3845_v22, %v1390_v9  ;;  %v1429_v9 = vadd.f32 %v3845_v22, %v1361_v1 }
 0x139   : > { %v4163_v63 = vpop.eup %3164  ;;  %v1457_v36 = vadd.f32 %v3845_v22, %v1389_v30  ;;  %v1648_v19 = vpop.f32.mrf.mxu0  ;;  %877 = vperm.xlu2 %3101, %v502_v24   ;;  %872 = vperm.xlu1 %3100, %v501_v17   ;;  %v550_v17 = vld [vmem:[%s3736_s13 + $0x168] sm:$0xff]  ;;  %v549_v30 = vld [vmem:[%s3736_s13 + $0x160] sm:$0xff] }
 0x13a   : > { %3172 = vtanh.f32 %v1458_v6  ;;  %v1649_v38 = vadd.f32 %v4145_v28, %v1648_v19  ;;  %1173 = vperm.xlu0 %3099, %v548_v18   ;;  %v1552_v44 = vpack.c.bf16 %v4163_v63, %v4160_v10  ;;  %v3167_v7 = vpop.eup %3166  ;;  %v486_v6 = vld [vmem:[%s3721_s28 + $0x168] sm:$0xff]  ;;  %v1327_v19 = vmul.f32 %v3829_v13, %v4127_v33  ;;  %v3060_v63 = vld [vmem:[%s5038_s8 + $0x10] sm:$0xff] }
 0x13b   : > { %3174 = vtanh.f32 %v1457_v36  ;;  %v4169_v34 = vpop.permute.xlu2 %832  ;;  %v1119_v39 = vpop.permute.xlu1 %1118 }
 0x13c   : > { %3176 = vtanh.f32 %v1649_v38  ;;  %v1309_v50 = vmul.f32 %v3829_v13, %v1119_v39  ;;  %v738_v25 = vpop.permute.xlu0 %737  ;;  %v3169_v59 = vpop.eup %3168 }
 0x13d   : > { %v924_v58 = vmul.f32 %v3824_v12, %v738_v25  ;;  %v3171_v51 = vpop.eup %3170  ;;  %v1546_v16 = vpack.c.bf16 %v3169_v59, %v3167_v7 }
 0x13e   : > { %v1373_v60 = vadd.f32 %v1309_v50, %v923_v49 }
 0x13f   : > { %v1374_v55 = vadd.f32 %v1310_v48, %v924_v58 }
 0x140   : > { %v3173_v8 = vpop.eup %3172  ;;  %v1441_v11 = vadd.f32 %v3845_v22, %v1373_v60  ;;  %v504_v60 = vld [vmem:[%s3721_s28 + $0x1f8] sm:$0xff] }
 0x141   : > { %v3175_v62 = vpop.eup %3174  ;;  %v1442_v3 = vadd.f32 %v3845_v22, %v1374_v55  ;;  %v1651_v4 = vpop.f32.mrf.mxu0  ;;  %792 = vperm.xlu2 %3101, %v485_v42   ;;  %1263 = vperm.xlu1 %3100, %v566_v56  }
 0x142   : > { %v3177_v47 = vpop.eup %3176  ;;  %3178 = vtanh.f32 %v1441_v11  ;;  %1258 = vperm.xlu0 %3099, %v565_v0   ;;  %v1561_v23 = vpack.c.bf16 %v3173_v8, %v3175_v62  ;;  %v1652_v18 = vadd.f32 %v4145_v28, %v1651_v4  ;;  %v4220_v11 = vld [vmem:[%s5032_s2] ss:$0 sm:$0xff]  ;;  %v4227_v62 = vld [vmem:[%s5032_s2 + $0x1] ss:$0 sm:$0xff] }
 0x143   : > { %3180 = vtanh.f32 %v1442_v3  ;;  %v4190_v14 = vpop.permute.xlu2 %1223  ;;  %v828_v61 = vpop.permute.xlu1 %827  ;;  %v1870_v29 = vpack.c.bf16 %v3177_v47, %v3171_v51  ;;  %v503_v51 = vld [vmem:[%s3721_s28 + $0x1f0] sm:$0xff] }
 0x144   : > { %1690 = vmatmul.bf16.gmra.mxu0 %v1546_v16  ;;  %1765 = vmatmul.bf16.vlgmr.msra.gmra.mxu3 %v1561_v23  ;;  %v823_v20 = vpop.permute.xlu0 %822  ;;  %3182 = vtanh.f32 %v1430_v53  ;;  %v942_v52 = vmul.f32 %v3824_v12, %v828_v61 }
 0x145   : > { %1978 = vmatmul.bf16.vlgmr.msra.gmra.mxu1 %v1870_v29  ;;  %v941_v24 = vmul.f32 %v3824_v12, %v823_v20  ;;  %3184 = vtanh.f32 %v1429_v9  ;;  %v487_v29 = vld [vmem:[%s3721_s28 + $0x170] sm:$0xff]  ;;  %v568_v20 = vld [vmem:[%s3736_s13 + $0x1f8] sm:$0xff] }
 0x146   : > { %3186 = vtanh.f32 %v1652_v18 }
 0x147   : > { %v1391_v46 = vadd.f32 %v1327_v19, %v941_v24  ;;  %v4241_v24 = vld [vmem:[%s5033_s3] ss:$0 sm:$0xff] }
 0x148   : > { %v4199_v36 = vpop.eup %3178 }
 0x149   : > { %v4203_v38 = vpop.eup %3180  ;;  %v1653_v39 = vpop.f32.mrf.mxu0  ;;  %1183 = vperm.xlu2 %3101, %v550_v17   ;;  %1178 = vperm.xlu1 %3100, %v549_v30   ;;  %v1459_v59 = vadd.f32 %v3845_v22, %v1391_v46 }
 0x14a   : > { %v1654_v49 = vadd.f32 %v4145_v28, %v1653_v39  ;;  %797 = vperm.xlu0 %3099, %v486_v6   ;;  %v1553_v50 = vpack.c.bf16 %v4203_v38, %v4199_v36  ;;  %v3183_v58 = vpop.eup %3182 }
 0x14b   : > { %v743_v25 = vpop.permute.xlu1 %742  ;;  %v4208_v33 = vpop.permute.xlu2 %1138 }
 0x14c   : > { %3188 = vtanh.f32 %v1654_v49  ;;  %v1214_v7 = vpop.permute.xlu0 %1213  ;;  %v3185_v42 = vpop.eup %3184  ;;  %v925_v4 = vmul.f32 %v4220_v11, %v743_v25  ;;  %v943_v49 = vmul.f32 %v4220_v11, %v4169_v34 }
 0x14d   : > { %v1328_v48 = vmul.f32 %v3829_v13, %v1214_v7  ;;  %v3187_v26 = vpop.eup %3186  ;;  %3190 = vtanh.f32 %v1459_v59  ;;  %v1547_v12 = vpack.c.bf16 %v3183_v58, %v3185_v42  ;;  %v552_v59 = vld [vmem:[%s3736_s13 + $0x178] sm:$0xff]  ;;  %v551_v42 = vld [vmem:[%s3736_s13 + $0x170] sm:$0xff] }
 0x14f   : > { %v1392_v56 = vadd.f32 %v1328_v48, %v942_v52  ;;  %v1330_v52 = vmul.f32 %v4227_v62, %v4190_v14 }
 0x151   : > { %v1460_v55 = vadd.f32 %v3845_v22, %v1392_v56  ;;  %v1656_v0 = vpop.f32.mrf.mxu0  ;;  %1268 = vperm.xlu2 %3101, %v567_v15   ;;  %887 = vperm.xlu1 %3100, %v504_v60   ;;  %v926_v22 = vmul.f32 %v4220_v11, %v4148_v2  ;;  %v488_v2 = vld [vmem:[%s3721_s28 + $0x178] sm:$0xff] }
 0x152   : > { %v3189_v8 = vpop.eup %3188  ;;  %882 = vperm.xlu0 %3099, %v503_v51   ;;  %v1657_v47 = vadd.f32 %v4145_v28, %v1656_v0 }
 0x153   : > { %3192 = vtanh.f32 %v1460_v55  ;;  %v1134_v13 = vpop.permute.xlu1 %1133  ;;  %v1871_v45 = vpack.c.bf16 %v3189_v8, %v3187_v26  ;;  %v4233_v23 = vpop.permute.xlu2 %847 }
 0x154   : > { %v1312_v1 = vmul.f32 %v4227_v62, %v1134_v13  ;;  %1695 = vmatmul.bf16.gmra.mxu0 %v1547_v12  ;;  %v1129_v3 = vpop.permute.xlu0 %1128  ;;  %v3191_v9 = vpop.eup %3190  ;;  %3194 = vtanh.f32 %v1657_v47 }
 0x155   : > { %v1311_v16 = vmul.f32 %v4227_v62, %v1129_v3  ;;  %1983 = vmatmul.bf16.gmra.mxu1 %v1871_v45 }
 0x156   : > { %v1376_v61 = vadd.f32 %v1312_v1, %v926_v22  ;;  %v1313_v22 = vmul.f32 %v4227_v62, %v4208_v33 }
 0x157   : > { %v1375_v53 = vadd.f32 %v1311_v16, %v925_v4 }
 0x158   : > { %v1444_v17 = vadd.f32 %v4241_v24, %v1376_v61 }
 0x159   : > { %v3193_v30 = vpop.eup %3192  ;;  %v1443_v18 = vadd.f32 %v4241_v24, %v1375_v53  ;;  %v1658_v6 = vpop.f32.mrf.mxu0  ;;  %807 = vperm.xlu2 %3101, %v488_v2   ;;  %802 = vperm.xlu1 %3100, %v487_v29  }
 0x15a   : > { %3196 = vtanh.f32 %v1444_v17  ;;  %v1659_v19 = vadd.f32 %v4145_v28, %v1658_v6  ;;  %1273 = vperm.xlu0 %3099, %v568_v20   ;;  %v1562_v39 = vpack.c.bf16 %v3193_v30, %v3191_v9  ;;  %v3195_v15 = vpop.eup %3194 }
 0x15b   : > { %3198 = vtanh.f32 %v1443_v18  ;;  %v1219_v46 = vpop.permute.xlu1 %1218  ;;  %v4256_v51 = vpop.permute.xlu2 %762 }
 0x15c   : > { %3200 = vtanh.f32 %v1659_v19  ;;  %v1329_v25 = vmul.f32 %v4227_v62, %v1219_v46  ;;  %1770 = vmatmul.bf16.gmra.mxu3 %v1562_v39  ;;  %v838_v7 = vpop.permute.xlu0 %837  ;;  %v946_v46 = vmul.f32 %v4220_v11, %v4233_v23 }
 0x15d   : > { %v944_v48 = vmul.f32 %v4220_v11, %v838_v7 }
 0x15e   : > { %v1393_v58 = vadd.f32 %v1329_v25, %v943_v49 }
 0x15f   : > { %v1394_v60 = vadd.f32 %v1330_v52, %v944_v48 }
 0x160   : > { %v4254_v56 = vpop.eup %3196  ;;  %v1461_v34 = vadd.f32 %v4241_v24, %v1393_v58 }
 0x161   : > { %v4259_v26 = vpop.eup %3198  ;;  %v1462_v55 = vadd.f32 %v4241_v24, %v1394_v60  ;;  %v1661_v0 = vpop.f32.mrf.mxu0  ;;  %1193 = vperm.xlu1 %3100, %v552_v59  }
 0x162   : > { %v3201_v14 = vpop.eup %3200  ;;  %3202 = vtanh.f32 %v1461_v34  ;;  %1188 = vperm.xlu0 %3099, %v551_v42   ;;  %v1554_v8 = vpack.c.bf16 %v4254_v56, %v4259_v26  ;;  %v1662_v3 = vadd.f32 %v4145_v28, %v1661_v0  ;;  %v929_v0 = vmul.f32 %v4220_v11, %v4256_v51 }
 0x163   : > { %3204 = vtanh.f32 %v1462_v55  ;;  %v758_v12 = vpop.permute.xlu1 %757  ;;  %v1872_v13 = vpack.c.bf16 %v3201_v14, %v3195_v15  ;;  %v1154_v2 = vpop.permute.xlu2 %1153 }
 0x164   : > { %1700 = vmatmul.bf16.gmra.mxu0 %v1548_v21  ;;  %v753_v45 = vpop.permute.xlu0 %752  ;;  %3206 = vtanh.f32 %v1662_v3  ;;  %v928_v21 = vmul.f32 %v4220_v11, %v758_v12 }
 0x165   : > { %v927_v1 = vmul.f32 %v4220_v11, %v753_v45  ;;  %1988 = vmatmul.bf16.gmra.mxu1 %v1872_v13  ;;  %v1316_v13 = vmul.f32 %v4227_v62, %v1154_v2 }
 0x167   : > { %v1377_v4 = vadd.f32 %v1313_v22, %v927_v1 }
 0x168   : > { %v3203_v47 = vpop.eup %3202 }
 0x169   : > { %v3205_v16 = vpop.eup %3204  ;;  %v1663_v61 = vpop.f32.mrf.mxu0  ;;  %v1445_v20 = vadd.f32 %v4241_v24, %v1377_v4 }
 0x16a   : > { %v1664_v29 = vadd.f32 %v4145_v28, %v1663_v61  ;;  %v1563_v53 = vpack.c.bf16 %v3205_v16, %v3203_v47  ;;  %v3207_v17 = vpop.eup %3206 }
 0x16b   : > { %v843_v41 = vpop.permute.xlu1 %842  ;;  %v1239_v49 = vpop.permute.xlu2 %1238 }
 0x16c   : > { %3208 = vtanh.f32 %v1664_v29  ;;  %1775 = vmatmul.bf16.gmra.mxu3 %v1563_v53  ;;  %v1144_v43 = vpop.permute.xlu0 %1143  ;;  %v945_v52 = vmul.f32 %v4220_v11, %v843_v41 }
 0x16d   : > { %v1314_v33 = vmul.f32 %v4227_v62, %v1144_v43  ;;  %3210 = vtanh.f32 %v1445_v20 }
 0x16f   : > { %v1378_v9 = vadd.f32 %v1314_v33, %v928_v21 }
 0x171   : > { %v1446_v30 = vadd.f32 %v4241_v24, %v1378_v9  ;;  %v1666_v18 = vpop.f32.mrf.mxu0 }
 0x172   : > { %v3209_v6 = vpop.eup %3208  ;;  %v1667_v48 = vadd.f32 %v4145_v28, %v1666_v18 }
 0x173   : > { %3212 = vtanh.f32 %v1446_v30  ;;  %v1234_v19 = vpop.permute.xlu1 %1233  ;;  %v1873_v39 = vpack.c.bf16 %v3209_v6, %v3207_v17  ;;  %v4285_v60 = vpop.eup %3210  ;;  %v1333_v17 = vmul.f32 %v4227_v62, %v1239_v49 }
 0x174   : > { %v1332_v25 = vmul.f32 %v4227_v62, %v1234_v19  ;;  %1705 = vmatmul.bf16.gmra.mxu0 %v1549_v40  ;;  %v1229_v7 = vpop.permute.xlu0 %1228  ;;  %3214 = vtanh.f32 %v1667_v48  ;;  %v778_v22 = vpop.permute.xlu2 %777 }
 0x175   : > { %v1331_v58 = vmul.f32 %v4227_v62, %v1229_v7  ;;  %1993 = vmatmul.bf16.gmra.mxu1 %v1873_v39 }
 0x176   : > { %v1396_v59 = vadd.f32 %v1332_v25, %v946_v46 }
 0x177   : > { %v1395_v15 = vadd.f32 %v1331_v58, %v945_v52 }
 0x178   : > { %v1464_v23 = vadd.f32 %v4241_v24, %v1396_v59 }
 0x179   : > { %v4288_v42 = vpop.eup %3212  ;;  %v1463_v32 = vadd.f32 %v4241_v24, %v1395_v15  ;;  %v1668_v37 = vpop.f32.mrf.mxu0 }
 0x17a   : > { %3216 = vtanh.f32 %v1464_v23  ;;  %v1669_v40 = vadd.f32 %v4145_v28, %v1668_v37  ;;  %v1555_v34 = vpack.c.bf16 %v4288_v42, %v4285_v60  ;;  %v3215_v3 = vpop.eup %3214  ;;  %v932_v37 = vmul.f32 %v4220_v11, %v778_v22 }
 0x17b   : > { %3218 = vtanh.f32 %v1463_v32  ;;  %v1149_v55 = vpop.permute.xlu1 %1148 }
 0x17c   : > { %3220 = vtanh.f32 %v1669_v40  ;;  %v1315_v14 = vmul.f32 %v4227_v62, %v1149_v55  ;;  %v768_v12 = vpop.permute.xlu0 %767  ;;  %v863_v30 = vpop.permute.xlu2 %862 }
 0x17d   : > { %v930_v45 = vmul.f32 %v4220_v11, %v768_v12 }
 0x17e   : > { %v1379_v1 = vadd.f32 %v1315_v14, %v929_v0 }
 0x17f   : > { %v1380_v4 = vadd.f32 %v1316_v13, %v930_v45  ;;  %v3065_v13 = vld [vmem:[%s5038_s8 + $0x38] sm:$0xff] }
 0x180   : > { %v3217_v47 = vpop.eup %3216  ;;  %v1447_v16 = vadd.f32 %v4241_v24, %v1379_v1  ;;  %2303 = vmatpush.bf16.msra.mxu2 %v3065_v13  ;;  %3082 = vmatpush.bf16.msra.mxu3 %v3065_v13 }
 0x181   : > { %v3219_v61 = vpop.eup %3218  ;;  %v1448_v29 = vadd.f32 %v4241_v24, %v1380_v4  ;;  %v1671_v53 = vpop.f32.mrf.mxu0  ;;  %v3064_v4 = vld [vmem:[%s5038_s8 + $0x30] sm:$0xff] }
 0x182   : > { %v3221_v51 = vpop.eup %3220  ;;  %3222 = vtanh.f32 %v1447_v16  ;;  %v1564_v41 = vpack.c.bf16 %v3217_v47, %v3219_v61  ;;  %v1672_v20 = vadd.f32 %v4145_v28, %v1671_v53 }
 0x183   : > { %3224 = vtanh.f32 %v1448_v29  ;;  %v858_v43 = vpop.permute.xlu1 %857  ;;  %v1874_v21 = vpack.c.bf16 %v3221_v51, %v3215_v3  ;;  %v949_v29 = vmul.f32 %v4220_v11, %v863_v30 }
 0x184   : > { %1710 = vmatmul.bf16.gmra.mxu0 %v1550_v54  ;;  %1780 = vmatmul.bf16.gmra.mxu3 %v1564_v41  ;;  %v853_v2 = vpop.permute.xlu0 %852  ;;  %3226 = vtanh.f32 %v1672_v20  ;;  %v948_v46 = vmul.f32 %v4220_v11, %v858_v43  ;;  %v1254_v15 = vpop.permute.xlu2 %1253 }
 0x185   : > { %1998 = vmatmul.bf16.gmra.mxu1 %v1874_v21  ;;  %v947_v33 = vmul.f32 %v4220_v11, %v853_v2  ;;  %2304 = vmatpush.bf16.msra.mxu2 %v3064_v4  ;;  %v1336_v43 = vmul.f32 %v4227_v62, %v1254_v15  ;;  %v3063_v2 = vld [vmem:[%s5038_s8 + $0x28] sm:$0xff] }
 0x186   : > { %3083 = vmatpush.bf16.msra.mxu3 %v3064_v4  ;;  %v3058_v4 = vld [vmem:[%s5038_s8] sm:$0xff] }
 0x187   : > { %v1397_v19 = vadd.f32 %v1333_v17, %v947_v33 }
 0x188   : > { %v4306_v9 = vpop.eup %3222 }
 0x189   : > { %v4309_v18 = vpop.eup %3224  ;;  %v1673_v6 = vpop.f32.mrf.mxu0  ;;  %v1465_v49 = vadd.f32 %v4241_v24, %v1397_v19  ;;  %2305 = vmatpush.bf16.msra.mxu2 %v3063_v2 }
 0x18a   : > { %v1674_v39 = vadd.f32 %v4145_v28, %v1673_v6  ;;  %v1556_v57 = vpack.c.bf16 %v4309_v18, %v4306_v9  ;;  %v3227_v52 = vpop.eup %3226  ;;  %3084 = vmatpush.bf16.msra.mxu3 %v3063_v2  ;;  %v4442_v18 = vld [vmem:[%s5035_s5] ss:$0 sm:$0xff] }
 0x18b   : > { %v773_v5 = vpop.permute.xlu1 %772 }
 0x18c   : > { %3228 = vtanh.f32 %v1674_v39  ;;  %v1244_v54 = vpop.permute.xlu0 %1243  ;;  %v931_v0 = vmul.f32 %v4220_v11, %v773_v5  ;;  %v1169_v53 = vpop.permute.xlu2 %1168 }
 0x18d   : > { %v1334_v25 = vmul.f32 %v4227_v62, %v1244_v54  ;;  %3230 = vtanh.f32 %v1465_v49  ;;  %v3062_v54 = vld [vmem:[%s5038_s8 + $0x20] sm:$0xff] }
 0x18e   : > { %2306 = vmatpush.bf16.msra.mxu2 %v3062_v54  ;;  %3085 = vmatpush.bf16.msra.mxu3 %v3062_v54 }
 0x18f   : > { %v1398_v7 = vadd.f32 %v1334_v25, %v948_v46 }
 0x191   : > { %v1466_v48 = vadd.f32 %v4241_v24, %v1398_v7  ;;  %v1676_v58 = vpop.f32.mrf.mxu0 }
 0x192   : > { %v3229_v59 = vpop.eup %3228  ;;  %v1677_v14 = vadd.f32 %v4145_v28, %v1676_v58 }
 0x193   : > { %3232 = vtanh.f32 %v1466_v48  ;;  %v1164_v23 = vpop.permute.xlu1 %1163  ;;  %v1875_v32 = vpack.c.bf16 %v3229_v59, %v3227_v52  ;;  %v3231_v1 = vpop.eup %3230  ;;  %v1319_v48 = vmul.f32 %v4227_v62, %v1169_v53  ;;  %v3061_v59 = vld [vmem:[%s5038_s8 + $0x18] sm:$0xff] }
 0x194   : > { %v1318_v40 = vmul.f32 %v4227_v62, %v1164_v23  ;;  %1715 = vmatmul.bf16.gmra.mxu0 %v1551_v35  ;;  %v1159_v55 = vpop.permute.xlu0 %1158  ;;  %3234 = vtanh.f32 %v1677_v14  ;;  %v878_v15 = vpop.permute.xlu2 %877  ;;  %2307 = vmatpush.bf16.msra.mxu2 %v3061_v59 }
 0x195   : > { %v1317_v12 = vmul.f32 %v4227_v62, %v1159_v55  ;;  %2003 = vmatmul.bf16.gmra.mxu1 %v1875_v32  ;;  %3086 = vmatpush.bf16.msra.mxu3 %v3061_v59 }
 0x196   : > { %v1382_v45 = vadd.f32 %v1318_v40, %v932_v37 }
 0x197   : > { %v1381_v22 = vadd.f32 %v1317_v12, %v931_v0 }
 0x198   : > { %v1450_v27 = vadd.f32 %v4241_v24, %v1382_v45  ;;  %2308 = vmatpush.bf16.msra.mxu2 %v3060_v63  ;;  %v3059_v45 = vld [vmem:[%s5038_s8 + $0x8] sm:$0xff] }
 0x199   : > { %v3233_v31 = vpop.eup %3232  ;;  %v1449_v35 = vadd.f32 %v4241_v24, %v1381_v22  ;;  %v1678_v3 = vpop.f32.mrf.mxu0  ;;  %3087 = vmatpush.bf16.msra.mxu3 %v3060_v63 }
 0x19a   : > { %3236 = vtanh.f32 %v1450_v27  ;;  %v1679_v47 = vadd.f32 %v4145_v28, %v1678_v3  ;;  %v1565_v16 = vpack.c.bf16 %v3233_v31, %v3231_v1  ;;  %v3235_v20 = vpop.eup %3234 }
 0x19b   : > { %3238 = vtanh.f32 %v1449_v35  ;;  %v1249_v61 = vpop.permute.xlu1 %1248 }
 0x19c   : > { %3240 = vtanh.f32 %v1679_v47  ;;  %v1335_v51 = vmul.f32 %v4227_v62, %v1249_v61  ;;  %1785 = vmatmul.bf16.gmra.mxu3 %v1565_v16  ;;  %v868_v41 = vpop.permute.xlu0 %867  ;;  %2309 = vmatpush.bf16.msra.mxu2 %v3059_v45  ;;  %v793_v27 = vpop.permute.xlu2 %792 }
 0x19d   : > { %v950_v21 = vmul.f32 %v4220_v11, %v868_v41  ;;  %3088 = vmatpush.bf16.msra.mxu3 %v3059_v45 }
 0x19e   : > { %v1399_v33 = vadd.f32 %v1335_v51, %v949_v29  ;;  %v952_v29 = vmul.f32 %v4220_v11, %v878_v15 }
 0x19f   : > { %v1400_v17 = vadd.f32 %v1336_v43, %v950_v21 }
 0x1a0   : > { %v4342_v30 = vpop.eup %3236  ;;  %v1467_v6 = vadd.f32 %v4241_v24, %v1399_v33  ;;  %2310 = vmatpush.bf16.msra.mxu2 %v3058_v4 }
 0x1a1   : > { %v4345_v19 = vpop.eup %3238  ;;  %v1468_v39 = vadd.f32 %v4241_v24, %v1400_v17  ;;  %v1681_v5 = vpop.f32.mrf.mxu0  ;;  %3089 = vmatpush.bf16.msra.mxu3 %v3058_v4 }
 0x1a2   : > { %v3241_v46 = vpop.eup %3240  ;;  %3242 = vtanh.f32 %v1467_v6  ;;  %v1557_v25 = vpack.c.bf16 %v4342_v30, %v4345_v19  ;;  %v1682_v23 = vadd.f32 %v4145_v28, %v1681_v5 }
 0x1a3   : > { %3244 = vtanh.f32 %v1468_v39  ;;  %v788_v49 = vpop.permute.xlu1 %787  ;;  %v1876_v7 = vpack.c.bf16 %v3241_v46, %v3235_v20  ;;  %v935_v46 = vmul.f32 %v4220_v11, %v793_v27 }
 0x1a4   : > { %1720 = vmatmul.bf16.gmra.mxu0 %v1552_v44  ;;  %v783_v52 = vpop.permute.xlu0 %782  ;;  %3246 = vtanh.f32 %v1682_v23  ;;  %v934_v12 = vmul.f32 %v4220_v11, %v788_v49 }
 0x1a5   : > { %v933_v58 = vmul.f32 %v4220_v11, %v783_v52  ;;  %2008 = vmatmul.bf16.gmra.mxu1 %v1876_v7 }
 0x1a7   : > { %v1383_v32 = vadd.f32 %v1319_v48, %v933_v58 }
 0x1a8   : > { %v3243_v37 = vpop.eup %3242 }
 0x1a9   : > { %v3245_v40 = vpop.eup %3244  ;;  %v1683_v10 = vpop.f32.mrf.mxu0  ;;  %v1451_v22 = vadd.f32 %v4241_v24, %v1383_v32 }
 0x1aa   : > { %v1684_v44 = vadd.f32 %v4145_v28, %v1683_v10  ;;  %v1566_v55 = vpack.c.bf16 %v3245_v40, %v3243_v37  ;;  %v3247_v31 = vpop.eup %3246 }
 0x1ab   : > { %v873_v0 = vpop.permute.xlu1 %872 }
 0x1ac   : > { %3248 = vtanh.f32 %v1684_v44  ;;  %1790 = vmatmul.bf16.gmra.mxu3 %v1566_v55  ;;  %v1174_v14 = vpop.permute.xlu0 %1173  ;;  %v951_v41 = vmul.f32 %v4220_v11, %v873_v0  ;;  %v4402_v0 = vld [vmem:[%s5037_s7] ss:$0 sm:$0xff] }
 0x1ad   : > { %v1320_v13 = vmul.f32 %v4227_v62, %v1174_v14  ;;  %3250 = vtanh.f32 %v1451_v22 }
 0x1af   : > { %v1384_v1 = vadd.f32 %v1320_v13, %v934_v12 }
 0x1b1   : > { %v1452_v35 = vadd.f32 %v4241_v24, %v1384_v1  ;;  %v1686_v3 = vpop.f32.mrf.mxu0 }
 0x1b2   : > { %v3249_v47 = vpop.eup %3248  ;;  %v1687_v43 = vadd.f32 %v4145_v28, %v1686_v3 }
 0x1b3   : > { %3252 = vtanh.f32 %v1452_v35  ;;  %v1264_v16 = vpop.permute.xlu1 %1263  ;;  %v1877_v61 = vpack.c.bf16 %v3249_v47, %v3247_v31  ;;  %v4384_v20 = vpop.eup %3250 }
 0x1b4   : > { %v1338_v53 = vmul.f32 %v4227_v62, %v1264_v16  ;;  %1725 = vmatmul.bf16.gmra.mxu0 %v1553_v50  ;;  %v1259_v51 = vpop.permute.xlu0 %1258  ;;  %3254 = vtanh.f32 %v1687_v43  ;;  %v1184_v50 = vpop.permute.xlu2 %1183 }
 0x1b5   : > { %v1337_v21 = vmul.f32 %v4227_v62, %v1259_v51  ;;  %2013 = vmatmul.bf16.gmra.mxu1 %v1877_v61  ;;  %v1322_v52 = vmul.f32 %v4227_v62, %v1184_v50 }
 0x1b6   : > { %v1402_v2 = vadd.f32 %v1338_v53, %v952_v29 }
 0x1b7   : > { %v1401_v33 = vadd.f32 %v1337_v21, %v951_v41 }
 0x1b8   : > { %v1470_v17 = vadd.f32 %v4241_v24, %v1402_v2 }
 0x1b9   : > { %v4387_v6 = vpop.eup %3252  ;;  %v1469_v36 = vadd.f32 %v4241_v24, %v1401_v33  ;;  %v1688_v38 = vpop.f32.mrf.mxu0 }
 0x1ba   : > { %3256 = vtanh.f32 %v1470_v17  ;;  %v1689_v39 = vadd.f32 %v4145_v28, %v1688_v38  ;;  %v1558_v5 = vpack.c.bf16 %v4387_v6, %v4384_v20  ;;  %v3255_v59 = vpop.eup %3254 }
 0x1bb   : > { %3258 = vtanh.f32 %v1469_v36  ;;  %v1179_v54 = vpop.permute.xlu1 %1178 }
 0x1bc   : > { %3260 = vtanh.f32 %v1689_v39  ;;  %v1321_v49 = vmul.f32 %v4227_v62, %v1179_v54  ;;  %v798_v7 = vpop.permute.xlu0 %797  ;;  %v1269_v13 = vpop.permute.xlu2 %1268 }
 0x1bd   : > { %v936_v48 = vmul.f32 %v4220_v11, %v798_v7  ;;  %v1339_v31 = vmul.f32 %v4227_v62, %v1269_v13 }
 0x1be   : > { %v1385_v58 = vadd.f32 %v1321_v49, %v935_v46 }
 0x1bf   : > { %v1386_v15 = vadd.f32 %v1322_v52, %v936_v48 }
 0x1c0   : > { %v3257_v23 = vpop.eup %3256  ;;  %v1453_v32 = vadd.f32 %v4241_v24, %v1385_v58 }
 0x1c1   : > { %v3259_v37 = vpop.eup %3258  ;;  %v1454_v40 = vadd.f32 %v4241_v24, %v1386_v15  ;;  %v1691_v10 = vpop.f32.mrf.mxu0 }
 0x1c2   : > { %v3261_v63 = vpop.eup %3260  ;;  %3262 = vtanh.f32 %v1453_v32  ;;  %v1979_v44 = vpop.f32.mrf.mxu1  ;;  %v1567_v55 = vpack.c.bf16 %v3257_v23, %v3259_v37  ;;  %v1692_v45 = vadd.f32 %v4145_v28, %v1691_v10 }
 0x1c3   : > { %3264 = vtanh.f32 %v1454_v40  ;;  %v1878_v14 = vpack.c.bf16 %v3261_v63, %v3255_v59  ;;  %v1980_v1 = vadd.f32 %v4402_v0, %v1979_v44  ;;  %v888_v56 = vpop.permute.xlu1 %887 }
 0x1c4   : > { %1730 = vmatmul.bf16.gmra.mxu0 %v1554_v8  ;;  %1795 = vmatmul.bf16.gmra.mxu3 %v1567_v55  ;;  %v883_v12 = vpop.permute.xlu0 %882  ;;  %3266 = vtanh.f32 %v1692_v45  ;;  %v954_v29 = vmul.f32 %v4220_v11, %v888_v56  ;;  %v808_v20 = vpop.permute.xlu2 %807 }
 0x1c5   : > { %2018 = vmatmul.bf16.gmra.mxu1 %v1878_v14  ;;  %v953_v22 = vmul.f32 %v4220_v11, %v883_v12  ;;  %3268 = vtanh.f32 %v1980_v1 }
 0x1c7   : > { %v1403_v26 = vadd.f32 %v1339_v31, %v953_v22  ;;  %v1766_v53 = vpop.f32.mrf.mxu3 }
 0x1c8   : > { %v4410_v27 = vpop.eup %3262 }
 0x1c9   : > { %v4413_v35 = vpop.eup %3264  ;;  %v1693_v3 = vpop.f32.mrf.mxu0  ;;  %v1471_v41 = vadd.f32 %v4241_v24, %v1403_v26 }
 0x1ca   : > { %v1694_v8 = vadd.f32 %v4145_v28, %v1693_v3  ;;  %v1981_v4 = vpop.f32.mrf.mxu1  ;;  %v1559_v47 = vpack.c.bf16 %v4413_v35, %v4410_v27  ;;  %v3267_v21 = vpop.eup %3266 }
 0x1cb   : > { %v1982_v16 = vadd.f32 %v4402_v0, %v1981_v4  ;;  %v3269_v2 = vpop.eup %3268 }
 0x1cc   : > { %3270 = vtanh.f32 %v1694_v8  ;;  %v1274_v61 = vpop.permute.xlu0 %1273 }
 0x1cd   : > { %3272 = vtanh.f32 %v1982_v16  ;;  %v1340_v51 = vmul.f32 %v4227_v62, %v1274_v61 }
 0x1ce   : > { %3274 = vtanh.f32 %v1471_v41 }
 0x1cf   : > { %v1404_v43 = vadd.f32 %v1340_v51, %v954_v29  ;;  %v1768_v49 = vpop.f32.mrf.mxu3 }
 0x1d0   : > { %v1769_v42 = vadd.f32 %v4145_v28, %v1768_v49 }
 0x1d1   : > { %v1472_v33 = vadd.f32 %v4241_v24, %v1404_v43  ;;  %v1696_v17 = vpop.f32.mrf.mxu0 }
 0x1d2   : > { %v3271_v36 = vpop.eup %3270  ;;  %v1984_v38 = vpop.f32.mrf.mxu1  ;;  %v1697_v46 = vadd.f32 %v4145_v28, %v1696_v17 }
 0x1d3   : > { %v3273_v50 = vpop.eup %3272  ;;  %3276 = vtanh.f32 %v1472_v33  ;;  %v1879_v39 = vpack.c.bf16 %v3271_v36, %v3267_v21  ;;  %v1985_v7 = vadd.f32 %v4402_v0, %v1984_v38 }
 0x1d4   : > { %1735 = vmatmul.bf16.gmra.mxu0 %v1555_v34  ;;  %v2203_v54 = vpack.c.bf16 %v3273_v50, %v3269_v2  ;;  %v3275_v52 = vpop.eup %3274  ;;  %3278 = vtanh.f32 %v1697_v46  ;;  %v1767_v34 = vadd.f32 %v4145_v28, %v1766_v53 }
 0x1d5   : > { %2023 = vmatmul.bf16.gmra.mxu1 %v1879_v39  ;;  %3280 = vtanh.f32 %v1985_v7 }
 0x1d6   : > { %2311 = vmatmul.bf16.vlgmr.msra.gmra.mxu2 %v2203_v54 }
 0x1d9   : > { %v3277_v48 = vpop.eup %3276  ;;  %v1698_v58 = vpop.f32.mrf.mxu0 }
 0x1da   : > { %v1699_v59 = vadd.f32 %v4145_v28, %v1698_v58  ;;  %v1986_v15 = vpop.f32.mrf.mxu1  ;;  %v1568_v23 = vpack.c.bf16 %v3277_v48, %v3275_v52  ;;  %v3279_v37 = vpop.eup %3278 }
 0x1db   : > { %v1987_v60 = vadd.f32 %v4402_v0, %v1986_v15  ;;  %v3281_v40 = vpop.eup %3280 }
 0x1dc   : > { %3282 = vtanh.f32 %v1699_v59  ;;  %1800 = vmatmul.bf16.gmra.mxu3 %v1568_v23 }
 0x1dd   : > { %3284 = vtanh.f32 %v1987_v60 }
 0x1de   : > { %3286 = vtanh.f32 %v1769_v42 }
 0x1df   : > { %v1771_v32 = vpop.f32.mrf.mxu3  ;;  %3288 = vtanh.f32 %v1767_v34 }
 0x1e0   : > { %v1772_v4 = vadd.f32 %v4442_v18, %v1771_v32 }
 0x1e1   : > { %v1701_v10 = vpop.f32.mrf.mxu0 }
 0x1e2   : > { %v3283_v63 = vpop.eup %3282  ;;  %v1989_v44 = vpop.f32.mrf.mxu1  ;;  %v1702_v13 = vadd.f32 %v4145_v28, %v1701_v10 }
 0x1e3   : > { %v3285_v55 = vpop.eup %3284  ;;  %v1880_v14 = vpack.c.bf16 %v3283_v63, %v3279_v37  ;;  %v1990_v22 = vadd.f32 %v4402_v0, %v1989_v44  ;;  %v1189_v44 = vpop.permute.xlu0 %1188 }
 0x1e4   : > { %1740 = vmatmul.bf16.gmra.mxu0 %v1556_v57  ;;  %v2204_v12 = vpack.c.bf16 %v3285_v55, %v3281_v40  ;;  %v3287_v45 = vpop.eup %3286  ;;  %3290 = vtanh.f32 %v1702_v13  ;;  %v1323_v13 = vmul.f32 %v4227_v62, %v1189_v44 }
 0x1e5   : > { %2028 = vmatmul.bf16.gmra.mxu1 %v1880_v14  ;;  %v3289_v31 = vpop.eup %3288  ;;  %3292 = vtanh.f32 %v1990_v22  ;;  %v938_v22 = vmul.f32 %v4220_v11, %v808_v20 }
 0x1e6   : > { %2316 = vmatmul.bf16.gmra.mxu2 %v2204_v12  ;;  %v1894_v8 = vpack.c.bf16 %v3287_v45, %v3289_v31 }
 0x1e7   : > { %v1773_v1 = vpop.f32.mrf.mxu3 }
 0x1e8   : > { %v1774_v57 = vadd.f32 %v4442_v18, %v1773_v1 }
 0x1e9   : > { %v1703_v3 = vpop.f32.mrf.mxu0 }
 0x1ea   : > { %v1704_v56 = vadd.f32 %v4145_v28, %v1703_v3  ;;  %v1991_v26 = vpop.f32.mrf.mxu1  ;;  %v3291_v16 = vpop.eup %3290 }
 0x1eb   : > { %v1992_v9 = vadd.f32 %v4402_v0, %v1991_v26  ;;  %v3293_v28 = vpop.eup %3292 }
 0x1ec   : > { %3294 = vtanh.f32 %v1704_v56  ;;  %2098 = vmatmul.bf16.vlgmr.msrb.gmra.mxu3 %v1894_v8 }
 0x1ed   : > { %3296 = vtanh.f32 %v1992_v9 }
 0x1ee   : > { %3298 = vtanh.f32 %v1774_v57 }
 0x1ef   : > { %v1776_v61 = vpop.f32.mrf.mxu3  ;;  %3300 = vtanh.f32 %v1772_v4 }
 0x1f0   : > { %v1777_v49 = vadd.f32 %v4442_v18, %v1776_v61 }
 0x1f1   : > { %v1706_v29 = vpop.f32.mrf.mxu0 }
 0x1f2   : > { %v3295_v53 = vpop.eup %3294  ;;  %v1994_v51 = vpop.f32.mrf.mxu1  ;;  %v1707_v2 = vadd.f32 %v4442_v18, %v1706_v29 }
 0x1f3   : > { %v3297_v41 = vpop.eup %3296  ;;  %v1881_v43 = vpack.c.bf16 %v3295_v53, %v3291_v16  ;;  %v1995_v17 = vadd.f32 %v4402_v0, %v1994_v51 }
 0x1f4   : > { %1745 = vmatmul.bf16.gmra.mxu0 %v1557_v25  ;;  %v2205_v21 = vpack.c.bf16 %v3297_v41, %v3293_v28  ;;  %v3299_v33 = vpop.eup %3298  ;;  %3302 = vtanh.f32 %v1707_v2  ;;  %v803_v25 = vpop.permute.xlu1 %802 }
 0x1f5   : > { %2033 = vmatmul.bf16.gmra.mxu1 %v1881_v43  ;;  %v3301_v36 = vpop.eup %3300  ;;  %3304 = vtanh.f32 %v1995_v17  ;;  %v937_v1 = vmul.f32 %v4220_v11, %v803_v25 }
 0x1f6   : > { %2321 = vmatmul.bf16.gmra.mxu2 %v2205_v21  ;;  %v1895_v46 = vpack.c.bf16 %v3299_v33, %v3301_v36 }
 0x1f7   : > { %v1778_v50 = vpop.f32.mrf.mxu3  ;;  %v1387_v9 = vadd.f32 %v1323_v13, %v937_v1 }
 0x1f8   : > { %v1779_v19 = vadd.f32 %v4442_v18, %v1778_v50 }
 0x1f9   : > { %v1708_v38 = vpop.f32.mrf.mxu0  ;;  %v1455_v29 = vadd.f32 %v4241_v24, %v1387_v9 }
 0x1fa   : > { %v1709_v39 = vadd.f32 %v4442_v18, %v1708_v38  ;;  %v1996_v54 = vpop.f32.mrf.mxu1  ;;  %v3303_v7 = vpop.eup %3302 }
 0x1fb   : > { %v1997_v30 = vadd.f32 %v4402_v0, %v1996_v54  ;;  %v3305_v52 = vpop.eup %3304 }
 0x1fc   : > { %3306 = vtanh.f32 %v1709_v39  ;;  %2103 = vmatmul.bf16.gmra.mxu3 %v1895_v46  ;;  %v1194_v10 = vpop.permute.xlu1 %1193 }
 0x1fd   : > { %3308 = vtanh.f32 %v1997_v30 }
 0x1fe   : > { %3310 = vtanh.f32 %v1779_v19 }
 0x1ff   : > { %3312 = vtanh.f32 %v1777_v49 }
 0x201   : > { %v1711_v48 = vpop.f32.mrf.mxu0 }
 0x202   : > { %v3307_v58 = vpop.eup %3306  ;;  %v1999_v59 = vpop.f32.mrf.mxu1  ;;  %v1712_v42 = vadd.f32 %v4442_v18, %v1711_v48 }
 0x203   : > { %v3309_v15 = vpop.eup %3308  ;;  %v1882_v23 = vpack.c.bf16 %v3307_v58, %v3303_v7  ;;  %v2000_v32 = vadd.f32 %v4402_v0, %v1999_v59 }
 0x204   : > { %1750 = vmatmul.bf16.gmra.mxu0 %v1558_v5  ;;  %v2206_v60 = vpack.c.bf16 %v3309_v15, %v3305_v52  ;;  %v3311_v34 = vpop.eup %3310  ;;  %3314 = vtanh.f32 %v1712_v42  ;;  %v1324_v5 = vmul.f32 %v4227_v62, %v1194_v10 }
 0x205   : > { %2038 = vmatmul.bf16.gmra.mxu1 %v1882_v23  ;;  %v3313_v40 = vpop.eup %3312  ;;  %3316 = vtanh.f32 %v2000_v32 }
 0x206   : > { %2326 = vmatmul.bf16.gmra.mxu2 %v2206_v60  ;;  %v1896_v12 = vpack.c.bf16 %v3311_v34, %v3313_v40  ;;  %v1388_v56 = vadd.f32 %v1324_v5, %v938_v22 }
 0x207   : > { %v1781_v37 = vpop.f32.mrf.mxu3 }
 0x208   : > { %v1782_v45 = vadd.f32 %v4442_v18, %v1781_v37  ;;  %v1456_v28 = vadd.f32 %v4241_v24, %v1388_v56 }
 0x209   : > { %v1713_v63 = vpop.f32.mrf.mxu0 }
 0x20a   : > { %v1714_v55 = vadd.f32 %v4442_v18, %v1713_v63  ;;  %v2001_v14 = vpop.f32.mrf.mxu1  ;;  %v3315_v3 = vpop.eup %3314 }
 0x20b   : > { %v2002_v6 = vadd.f32 %v4402_v0, %v2001_v14  ;;  %v3317_v8 = vpop.eup %3316 }
 0x20c   : > { %3318 = vtanh.f32 %v1714_v55  ;;  %2108 = vmatmul.bf16.gmra.mxu3 %v1896_v12 }
 0x20d   : > { %3320 = vtanh.f32 %v2002_v6 }
 0x20e   : > { %3322 = vtanh.f32 %v1782_v45 }
 0x20f   : > { %v1783_v31 = vpop.f32.mrf.mxu3 }
 0x210   : > { %v1784_v26 = vadd.f32 %v4442_v18, %v1783_v31 }
 0x211   : > { %v1716_v57 = vpop.f32.mrf.mxu0 }
 0x212   : > { %v3319_v4 = vpop.eup %3318  ;;  %3324 = vtanh.f32 %v1784_v26  ;;  %v2004_v16 = vpop.f32.mrf.mxu1  ;;  %v1717_v53 = vadd.f32 %v4442_v18, %v1716_v57 }
 0x213   : > { %v3321_v62 = vpop.eup %3320  ;;  %v1883_v61 = vpack.c.bf16 %v3319_v4, %v3315_v3  ;;  %v2005_v41 = vadd.f32 %v4402_v0, %v2004_v16  ;;  %3326 = vtanh.f32 %v1456_v28 }
 0x214   : > { %1755 = vmatmul.bf16.gmra.mxu0 %v1559_v47  ;;  %v2207_v11 = vpack.c.bf16 %v3321_v62, %v3317_v8  ;;  %v3323_v51 = vpop.eup %3322  ;;  %3328 = vtanh.f32 %v1455_v29 }
 0x215   : > { %2043 = vmatmul.bf16.gmra.mxu1 %v1883_v61  ;;  %3330 = vtanh.f32 %v1717_v53 }
 0x216   : > { %2331 = vmatmul.bf16.gmra.mxu2 %v2207_v11  ;;  %3332 = vtanh.f32 %v2005_v41 }
 0x218   : > { %v3325_v43 = vpop.eup %3324 }
 0x219   : > { %v1718_v21 = vpop.f32.mrf.mxu0  ;;  %v1897_v2 = vpack.c.bf16 %v3325_v43, %v3323_v51  ;;  %v3327_v24 = vpop.eup %3326 }
 0x21a   : > { %v1719_v33 = vadd.f32 %v4442_v18, %v1718_v21  ;;  %v2006_v27 = vpop.f32.mrf.mxu1  ;;  %v3329_v47 = vpop.eup %3328 }
 0x21b   : > { %v2007_v35 = vadd.f32 %v4402_v0, %v2006_v27  ;;  %v3331_v36 = vpop.eup %3330  ;;  %v1560_v46 = vpack.c.bf16 %v3327_v24, %v3329_v47 }
 0x21c   : > { %3334 = vtanh.f32 %v1719_v33  ;;  %2113 = vmatmul.bf16.gmra.mxu3 %v1897_v2  ;;  %v3333_v38 = vpop.eup %3332 }
 0x21d   : > { %3336 = vtanh.f32 %v2007_v35 }
 0x21f   : > { %v1786_v17 = vpop.f32.mrf.mxu3 }
 0x220   : > { %v1787_v25 = vadd.f32 %v4442_v18, %v1786_v17 }
 0x221   : > { %v1721_v50 = vpop.f32.mrf.mxu0 }
 0x222   : > { %v3335_v39 = vpop.eup %3334  ;;  %v2009_v54 = vpop.f32.mrf.mxu1  ;;  %v1722_v7 = vadd.f32 %v4442_v18, %v1721_v50  ;;  %3338 = vtanh.f32 %v1787_v25 }
 0x223   : > { %v3337_v30 = vpop.eup %3336  ;;  %v1884_v19 = vpack.c.bf16 %v3335_v39, %v3331_v36  ;;  %v2010_v52 = vadd.f32 %v4402_v0, %v2009_v54 }
 0x224   : > { %1760 = vmatmul.bf16.gmra.mxu0 %v1560_v46  ;;  %v2208_v49 = vpack.c.bf16 %v3337_v30, %v3333_v38  ;;  %3340 = vtanh.f32 %v1722_v7 }
 0x225   : > { %2048 = vmatmul.bf16.gmra.mxu1 %v1884_v19  ;;  %v4499_v19 = vld [vmem:[%s5039_s9] ss:$0 sm:$0xff] }
 0x226   : > { %2336 = vmatmul.bf16.gmra.mxu2 %v2208_v49 }
 0x227   : > { %v1788_v48 = vpop.f32.mrf.mxu3 }
 0x228   : > { %v1789_v58 = vadd.f32 %v4442_v18, %v1788_v48  ;;  %v3339_v42 = vpop.eup %3338 }
 0x229   : > { %v1723_v59 = vpop.f32.mrf.mxu0 }
 0x22a   : > { %3342 = vtanh.f32 %v1789_v58  ;;  %v1724_v15 = vadd.f32 %v4442_v18, %v1723_v59  ;;  %v2011_v23 = vpop.f32.mrf.mxu1  ;;  %v3341_v34 = vpop.eup %3340 }
 0x22b   : > { %3344 = vtanh.f32 %v2010_v52  ;;  %v2012_v60 = vadd.f32 %v4402_v0, %v2011_v23 }
 0x22c   : > { %3346 = vtanh.f32 %v1724_v15 }
 0x22d   : > { %3348 = vtanh.f32 %v2012_v60 }
 0x22f   : > { %v1791_v32 = vpop.f32.mrf.mxu3 }
 0x230   : > { %v3343_v37 = vpop.eup %3342  ;;  %v1792_v20 = vadd.f32 %v4442_v18, %v1791_v32  ;;  %v4508_v32 = vld [vmem:[%s5040_s10] ss:$0 sm:$0xff] }
 0x231   : > { %v3345_v40 = vpop.eup %3344  ;;  %v1726_v10 = vpop.f32.mrf.mxu0  ;;  %v1898_v63 = vpack.c.bf16 %v3343_v37, %v3339_v42 }
 0x232   : > { %v3347_v44 = vpop.eup %3346  ;;  %v2014_v55 = vpop.f32.mrf.mxu1  ;;  %v1727_v5 = vadd.f32 %v4442_v18, %v1726_v10  ;;  %3350 = vtanh.f32 %v1792_v20 }
 0x233   : > { %v3349_v14 = vpop.eup %3348  ;;  %2118 = vmatmul.bf16.gmra.mxu3 %v1898_v63  ;;  %v1885_v12 = vpack.c.bf16 %v3347_v44, %v3341_v34  ;;  %v2015_v13 = vadd.f32 %v4402_v0, %v2014_v55 }
 0x234   : > { %v2209_v6 = vpack.c.bf16 %v3349_v14, %v3345_v40  ;;  %3352 = vtanh.f32 %v1727_v5 }
 0x235   : > { %2053 = vmatmul.bf16.gmra.mxu1 %v1885_v12 }
 0x236   : > { %2341 = vmatmul.bf16.gmra.mxu2 %v2209_v6 }
 0x237   : > { %v1793_v45 = vpop.f32.mrf.mxu3 }
 0x238   : > { %v1794_v22 = vadd.f32 %v4442_v18, %v1793_v45  ;;  %v3351_v26 = vpop.eup %3350 }
 0x239   : > { %v1728_v1 = vpop.f32.mrf.mxu0 }
 0x23a   : > { %3354 = vtanh.f32 %v1794_v22  ;;  %v1729_v31 = vadd.f32 %v4442_v18, %v1728_v1  ;;  %v2016_v3 = vpop.f32.mrf.mxu1  ;;  %v3353_v8 = vpop.eup %3352 }
 0x23b   : > { %3356 = vtanh.f32 %v2015_v13  ;;  %v2017_v56 = vadd.f32 %v4402_v0, %v2016_v3 }
 0x23c   : > { %3358 = vtanh.f32 %v1729_v31 }
 0x23d   : > { %3360 = vtanh.f32 %v2017_v56 }
 0x240   : > { %v3355_v9 = vpop.eup %3354 }
 0x241   : > { %v3357_v57 = vpop.eup %3356  ;;  %v1731_v4 = vpop.f32.mrf.mxu0  ;;  %v1899_v16 = vpack.c.bf16 %v3355_v9, %v3351_v26 }
 0x242   : > { %v3359_v62 = vpop.eup %3358  ;;  %v2019_v61 = vpop.f32.mrf.mxu1  ;;  %v1732_v53 = vadd.f32 %v4442_v18, %v1731_v4 }
 0x243   : > { %v3361_v28 = vpop.eup %3360  ;;  %2123 = vmatmul.bf16.gmra.mxu3 %v1899_v16  ;;  %v1886_v11 = vpack.c.bf16 %v3359_v62, %v3353_v8  ;;  %v2020_v51 = vadd.f32 %v4402_v0, %v2019_v61 }
 0x244   : > { %v2210_v29 = vpack.c.bf16 %v3361_v28, %v3357_v57  ;;  %3362 = vtanh.f32 %v1732_v53 }
 0x245   : > { %2058 = vmatmul.bf16.gmra.mxu1 %v1886_v11  ;;  %3364 = vtanh.f32 %v2020_v51 }
 0x246   : > { %2346 = vmatmul.bf16.gmra.mxu2 %v2210_v29 }
 0x247   : > { %v1796_v41 = vpop.f32.mrf.mxu3 }
 0x248   : > { %v1797_v27 = vadd.f32 %v4442_v18, %v1796_v41 }
 0x249   : > { %v1733_v43 = vpop.f32.mrf.mxu0 }
 0x24a   : > { %v1734_v21 = vadd.f32 %v4442_v18, %v1733_v43  ;;  %v2021_v2 = vpop.f32.mrf.mxu1  ;;  %v3363_v24 = vpop.eup %3362 }
 0x24b   : > { %v2022_v33 = vadd.f32 %v4402_v0, %v2021_v2  ;;  %v3365_v17 = vpop.eup %3364 }
 0x24c   : > { %3366 = vtanh.f32 %v1734_v21 }
 0x24d   : > { %3368 = vtanh.f32 %v2022_v33 }
 0x24e   : > { %3370 = vtanh.f32 %v1797_v27 }
 0x24f   : > { %v1798_v35 = vpop.f32.mrf.mxu3 }
 0x250   : > { %v1799_v47 = vadd.f32 %v4442_v18, %v1798_v35 }
 0x251   : > { %v1736_v36 = vpop.f32.mrf.mxu0 }
 0x252   : > { %v3367_v38 = vpop.eup %3366  ;;  %3372 = vtanh.f32 %v1799_v47  ;;  %v2024_v50 = vpop.f32.mrf.mxu1  ;;  %v1737_v30 = vadd.f32 %v4442_v18, %v1736_v36 }
 0x253   : > { %v3369_v39 = vpop.eup %3368  ;;  %v1887_v54 = vpack.c.bf16 %v3367_v38, %v3363_v24  ;;  %v2025_v49 = vadd.f32 %v4402_v0, %v2024_v50 }
 0x254   : > { %v2211_v46 = vpack.c.bf16 %v3369_v39, %v3365_v17  ;;  %v3371_v25 = vpop.eup %3370  ;;  %3374 = vtanh.f32 %v1737_v30 }
 0x255   : > { %2063 = vmatmul.bf16.gmra.mxu1 %v1887_v54  ;;  %3376 = vtanh.f32 %v2025_v49 }
 0x256   : > { %2351 = vmatmul.bf16.gmra.mxu2 %v2211_v46 }
 0x258   : > { %v3373_v7 = vpop.eup %3372 }
 0x259   : > { %v1738_v52 = vpop.f32.mrf.mxu0  ;;  %v2312_v48 = vpop.f32.mrf.mxu2  ;;  %v1900_v58 = vpack.c.bf16 %v3373_v7, %v3371_v25 }
 0x25a   : > { %v1739_v59 = vadd.f32 %v4442_v18, %v1738_v52  ;;  %v2313_v15 = vadd.f32 %v4499_v19, %v2312_v48  ;;  %v2026_v23 = vpop.f32.mrf.mxu1  ;;  %v3375_v34 = vpop.eup %3374 }
 0x25b   : > { %v2027_v60 = vadd.f32 %v4402_v0, %v2026_v23  ;;  %2128 = vmatmul.bf16.gmra.mxu3 %v1900_v58  ;;  %v3377_v37 = vpop.eup %3376 }
 0x25c   : > { %3378 = vtanh.f32 %v1739_v59 }
 0x25d   : > { %3380 = vtanh.f32 %v2313_v15 }
 0x25e   : > { %3382 = vtanh.f32 %v2027_v60 }
 0x25f   : > { %v1801_v42 = vpop.f32.mrf.mxu3 }
 0x260   : > { %v1802_v5 = vadd.f32 %v4442_v18, %v1801_v42 }
 0x261   : > { %v1741_v40 = vpop.f32.mrf.mxu0  ;;  %v2314_v10 = vpop.f32.mrf.mxu2 }
 0x262   : > { %v3379_v63 = vpop.eup %3378  ;;  %v2315_v44 = vadd.f32 %v4499_v19, %v2314_v10  ;;  %v2029_v55 = vpop.f32.mrf.mxu1  ;;  %v1742_v45 = vadd.f32 %v4442_v18, %v1741_v40 }
 0x263   : > { %v3381_v14 = vpop.eup %3380  ;;  %v1888_v12 = vpack.c.bf16 %v3379_v63, %v3375_v34  ;;  %v2030_v31 = vadd.f32 %v4402_v0, %v2029_v55 }
 0x264   : > { %v3383_v20 = vpop.eup %3382  ;;  %v2540_v6 = vmul.f32 %v3381_v14, %v4508_v32  ;;  %3384 = vtanh.f32 %v2315_v44 }
 0x265   : > { %2068 = vmatmul.bf16.gmra.mxu1 %v1888_v12  ;;  %v2212_v13 = vpack.c.bf16 %v3383_v20, %v3377_v37  ;;  %3386 = vtanh.f32 %v1802_v5 }
 0x266   : > { %2604 = vadd.xlane.f32.xlu2 %v2540_v6 }
 0x267   : > { %2356 = vmatmul.bf16.gmra.mxu2 %v2212_v13  ;;  %v1803_v22 = vpop.f32.mrf.mxu3 }
 0x268   : > { %v1804_v1 = vadd.f32 %v4442_v18, %v1803_v22 }
 0x269   : > { %v1743_v3 = vpop.f32.mrf.mxu0  ;;  %v4516_v56 = vpop.f32.mrf.mxu2 }
 0x26a   : > { %3388 = vtanh.f32 %v1804_v1  ;;  %v1744_v26 = vadd.f32 %v4442_v18, %v1743_v3  ;;  %v2031_v8 = vpop.f32.mrf.mxu1  ;;  %v3385_v9 = vpop.eup %3384 }
 0x26b   : > { %3390 = vtanh.f32 %v1742_v45  ;;  %v2032_v57 = vadd.f32 %v4402_v0, %v2031_v8  ;;  %v2541_v4 = vmul.f32 %v3385_v9, %v4508_v32  ;;  %v3387_v16 = vpop.eup %3386 }
 0x26c   : > { %3392 = vtanh.f32 %v1744_v26 }
 0x26d   : > { %3394 = vtanh.f32 %v2030_v31  ;;  %2606 = vadd.xlane.f32.xlu0 %v2541_v4 }
 0x26e   : > { %3396 = vtanh.f32 %v2032_v57 }
 0x26f   : > { %v2099_v62 = vpop.f32.mrf.mxu3 }
 0x270   : > { %v3389_v61 = vpop.eup %3388  ;;  %v2100_v33 = vadd.f32 %v4402_v0, %v2099_v62 }
 0x271   : > { %v3391_v28 = vpop.eup %3390  ;;  %v1746_v11 = vpop.f32.mrf.mxu0  ;;  %v1901_v53 = vpack.c.bf16 %v3389_v61, %v3387_v16 }
 0x272   : > { %v4521_v29 = vpop.f32.mrf.mxu2  ;;  %v3393_v51 = vpop.eup %3392  ;;  %v1747_v35 = vadd.f32 %v4442_v18, %v1746_v11  ;;  %3398 = vtanh.f32 %v2100_v33 }
 0x273   : > { %v2034_v41 = vpop.f32.mrf.mxu1  ;;  %v3395_v43 = vpop.eup %3394  ;;  %2133 = vmatmul.bf16.gmra.mxu3 %v1901_v53  ;;  %v1889_v21 = vpack.c.bf16 %v3393_v51, %v3391_v28 }
 0x274   : > { %v3397_v2 = vpop.eup %3396  ;;  %v2035_v17 = vadd.f32 %v4402_v0, %v2034_v41 }
 0x275   : > { %2073 = vmatmul.bf16.gmra.mxu1 %v1889_v21  ;;  %v2213_v27 = vpack.c.bf16 %v3397_v2, %v3395_v43 }
 0x277   : > { %2361 = vmatmul.bf16.gmra.mxu2 %v2213_v27  ;;  %v2101_v24 = vpop.f32.mrf.mxu3 }
 0x278   : > { %v2102_v47 = vadd.f32 %v4402_v0, %v2101_v24  ;;  %v3399_v46 = vpop.eup %3398 }
 0x279   : > { %v1748_v36 = vpop.f32.mrf.mxu0 }
 0x27a   : > { %v4527_v38 = vpop.f32.mrf.mxu2  ;;  %3400 = vtanh.f32 %v2102_v47  ;;  %v1749_v50 = vadd.f32 %v4442_v18, %v1748_v36 }
 0x27b   : > { %v2036_v39 = vpop.f32.mrf.mxu1  ;;  %3402 = vtanh.f32 %v1747_v35 }
 0x27c   : > { %v2037_v54 = vadd.f32 %v4402_v0, %v2036_v39  ;;  %3404 = vtanh.f32 %v1749_v50 }
 0x27d   : > { %3406 = vtanh.f32 %v2035_v17 }
 0x27e   : > { %3408 = vtanh.f32 %v2037_v54 }
 0x27f   : > { %v2104_v30 = vpop.f32.mrf.mxu3 }
 0x280   : > { %v3401_v25 = vpop.eup %3400  ;;  %v2105_v42 = vadd.f32 %v4402_v0, %v2104_v30 }
 0x281   : > { %v3403_v49 = vpop.eup %3402  ;;  %v2227_v7 = vpack.c.bf16 %v3401_v25, %v3399_v46  ;;  %v1751_v52 = vpop.f32.mrf.mxu0 }
 0x282   : > { %v4531_v48 = vpop.f32.mrf.mxu2  ;;  %v3405_v58 = vpop.eup %3404  ;;  %v1752_v37 = vadd.f32 %v4442_v18, %v1751_v52  ;;  %3410 = vtanh.f32 %v2105_v42 }
 0x283   : > { %v2039_v59 = vpop.f32.mrf.mxu1  ;;  %v3407_v15 = vpop.eup %3406  ;;  %2431 = vmatmul.bf16.vlgmr.msra.gmra.mxu3 %v2227_v7  ;;  %v1890_v23 = vpack.c.bf16 %v3405_v58, %v3403_v49 }
 0x284   : > { %v3409_v60 = vpop.eup %3408  ;;  %v2040_v63 = vadd.f32 %v4402_v0, %v2039_v59 }
 0x285   : > { %2078 = vmatmul.bf16.gmra.mxu1 %v1890_v23  ;;  %v2214_v34 = vpack.c.bf16 %v3409_v60, %v3407_v15 }
 0x287   : > { %2366 = vmatmul.bf16.gmra.mxu2 %v2214_v34  ;;  %v2106_v40 = vpop.f32.mrf.mxu3 }
 0x288   : > { %v2107_v10 = vadd.f32 %v4402_v0, %v2106_v40  ;;  %v3411_v6 = vpop.eup %3410 }
 0x289   : > { %v1753_v44 = vpop.f32.mrf.mxu0 }
 0x28a   : > { %v4537_v55 = vpop.f32.mrf.mxu2  ;;  %3412 = vtanh.f32 %v2107_v10  ;;  %v1754_v14 = vadd.f32 %v4442_v18, %v1753_v44 }
 0x28b   : > { %v2041_v12 = vpop.f32.mrf.mxu1  ;;  %3414 = vtanh.f32 %v1752_v37 }
 0x28c   : > { %v2042_v20 = vadd.f32 %v4402_v0, %v2041_v12  ;;  %3416 = vtanh.f32 %v1754_v14 }
 0x28d   : > { %3418 = vtanh.f32 %v2040_v63 }
 0x28e   : > { %3420 = vtanh.f32 %v2042_v20 }
 0x28f   : > { %v2109_v5 = vpop.f32.mrf.mxu3 }
 0x290   : > { %v3413_v13 = vpop.eup %3412  ;;  %v2110_v4 = vadd.f32 %v4402_v0, %v2109_v5 }
 0x291   : > { %v3415_v45 = vpop.eup %3414  ;;  %v1756_v22 = vpop.f32.mrf.mxu0  ;;  %v2228_v31 = vpack.c.bf16 %v3413_v13, %v3411_v6 }
 0x292   : > { %v4541_v1 = vpop.f32.mrf.mxu2  ;;  %v3417_v3 = vpop.eup %3416  ;;  %v1757_v62 = vadd.f32 %v4442_v18, %v1756_v22  ;;  %3422 = vtanh.f32 %v2110_v4 }
 0x293   : > { %v2044_v26 = vpop.f32.mrf.mxu1  ;;  %v3419_v8 = vpop.eup %3418  ;;  %2436 = vmatmul.bf16.gmra.mxu3 %v2228_v31  ;;  %v1891_v9 = vpack.c.bf16 %v3417_v3, %v3415_v45 }
 0x294   : > { %v3421_v57 = vpop.eup %3420  ;;  %v2045_v11 = vadd.f32 %v4402_v0, %v2044_v26 }
 0x295   : > { %2083 = vmatmul.bf16.gmra.mxu1 %v1891_v9  ;;  %v2215_v16 = vpack.c.bf16 %v3421_v57, %v3419_v8 }
 0x297   : > { %2371 = vmatmul.bf16.gmra.mxu2 %v2215_v16  ;;  %v2111_v61 = vpop.f32.mrf.mxu3 }
 0x298   : > { %v2112_v28 = vadd.f32 %v4402_v0, %v2111_v61  ;;  %v3423_v2 = vpop.eup %3422 }
 0x299   : > { %v1758_v53 = vpop.f32.mrf.mxu0 }
 0x29a   : > { %v4547_v51 = vpop.f32.mrf.mxu2  ;;  %3424 = vtanh.f32 %v2112_v28  ;;  %v1759_v41 = vadd.f32 %v4442_v18, %v1758_v53  ;;  %v4574_v53 = vld [vmem:[%s5037_s7] ss:$0 sm:$0xff] }
 0x29b   : > { %v2046_v43 = vpop.f32.mrf.mxu1  ;;  %3426 = vtanh.f32 %v1757_v62 }
 0x29c   : > { %v2047_v21 = vadd.f32 %v4402_v0, %v2046_v43  ;;  %3428 = vtanh.f32 %v1759_v41 }
 0x29d   : > { %3430 = vtanh.f32 %v2045_v11 }
 0x29e   : > { %3432 = vtanh.f32 %v2047_v21 }
 0x29f   : > { %v2114_v33 = vpop.f32.mrf.mxu3 }
 0x2a0   : > { %v3425_v27 = vpop.eup %3424  ;;  %v2115_v30 = vadd.f32 %v4402_v0, %v2114_v33 }
 0x2a1   : > { %v3427_v35 = vpop.eup %3426  ;;  %v1761_v24 = vpop.f32.mrf.mxu0  ;;  %v2229_v17 = vpack.c.bf16 %v3425_v27, %v3423_v2 }
 0x2a2   : > { %v4551_v47 = vpop.f32.mrf.mxu2  ;;  %v3429_v36 = vpop.eup %3428  ;;  %v1762_v49 = vadd.f32 %v4442_v18, %v1761_v24  ;;  %3434 = vtanh.f32 %v2115_v30 }
 0x2a3   : > { %v2049_v50 = vpop.f32.mrf.mxu1  ;;  %v3431_v39 = vpop.eup %3430  ;;  %2441 = vmatmul.bf16.gmra.mxu3 %v2229_v17  ;;  %v1892_v54 = vpack.c.bf16 %v3429_v36, %v3427_v35 }
 0x2a4   : > { %v3433_v46 = vpop.eup %3432  ;;  %v2050_v58 = vadd.f32 %v4402_v0, %v2049_v50 }
 0x2a5   : > { %2088 = vmatmul.bf16.gmra.mxu1 %v1892_v54  ;;  %v2216_v25 = vpack.c.bf16 %v3433_v46, %v3431_v39  ;;  %v4584_v46 = vld [vmem:[#allocation2] ss:$0 sm:$0xff] }
 0x2a7   : > { %2376 = vmatmul.bf16.gmra.mxu2 %v2216_v25  ;;  %v2116_v7 = vpop.f32.mrf.mxu3 }
 0x2a8   : > { %v2117_v52 = vadd.f32 %v4402_v0, %v2116_v7  ;;  %v3435_v34 = vpop.eup %3434 }
 0x2a9   : > { %v1763_v59 = vpop.f32.mrf.mxu0 }
 0x2aa   : > { %v4557_v15 = vpop.f32.mrf.mxu2  ;;  %3436 = vtanh.f32 %v2117_v52  ;;  %v1764_v23 = vadd.f32 %v4442_v18, %v1763_v59 }
 0x2ab   : > { %v2051_v60 = vpop.f32.mrf.mxu1  ;;  %3438 = vtanh.f32 %v1762_v49 }
 0x2ac   : > { %v2052_v42 = vadd.f32 %v4402_v0, %v2051_v60  ;;  %3440 = vtanh.f32 %v1764_v23 }
 0x2ad   : > { %3442 = vtanh.f32 %v2050_v58 }
 0x2ae   : > { %3444 = vtanh.f32 %v2052_v42 }
 0x2b0   : > { %v3437_v37 = vpop.eup %3436 }
 0x2b1   : > { %v3439_v40 = vpop.eup %3438  ;;  %v2230_v63 = vpack.c.bf16 %v3437_v37, %v3435_v34 }
 0x2b2   : > { %v4561_v10 = vpop.f32.mrf.mxu2  ;;  %v3441_v44 = vpop.eup %3440 }
 0x2b3   : > { %v2054_v14 = vpop.f32.mrf.mxu1  ;;  %v3443_v12 = vpop.eup %3442  ;;  %2446 = vmatmul.bf16.gmra.mxu3 %v2230_v63  ;;  %v1893_v20 = vpack.c.bf16 %v3441_v44, %v3439_v40 }
 0x2b4   : > { %v3445_v6 = vpop.eup %3444  ;;  %v2055_v13 = vadd.f32 %v4402_v0, %v2054_v14 }
 0x2b5   : > { %2093 = vmatmul.bf16.gmra.mxu1 %v1893_v20  ;;  %v2217_v18 = vpack.c.bf16 %v3445_v6, %v3443_v12 }
 0x2b6   : > { %v2119_v5 = vpop.f32.mrf.mxu3  ;;  %3446 = vtanh.f32 %v2055_v13 }
 0x2b7   : > { %2381 = vmatmul.bf16.gmra.mxu2 %v2217_v18  ;;  %v2120_v3 = vadd.f32 %v4402_v0, %v2119_v5 }
 0x2ba   : > { %v4564_v45 = vpop.f32.mrf.mxu2 }
 0x2bb   : > { %v2056_v22 = vpop.f32.mrf.mxu1 }
 0x2bc   : > { %v2057_v31 = vadd.f32 %v4402_v0, %v2056_v22  ;;  %v3447_v57 = vpop.eup %3446 }
 0x2be   : > { %3448 = vtanh.f32 %v2057_v31  ;;  %v2121_v26 = vpop.f32.mrf.mxu3 }
 0x2bf   : > { %v2122_v8 = vadd.f32 %v4402_v0, %v2121_v26  ;;  %3450 = vtanh.f32 %v2120_v3 }
 0x2c1   : > { %3452 = vtanh.f32 %v2122_v8 }
 0x2c2   : > { %v4569_v9 = vpop.f32.mrf.mxu2 }
 0x2c3   : > { %v2059_v4 = vpop.f32.mrf.mxu1 }
 0x2c4   : > { %v3449_v16 = vpop.eup %3448  ;;  %v2060_v41 = vadd.f32 %v4574_v53, %v2059_v4 }
 0x2c5   : > { %v2218_v62 = vpack.c.bf16 %v3449_v16, %v3447_v57  ;;  %v3451_v61 = vpop.eup %3450 }
 0x2c6   : > { %v2124_v28 = vpop.f32.mrf.mxu3  ;;  %3454 = vtanh.f32 %v2060_v41 }
 0x2c7   : > { %v3453_v11 = vpop.eup %3452  ;;  %2386 = vmatmul.bf16.gmra.mxu2 %v2218_v62  ;;  %v2125_v33 = vadd.f32 %v4574_v53, %v2124_v28 }
 0x2c8   : > { %v2231_v0 = vpack.c.bf16 %v3453_v11, %v3451_v61 }
 0x2ca   : > { %v4577_v43 = vpop.f32.mrf.mxu2  ;;  %2451 = vmatmul.bf16.gmra.mxu3 %v2231_v0 }
 0x2cb   : > { %v2061_v21 = vpop.f32.mrf.mxu1 }
 0x2cc   : > { %v2062_v2 = vadd.f32 %v4574_v53, %v2061_v21  ;;  %v3455_v17 = vpop.eup %3454 }
 0x2ce   : > { %3456 = vtanh.f32 %v2062_v2  ;;  %v2126_v27 = vpop.f32.mrf.mxu3 }
 0x2cf   : > { %v2127_v35 = vadd.f32 %v4574_v53, %v2126_v27  ;;  %3458 = vtanh.f32 %v2125_v33 }
 0x2d1   : > { %3460 = vtanh.f32 %v2127_v35 }
 0x2d2   : > { %v4582_v24 = vpop.f32.mrf.mxu2 }
 0x2d3   : > { %v2064_v36 = vpop.f32.mrf.mxu1 }
 0x2d4   : > { %v3457_v50 = vpop.eup %3456  ;;  %v2065_v25 = vadd.f32 %v4574_v53, %v2064_v36 }
 0x2d5   : > { %v2219_v39 = vpack.c.bf16 %v3457_v50, %v3455_v17  ;;  %v3459_v54 = vpop.eup %3458 }
 0x2d6   : > { %3462 = vtanh.f32 %v2065_v25 }
 0x2d7   : > { %v3461_v30 = vpop.eup %3460  ;;  %2391 = vmatmul.bf16.gmra.mxu2 %v2219_v39 }
 0x2d8   : > { %v2232_v49 = vpack.c.bf16 %v3461_v30, %v3459_v54 }
 0x2d9   : > { %v2605_v7 = vpop.xlane.xlu2 %2604 }
 0x2da   : > { %v4593_v52 = vpop.f32.mrf.mxu2  ;;  %v2736_v58 = vadd.f32 %v4584_v46, %v2605_v7  ;;  %2456 = vmatmul.bf16.gmra.mxu3 %v2232_v49 }
 0x2db   : > { %v2066_v59 = vpop.f32.mrf.mxu1 }
 0x2dc   : > { %v2067_v23 = vadd.f32 %v4574_v53, %v2066_v59  ;;  %2801 = vst.msk [vmem:[%s4591_s25] sm:$0xff] %vm2800_vm0, %v2736_v58  ;;  %v3463_v37 = vpop.eup %3462 }
 0x2de   : > { %3464 = vtanh.f32 %v2067_v23  ;;  %v2129_v60 = vpop.f32.mrf.mxu3  ;;  %v2318_v23 = vadd.f32 %v4499_v19, %v4516_v56  ;;  %v2320_v56 = vadd.f32 %v4499_v19, %v4521_v29 }
 0x2df   : > { %v2130_v14 = vadd.f32 %v4574_v53, %v2129_v60 }
 0x2e0   : > { %v2607_v42 = vpop.xlane.xlu0 %2606 }
 0x2e1   : > { %v2737_v40 = vadd.f32 %v4584_v46, %v2607_v42  ;;  %3466 = vtanh.f32 %v2130_v14 }
 0x2e2   : > { %v4599_v34 = vpop.f32.mrf.mxu2 }
 0x2e3   : > { %v2069_v63 = vpop.f32.mrf.mxu1  ;;  %2802 = vst.msk [vmem:[%s4591_s25 + $0x8] sm:$0xff] %vm2800_vm0, %v2737_v40 }
 0x2e4   : > { %v3465_v44 = vpop.eup %3464  ;;  %v2070_v18 = vadd.f32 %v4574_v53, %v2069_v63 }
 0x2e5   : > { %v2220_v12 = vpack.c.bf16 %v3465_v44, %v3463_v37 }
 0x2e6   : > { %v2131_v20 = vpop.f32.mrf.mxu3 }
 0x2e7   : > { %v2132_v6 = vadd.f32 %v4574_v53, %v2131_v20  ;;  %2396 = vmatmul.bf16.gmra.mxu2 %v2220_v12  ;;  %v3467_v31 = vpop.eup %3466 }
 0x2e9   : > { %3468 = vtanh.f32 %v2132_v6 }
 0x2ea   : > { %v4607_v5 = vpop.f32.mrf.mxu2  ;;  %3470 = vtanh.f32 %v2070_v18 }
 0x2eb   : > { %v2071_v13 = vpop.f32.mrf.mxu1 }
 0x2ec   : > { %v2072_v22 = vadd.f32 %v4574_v53, %v2071_v13 }
 0x2ee   : > { %3472 = vtanh.f32 %v2072_v22 }
 0x2ef   : > { %v3469_v3 = vpop.eup %3468 }
 0x2f0   : > { %v2233_v26 = vpack.c.bf16 %v3469_v3, %v3467_v31  ;;  %v3471_v4 = vpop.eup %3470  ;;  %v2323_v3 = vadd.f32 %v4499_v19, %v4527_v38 }
 0x2f2   : > { %v4610_v8 = vpop.f32.mrf.mxu2  ;;  %2461 = vmatmul.bf16.gmra.mxu3 %v2233_v26 }
 0x2f3   : > { %v2074_v57 = vpop.f32.mrf.mxu1 }
 0x2f4   : > { %v3473_v16 = vpop.eup %3472  ;;  %v2075_v28 = vadd.f32 %v4574_v53, %v2074_v57 }
 0x2f5   : > { %v2221_v62 = vpack.c.bf16 %v3473_v16, %v3471_v4 }
 0x2f6   : > { %v2134_v61 = vpop.f32.mrf.mxu3  ;;  %3474 = vtanh.f32 %v2075_v28 }
 0x2f7   : > { %2401 = vmatmul.bf16.gmra.mxu2 %v2221_v62  ;;  %v2135_v21 = vadd.f32 %v4574_v53, %v2134_v61  ;;  %v2325_v62 = vadd.f32 %v4499_v19, %v4531_v48 }
 0x2fa   : > { %v4613_v11 = vpop.f32.mrf.mxu2 }
 0x2fb   : > { %v2076_v41 = vpop.f32.mrf.mxu1 }
 0x2fc   : > { %v2077_v0 = vadd.f32 %v4574_v53, %v2076_v41  ;;  %v3475_v17 = vpop.eup %3474 }
 0x2fe   : > { %3476 = vtanh.f32 %v2077_v0  ;;  %v2136_v2 = vpop.f32.mrf.mxu3 }
 0x2ff   : > { %v2137_v33 = vadd.f32 %v4574_v53, %v2136_v2  ;;  %3478 = vtanh.f32 %v2135_v21 }
 0x301   : > { %3480 = vtanh.f32 %v2137_v33 }
 0x302   : > { %v4618_v27 = vpop.f32.mrf.mxu2 }
 0x303   : > { %v2079_v35 = vpop.f32.mrf.mxu1 }
 0x304   : > { %v3477_v36 = vpop.eup %3476  ;;  %v2080_v7 = vadd.f32 %v4574_v53, %v2079_v35 }
 0x305   : > { %v2222_v50 = vpack.c.bf16 %v3477_v36, %v3475_v17  ;;  %v3479_v39 = vpop.eup %3478 }
 0x306   : > { %v2432_v54 = vpop.f32.mrf.mxu3 }
 0x307   : > { %v3481_v30 = vpop.eup %3480  ;;  %2406 = vmatmul.bf16.gmra.mxu2 %v2222_v50  ;;  %v2433_v25 = vadd.f32 %v4499_v19, %v2432_v54  ;;  %v2328_v50 = vadd.f32 %v4499_v19, %v4537_v55 }
 0x308   : > { %v2234_v49 = vpack.c.bf16 %v3481_v30, %v3479_v39 }
 0x309   : > { %3482 = vtanh.f32 %v2433_v25 }
 0x30a   : > { %v4622_v58 = vpop.f32.mrf.mxu2  ;;  %2466 = vmatmul.bf16.gmra.mxu3 %v2234_v49  ;;  %3484 = vtanh.f32 %v2080_v7 }
 0x30b   : > { %v2081_v59 = vpop.f32.mrf.mxu1 }
 0x30c   : > { %v2082_v60 = vadd.f32 %v4574_v53, %v2081_v59 }
 0x30e   : > { %3486 = vtanh.f32 %v2082_v60  ;;  %v2434_v42 = vpop.f32.mrf.mxu3 }
 0x30f   : > { %v3483_v37 = vpop.eup %3482  ;;  %3488 = vtanh.f32 %v2318_v23  ;;  %v2435_v40 = vadd.f32 %v4499_v19, %v2434_v42 }
 0x310   : > { %v2588_v63 = vmul.f32 %v3483_v37, %v4508_v32  ;;  %v3485_v12 = vpop.eup %3484  ;;  %v2330_v37 = vadd.f32 %v4499_v19, %v4541_v1 }
 0x311   : > { %3490 = vtanh.f32 %v2435_v40 }
 0x312   : > { %v4629_v44 = vpop.f32.mrf.mxu2  ;;  %2700 = vadd.xlane.f32.xlu1 %v2588_v63  ;;  %3492 = vtanh.f32 %v2320_v56 }
 0x313   : > { %v2084_v14 = vpop.f32.mrf.mxu1 }
 0x314   : > { %v3487_v20 = vpop.eup %3486  ;;  %v2085_v4 = vadd.f32 %v4574_v53, %v2084_v14 }
 0x315   : > { %v3489_v6 = vpop.eup %3488  ;;  %v2223_v18 = vpack.c.bf16 %v3487_v20, %v3485_v12 }
 0x316   : > { %v2437_v13 = vpop.f32.mrf.mxu3  ;;  %v2542_v57 = vmul.f32 %v3489_v6, %v4508_v32 }
 0x317   : > { %v3491_v22 = vpop.eup %3490  ;;  %2411 = vmatmul.bf16.gmra.mxu2 %v2223_v18  ;;  %v2438_v31 = vadd.f32 %v4499_v19, %v2437_v13 }
 0x318   : > { %v2589_v26 = vmul.f32 %v3491_v22, %v4508_v32  ;;  %v3493_v28 = vpop.eup %3492  ;;  %v2333_v22 = vadd.f32 %v4499_v19, %v4547_v51 }
 0x319   : > { %3494 = vtanh.f32 %v2438_v31  ;;  %v2543_v2 = vmul.f32 %v3493_v28, %v4508_v32 }
 0x31a   : > { %v4639_v29 = vpop.f32.mrf.mxu2  ;;  %2702 = vadd.xlane.f32.xlu2 %v2589_v26  ;;  %2608 = vadd.xlane.f32.xlu1 %v2542_v57  ;;  %3496 = vtanh.f32 %v2323_v3 }
 0x31b   : > { %v2086_v16 = vpop.f32.mrf.mxu1  ;;  %3498 = vtanh.f32 %v2085_v4 }
 0x31c   : > { %v2087_v61 = vadd.f32 %v4574_v53, %v2086_v16 }
 0x31e   : > { %3500 = vtanh.f32 %v2087_v61  ;;  %v2439_v38 = vpop.f32.mrf.mxu3 }
 0x31f   : > { %v3495_v41 = vpop.eup %3494  ;;  %3502 = vtanh.f32 %v2325_v62  ;;  %v2440_v0 = vadd.f32 %v4499_v19, %v2439_v38 }
 0x320   : > { %v2590_v21 = vmul.f32 %v3495_v41, %v4508_v32  ;;  %v3497_v33 = vpop.eup %3496  ;;  %v2335_v41 = vadd.f32 %v4499_v19, %v4551_v47 }
 0x321   : > { %3504 = vtanh.f32 %v2440_v0  ;;  %v3499_v17 = vpop.eup %3498  ;;  %v2544_v59 = vmul.f32 %v3497_v33, %v4508_v32 }
 0x322   : > { %v4647_v35 = vpop.f32.mrf.mxu2  ;;  %2704 = vadd.xlane.f32.xlu0 %v2590_v21  ;;  %2610 = vadd.xlane.f32.xlu2 %v2543_v2  ;;  %3506 = vtanh.f32 %v2328_v50 }
 0x323   : > { %v2089_v48 = vpop.f32.mrf.mxu1 }
 0x324   : > { %v3501_v36 = vpop.eup %3500  ;;  %v2090_v60 = vadd.f32 %v4574_v53, %v2089_v48 }
 0x325   : > { %v3503_v39 = vpop.eup %3502  ;;  %v2224_v54 = vpack.c.bf16 %v3501_v36, %v3499_v17 }
 0x326   : > { %v2442_v30 = vpop.f32.mrf.mxu3  ;;  %v2545_v7 = vmul.f32 %v3503_v39, %v4508_v32 }
 0x327   : > { %v3505_v25 = vpop.eup %3504  ;;  %2416 = vmatmul.bf16.gmra.mxu2 %v2224_v54  ;;  %v2443_v49 = vadd.f32 %v4499_v19, %v2442_v30 }
 0x328   : > { %v2591_v23 = vmul.f32 %v3505_v25, %v4508_v32  ;;  %v3507_v63 = vpop.eup %3506 }
 0x329   : > { %3508 = vtanh.f32 %v2443_v49  ;;  %v2546_v6 = vmul.f32 %v3507_v63, %v4508_v32 }
 0x32a   : > { %v4656_v42 = vpop.f32.mrf.mxu2  ;;  %2614 = vadd.xlane.f32.xlu0 %v2545_v7  ;;  %2612 = vadd.xlane.f32.xlu2 %v2544_v59  ;;  %3510 = vtanh.f32 %v2090_v60 }
 0x32b   : > { %v2091_v55 = vpop.f32.mrf.mxu1  ;;  %2706 = vadd.xlane.f32.xlu1 %v2591_v23 }
 0x32c   : > { %v2092_v40 = vadd.f32 %v4574_v53, %v2091_v55 }
 0x32e   : > { %3512 = vtanh.f32 %v2092_v40  ;;  %v2444_v14 = vpop.f32.mrf.mxu3 }
 0x32f   : > { %v3509_v12 = vpop.eup %3508  ;;  %3514 = vtanh.f32 %v2330_v37  ;;  %v2445_v56 = vadd.f32 %v4499_v19, %v2444_v14  ;;  %v2340_v37 = vadd.f32 %v4499_v19, %v4561_v10 }
 0x330   : > { %v2592_v20 = vmul.f32 %v3509_v12, %v4508_v32  ;;  %v3511_v13 = vpop.eup %3510 }
 0x331   : > { %3516 = vtanh.f32 %v2445_v56 }
 0x332   : > { %v4664_v18 = vpop.f32.mrf.mxu2  ;;  %2708 = vadd.xlane.f32.xlu2 %v2592_v20  ;;  %3518 = vtanh.f32 %v2333_v22  ;;  %v2343_v20 = vadd.f32 %v4499_v19, %v4564_v45 }
 0x333   : > { %v2094_v1 = vpop.f32.mrf.mxu1  ;;  %2616 = vadd.xlane.f32.xlu1 %v2546_v6 }
 0x334   : > { %v3513_v31 = vpop.eup %3512  ;;  %v2095_v28 = vadd.f32 %v4574_v53, %v2094_v1 }
 0x335   : > { %v3515_v3 = vpop.eup %3514  ;;  %v2225_v26 = vpack.c.bf16 %v3513_v31, %v3511_v13 }
 0x336   : > { %v2447_v57 = vpop.f32.mrf.mxu3  ;;  %v2547_v61 = vmul.f32 %v3515_v3, %v4508_v32 }
 0x337   : > { %v3517_v4 = vpop.eup %3516  ;;  %2421 = vmatmul.bf16.gmra.mxu2 %v2225_v26  ;;  %v2448_v16 = vadd.f32 %v4499_v19, %v2447_v57  ;;  %v2345_v26 = vadd.f32 %v4499_v19, %v4569_v9  ;;  %v2353_v9 = vadd.f32 %v4499_v19, %v4593_v52 }
 0x338   : > { %v2593_v62 = vmul.f32 %v3517_v4, %v4508_v32  ;;  %v3519_v21 = vpop.eup %3518 }
 0x339   : > { %3520 = vtanh.f32 %v2448_v16  ;;  %v2548_v17 = vmul.f32 %v3519_v21, %v4508_v32 }
 0x33a   : > { %v4672_v38 = vpop.f32.mrf.mxu2  ;;  %2710 = vadd.xlane.f32.xlu0 %v2593_v62  ;;  %2618 = vadd.xlane.f32.xlu2 %v2547_v61  ;;  %3522 = vtanh.f32 %v2095_v28 }
 0x33b   : > { %v2096_v51 = vpop.f32.mrf.mxu1 }
 0x33c   : > { %v2097_v0 = vadd.f32 %v4574_v53, %v2096_v51  ;;  %v2338_v53 = vadd.f32 %v4499_v19, %v4557_v15  ;;  %v2348_v51 = vadd.f32 %v4499_v19, %v4577_v43  ;;  %v2360_v43 = vadd.f32 %v4499_v19, %v4610_v8 }
 0x33d   : > { %v2368_v8 = vadd.f32 %v4499_v19, %v4622_v58  ;;  %v4741_v58 = vld [vmem:[%s5039_s9] ss:$0 sm:$0xff] }
 0x33e   : > { %3524 = vtanh.f32 %v2097_v0  ;;  %v2449_v2 = vpop.f32.mrf.mxu3 }
 0x33f   : > { %v3521_v33 = vpop.eup %3520  ;;  %3526 = vtanh.f32 %v2335_v41  ;;  %v2450_v48 = vadd.f32 %v4499_v19, %v2449_v2 }
 0x340   : > { %v2594_v36 = vmul.f32 %v3521_v33, %v4508_v32  ;;  %v3523_v47 = vpop.eup %3522 }
 0x341   : > { %3528 = vtanh.f32 %v2450_v48  ;;  %v2355_v48 = vadd.f32 %v4499_v19, %v4599_v34  ;;  %v2363_v34 = vadd.f32 %v4499_v19, %v4613_v11 }
 0x342   : > { %v4680_v50 = vpop.f32.mrf.mxu2  ;;  %2620 = vadd.xlane.f32.xlu0 %v2548_v17  ;;  %2712 = vadd.xlane.f32.xlu1 %v2594_v36  ;;  %3530 = vtanh.f32 %v2338_v53 }
 0x344   : > { %v3525_v39 = vpop.eup %3524 }
 0x345   : > { %v3527_v54 = vpop.eup %3526  ;;  %v2226_v30 = vpack.c.bf16 %v3525_v39, %v3523_v47 }
 0x346   : > { %v2549_v7 = vmul.f32 %v3527_v54, %v4508_v32 }
 0x347   : > { %v3529_v25 = vpop.eup %3528  ;;  %2426 = vmatmul.bf16.gmra.mxu2 %v2226_v30 }
 0x348   : > { %v2595_v49 = vmul.f32 %v3529_v25, %v4508_v32  ;;  %v3531_v23 = vpop.eup %3530 }
 0x349   : > { %v2550_v15 = vmul.f32 %v3531_v23, %v4508_v32 }
 0x34a   : > { %v4686_v59 = vpop.f32.mrf.mxu2  ;;  %2714 = vadd.xlane.f32.xlu2 %v2595_v49  ;;  %2622 = vadd.xlane.f32.xlu1 %v2549_v7  ;;  %v2350_v49 = vadd.f32 %v4499_v19, %v4582_v24 }
 0x34d   : > { %v2452_v60 = vpop.f32.mrf.mxu3 }
 0x34e   : > { %v2453_v55 = vadd.f32 %v4499_v19, %v2452_v60 }
 0x350   : > { %3532 = vtanh.f32 %v2453_v55 }
 0x351   : > { %3534 = vtanh.f32 %v2340_v37 }
 0x352   : > { %v4692_v40 = vpop.f32.mrf.mxu2  ;;  %2624 = vadd.xlane.f32.xlu2 %v2550_v15  ;;  %v2370_v15 = vadd.f32 %v4741_v58, %v4629_v44 }
 0x355   : > { %v2454_v63 = vpop.f32.mrf.mxu3 }
 0x356   : > { %v3533_v14 = vpop.eup %3532  ;;  %v2455_v12 = vadd.f32 %v4499_v19, %v2454_v63 }
 0x357   : > { %v2596_v56 = vmul.f32 %v3533_v14, %v4508_v32  ;;  %v3535_v1 = vpop.eup %3534 }
 0x358   : > { %3536 = vtanh.f32 %v2455_v12  ;;  %v2551_v31 = vmul.f32 %v3535_v1, %v4508_v32  ;;  %v2378_v1 = vadd.f32 %v4741_v58, %v4656_v42 }
 0x359   : > { %2716 = vadd.xlane.f32.xlu0 %v2596_v56  ;;  %3538 = vtanh.f32 %v2343_v20  ;;  %v4755_v56 = vld [vmem:[%s5040_s10] ss:$0 sm:$0xff] }
 0x35a   : > { %v4698_v6 = vpop.f32.mrf.mxu2 }
 0x35d   : > { %v2457_v13 = vpop.f32.mrf.mxu3 }
 0x35e   : > { %v3537_v10 = vpop.eup %3536  ;;  %v2458_v22 = vadd.f32 %v4499_v19, %v2457_v13  ;;  %v2383_v13 = vadd.f32 %v4741_v58, %v4672_v38 }
 0x35f   : > { %v2597_v3 = vmul.f32 %v3537_v10, %v4508_v32  ;;  %v3539_v45 = vpop.eup %3538 }
 0x360   : > { %3540 = vtanh.f32 %v2458_v22  ;;  %v2552_v28 = vmul.f32 %v3539_v45, %v4508_v32 }
 0x361   : > { %2626 = vadd.xlane.f32.xlu0 %v2551_v31  ;;  %2718 = vadd.xlane.f32.xlu1 %v2597_v3  ;;  %3542 = vtanh.f32 %v2345_v26  ;;  %v2365_v31 = vadd.f32 %v4741_v58, %v4618_v27  ;;  %v2385_v27 = vadd.f32 %v4741_v58, %v4680_v50 }
 0x362   : > { %v4705_v57 = vpop.f32.mrf.mxu2 }
 0x365   : > { %v2459_v4 = vpop.f32.mrf.mxu3 }
 0x366   : > { %v3541_v16 = vpop.eup %3540  ;;  %v2460_v62 = vadd.f32 %v4499_v19, %v2459_v4 }
 0x367   : > { %v2598_v61 = vmul.f32 %v3541_v16, %v4508_v32  ;;  %v3543_v0 = vpop.eup %3542 }
 0x368   : > { %3544 = vtanh.f32 %v2460_v62  ;;  %v2553_v33 = vmul.f32 %v3543_v0, %v4508_v32  ;;  %v2373_v0 = vadd.f32 %v4741_v58, %v4639_v29  ;;  %v2393_v29 = vadd.f32 %v4741_v58, %v4698_v6 }
 0x369   : > { %2720 = vadd.xlane.f32.xlu2 %v2598_v61  ;;  %2628 = vadd.xlane.f32.xlu1 %v2552_v28  ;;  %3546 = vtanh.f32 %v2348_v51  ;;  %v2390_v28 = vadd.f32 %v4741_v58, %v4692_v40 }
 0x36a   : > { %v4714_v41 = vpop.f32.mrf.mxu2  ;;  %3548 = vtanh.f32 %v2353_v9 }
 0x36b   : > { %3550 = vtanh.f32 %v2355_v48 }
 0x36c   : > { %3552 = vtanh.f32 %v2360_v43 }
 0x36e   : > { %v3545_v21 = vpop.eup %3544 }
 0x36f   : > { %v2599_v2 = vmul.f32 %v3545_v21, %v4508_v32  ;;  %v3547_v52 = vpop.eup %3546 }
 0x370   : > { %v3549_v36 = vpop.eup %3548  ;;  %v2554_v39 = vmul.f32 %v3547_v52, %v4508_v32 }
 0x371   : > { %2722 = vadd.xlane.f32.xlu0 %v2599_v2  ;;  %2630 = vadd.xlane.f32.xlu2 %v2553_v33  ;;  %v2556_v54 = vmul.f32 %v3549_v36, %v4508_v32  ;;  %v3551_v25 = vpop.eup %3550 }
 0x372   : > { %v4722_v17 = vpop.f32.mrf.mxu2  ;;  %v3553_v7 = vpop.eup %3552  ;;  %v2557_v60 = vmul.f32 %v3551_v25, %v4508_v32 }
 0x373   : > { %v2559_v11 = vmul.f32 %v3553_v7, %v4508_v32 }
 0x375   : > { %v2462_v47 = vpop.f32.mrf.mxu3 }
 0x376   : > { %v2463_v53 = vadd.f32 %v4499_v19, %v2462_v47  ;;  %v2375_v19 = vadd.f32 %v4741_v58, %v4647_v35  ;;  %v2398_v47 = vadd.f32 %v4741_v58, %v4714_v41 }
 0x378   : > { %3554 = vtanh.f32 %v2463_v53 }
 0x379   : > { %2632 = vadd.xlane.f32.xlu0 %v2554_v39  ;;  %2636 = vadd.xlane.f32.xlu2 %v2556_v54  ;;  %3556 = vtanh.f32 %v2363_v34  ;;  %v2380_v54 = vadd.f32 %v4741_v58, %v4664_v18 }
 0x37a   : > { %v4731_v30 = vpop.f32.mrf.mxu2  ;;  %3558 = vtanh.f32 %v2368_v8 }
 0x37b   : > { %3560 = vtanh.f32 %v2350_v49 }
 0x37c   : > { %3562 = vtanh.f32 %v2370_v15 }
 0x37d   : > { %3564 = vtanh.f32 %v2375_v19 }
 0x37e   : > { %v3555_v23 = vpop.eup %3554 }
 0x37f   : > { %v2600_v55 = vmul.f32 %v3555_v23, %v4508_v32  ;;  %v3557_v37 = vpop.eup %3556  ;;  %v2358_v32 = vadd.f32 %v4741_v58, %v4607_v5 }
 0x380   : > { %v3559_v63 = vpop.eup %3558  ;;  %v2560_v35 = vmul.f32 %v4755_v56, %v3557_v37 }
 0x381   : > { %2638 = vadd.xlane.f32.xlu0 %v2557_v60  ;;  %2642 = vadd.xlane.f32.xlu2 %v2559_v11  ;;  %v3561_v14 = vpop.eup %3560  ;;  %3566 = vtanh.f32 %v2358_v32  ;;  %v2562_v20 = vmul.f32 %v4755_v56, %v3559_v63  ;;  %v2388_v32 = vadd.f32 %v4741_v58, %v4686_v59 }
 0x382   : > { %v4747_v24 = vpop.f32.mrf.mxu2  ;;  %2724 = vadd.xlane.f32.xlu1 %v2600_v55  ;;  %v2555_v5 = vmul.f32 %v4755_v56, %v3561_v14  ;;  %v3563_v22 = vpop.eup %3562  ;;  %3568 = vtanh.f32 %v2378_v1  ;;  %v2400_v55 = vadd.f32 %v4741_v58, %v4722_v17 }
 0x383   : > { %v3565_v3 = vpop.eup %3564  ;;  %3570 = vtanh.f32 %v2383_v13  ;;  %v2563_v38 = vmul.f32 %v4755_v56, %v3563_v22  ;;  %v2405_v15 = vadd.f32 %v4741_v58, %v4747_v24 }
 0x384   : > { %3572 = vtanh.f32 %v2365_v31  ;;  %v2565_v62 = vmul.f32 %v4755_v56, %v3565_v3  ;;  %v2395_v31 = vadd.f32 %v4741_v58, %v4705_v57 }
 0x385   : > { %v2701_v12 = vpop.xlane.xlu1 %2700  ;;  %3574 = vtanh.f32 %v2385_v27 }
 0x386   : > { %v2784_v44 = vadd.f32 %v4584_v46, %v2701_v12  ;;  %3576 = vtanh.f32 %v2390_v28  ;;  %v2403_v28 = vadd.f32 %v4741_v58, %v4731_v30 }
 0x387   : > { %v3567_v26 = vpop.eup %3566  ;;  %3578 = vtanh.f32 %v2373_v0 }
 0x388   : > { %2849 = vst.msk [vmem:[%s4591_s25 + $0x180] sm:$0xff] %vm2800_vm0, %v2784_v44  ;;  %v2558_v61 = vmul.f32 %v4755_v56, %v3567_v26  ;;  %v3569_v9 = vpop.eup %3568  ;;  %3580 = vtanh.f32 %v2393_v29 }
 0x389   : > { %2644 = vadd.xlane.f32.xlu0 %v2560_v35  ;;  %2648 = vadd.xlane.f32.xlu2 %v2562_v20  ;;  %v3571_v21 = vpop.eup %3570  ;;  %v2566_v40 = vmul.f32 %v4755_v56, %v3569_v9  ;;  %3582 = vtanh.f32 %v2398_v47 }
 0x38a   : > { %v4766_v10 = vpop.f32.mrf.mxu2  ;;  %2634 = vadd.xlane.f32.xlu1 %v2555_v5  ;;  %v3573_v2 = vpop.eup %3572  ;;  %v2568_v52 = vmul.f32 %v4755_v56, %v3571_v21  ;;  %3584 = vtanh.f32 %v2380_v54 }
 0x38b   : > { %v2561_v36 = vmul.f32 %v4755_v56, %v3573_v2  ;;  %v3575_v39 = vpop.eup %3574  ;;  %3586 = vtanh.f32 %v2400_v55  ;;  %v2408_v59 = vadd.f32 %v4741_v58, %v4766_v10 }
 0x38c   : > { %v3577_v34 = vpop.eup %3576  ;;  %v2569_v60 = vmul.f32 %v4755_v56, %v3575_v39  ;;  %3588 = vtanh.f32 %v2405_v15 }
 0x38d   : > { %v2703_v45 = vpop.xlane.xlu2 %2702  ;;  %v2609_v4 = vpop.xlane.xlu1 %2608  ;;  %v2571_v18 = vmul.f32 %v4755_v56, %v3577_v34  ;;  %3590 = vtanh.f32 %v2388_v32 }
 0x38e   : > { %v2785_v42 = vadd.f32 %v4584_v46, %v2703_v45  ;;  %v2738_v16 = vadd.f32 %v4584_v46, %v2609_v4  ;;  %v3579_v8 = vpop.eup %3578  ;;  %3592 = vtanh.f32 %v2408_v59 }
 0x38f   : > { %v2564_v11 = vmul.f32 %v4755_v56, %v3579_v8  ;;  %v3581_v37 = vpop.eup %3580  ;;  %v2464_v8 = vpop.f32.mrf.mxu3 }
 0x390   : > { %2850 = vst.msk [vmem:[%s4591_s25 + $0x188] sm:$0xff] %vm2800_vm0, %v2785_v42  ;;  %v3583_v63 = vpop.eup %3582  ;;  %v2572_v35 = vmul.f32 %v4755_v56, %v3581_v37 }
 0x391   : > { %2803 = vst.msk [vmem:[%s4591_s25 + $0x10] sm:$0xff] %vm2800_vm0, %v2738_v16  ;;  %2650 = vadd.xlane.f32.xlu0 %v2563_v38  ;;  %2654 = vadd.xlane.f32.xlu2 %v2565_v62  ;;  %v3585_v14 = vpop.eup %3584  ;;  %v2574_v20 = vmul.f32 %v4755_v56, %v3583_v63 }
 0x392   : > { %v4783_v51 = vpop.f32.mrf.mxu2  ;;  %2640 = vadd.xlane.f32.xlu1 %v2558_v61  ;;  %v2567_v5 = vmul.f32 %v4755_v56, %v3585_v14  ;;  %v3587_v22 = vpop.eup %3586 }
 0x393   : > { %v3589_v3 = vpop.eup %3588  ;;  %v2575_v16 = vmul.f32 %v4755_v56, %v3587_v22  ;;  %v2410_v29 = vadd.f32 %v4741_v58, %v4783_v51 }
 0x394   : > { %v3591_v26 = vpop.eup %3590  ;;  %v2577_v38 = vmul.f32 %v4755_v56, %v3589_v3 }
 0x395   : > { %v2611_v50 = vpop.xlane.xlu2 %2610  ;;  %v2705_v33 = vpop.xlane.xlu0 %2704  ;;  %v2570_v62 = vmul.f32 %v4755_v56, %v3591_v26 }
 0x396   : > { %v2739_v48 = vadd.f32 %v4584_v46, %v2611_v50  ;;  %v2786_v43 = vadd.f32 %v4584_v46, %v2705_v33  ;;  %v3593_v27 = vpop.eup %3592 }
 0x397   : > { %v2467_v55 = vpop.f32.mrf.mxu3 }
 0x398   : > { %2804 = vst.msk [vmem:[%s4591_s25 + $0x18] sm:$0xff] %vm2800_vm0, %v2739_v48 }
 0x399   : > { %2851 = vst.msk [vmem:[%s4591_s25 + $0x190] sm:$0xff] %vm2800_vm0, %v2786_v43  ;;  %2656 = vadd.xlane.f32.xlu0 %v2566_v40  ;;  %2660 = vadd.xlane.f32.xlu2 %v2568_v52  ;;  %v2578_v43 = vmul.f32 %v4755_v56, %v3593_v27  ;;  %v4897_v27 = vld [vmem:[#allocation2] ss:$0 sm:$0xff] }
 0x39a   : > { %v2412_v53 = vpop.f32.mrf.mxu2  ;;  %2646 = vadd.xlane.f32.xlu1 %v2561_v36 }
 0x39b   : > { %v2413_v1 = vadd.f32 %v4741_v58, %v2412_v53 }
 0x39d   : > { %v2613_v25 = vpop.xlane.xlu2 %2612  ;;  %v2615_v6 = vpop.xlane.xlu0 %2614  ;;  %3594 = vtanh.f32 %v2413_v1 }
 0x39e   : > { %v2740_v49 = vadd.f32 %v4584_v46, %v2613_v25  ;;  %v2707_v7 = vpop.xlane.xlu1 %2706  ;;  %v2741_v41 = vadd.f32 %v4584_v46, %v2615_v6  ;;  %3596 = vtanh.f32 %v2395_v31 }
 0x39f   : > { %v2787_v23 = vadd.f32 %v4584_v46, %v2707_v7 }
 0x3a0   : > { %2805 = vst.msk [vmem:[%s4591_s25 + $0x20] sm:$0xff] %vm2800_vm0, %v2740_v49 }
 0x3a1   : > { %2852 = vst.msk [vmem:[%s4591_s25 + $0x198] sm:$0xff] %vm2800_vm0, %v2787_v23  ;;  %2662 = vadd.xlane.f32.xlu0 %v2569_v60  ;;  %2666 = vadd.xlane.f32.xlu2 %v2571_v18 }
 0x3a2   : > { %2806 = vst.msk [vmem:[%s4591_s25 + $0x28] sm:$0xff] %vm2800_vm0, %v2741_v41  ;;  %v2414_v19 = vpop.f32.mrf.mxu2  ;;  %2652 = vadd.xlane.f32.xlu1 %v2564_v11 }
 0x3a3   : > { %v2415_v57 = vadd.f32 %v4741_v58, %v2414_v19  ;;  %v3595_v0 = vpop.eup %3594 }
 0x3a4   : > { %v3597_v21 = vpop.eup %3596  ;;  %v2580_v40 = vmul.f32 %v4755_v56, %v3595_v0 }
 0x3a5   : > { %v2709_v17 = vpop.xlane.xlu2 %2708  ;;  %3598 = vtanh.f32 %v2415_v57  ;;  %v2573_v30 = vmul.f32 %v4755_v56, %v3597_v21 }
 0x3a6   : > { %v2788_v12 = vadd.f32 %v4584_v46, %v2709_v17  ;;  %v2617_v44 = vpop.xlane.xlu1 %2616 }
 0x3a7   : > { %v2742_v24 = vadd.f32 %v4584_v46, %v2617_v44 }
 0x3a8   : > { %2853 = vst.msk [vmem:[%s4591_s25 + $0x1a0] sm:$0xff] %vm2800_vm0, %v2788_v12 }
 0x3a9   : > { %2807 = vst.msk [vmem:[%s4591_s25 + $0x30] sm:$0xff] %vm2800_vm0, %v2742_v24  ;;  %2668 = vadd.xlane.f32.xlu0 %v2572_v35  ;;  %2672 = vadd.xlane.f32.xlu2 %v2574_v20  ;;  %v2465_v24 = vadd.f32 %v4741_v58, %v2464_v8  ;;  %v2469_v35 = vpop.f32.mrf.mxu3 }
 0x3aa   : > { %v4832_v13 = vpop.f32.mrf.mxu2  ;;  %2658 = vadd.xlane.f32.xlu1 %v2567_v5  ;;  %v2470_v1 = vadd.f32 %v4741_v58, %v2469_v35 }
 0x3ab   : > { %v3599_v36 = vpop.eup %3598  ;;  %v2418_v23 = vadd.f32 %v4741_v58, %v4832_v13 }
 0x3ac   : > { %v2581_v49 = vmul.f32 %v4755_v56, %v3599_v36 }
 0x3ad   : > { %v2619_v45 = vpop.xlane.xlu2 %2618  ;;  %v2711_v10 = vpop.xlane.xlu0 %2710 }
 0x3ae   : > { %v2743_v4 = vadd.f32 %v4584_v46, %v2619_v45  ;;  %v2789_v42 = vadd.f32 %v4584_v46, %v2711_v10 }
 0x3b0   : > { %2808 = vst.msk [vmem:[%s4591_s25 + $0x38] sm:$0xff] %vm2800_vm0, %v2743_v4  ;;  %v2468_v4 = vadd.f32 %v4741_v58, %v2467_v55 }
 0x3b1   : > { %2854 = vst.msk [vmem:[%s4591_s25 + $0x1a8] sm:$0xff] %vm2800_vm0, %v2789_v42  ;;  %2674 = vadd.xlane.f32.xlu0 %v2575_v16  ;;  %2678 = vadd.xlane.f32.xlu2 %v2577_v38 }
 0x3b2   : > { %v2419_v61 = vpop.f32.mrf.mxu2  ;;  %2664 = vadd.xlane.f32.xlu1 %v2570_v62 }
 0x3b3   : > { %v2420_v9 = vadd.f32 %v4741_v58, %v2419_v61 }
 0x3b5   : > { %v2713_v2 = vpop.xlane.xlu1 %2712  ;;  %v2621_v50 = vpop.xlane.xlu0 %2620  ;;  %3600 = vtanh.f32 %v2420_v9 }
 0x3b6   : > { %v2790_v33 = vadd.f32 %v4584_v46, %v2713_v2  ;;  %v2744_v48 = vadd.f32 %v4584_v46, %v2621_v50  ;;  %3602 = vtanh.f32 %v2403_v28 }
 0x3b8   : > { %2855 = vst.msk [vmem:[%s4591_s25 + $0x1b0] sm:$0xff] %vm2800_vm0, %v2790_v33 }
 0x3b9   : > { %2809 = vst.msk [vmem:[%s4591_s25 + $0x40] sm:$0xff] %vm2800_vm0, %v2744_v48  ;;  %2680 = vadd.xlane.f32.xlu0 %v2578_v43  ;;  %2684 = vadd.xlane.f32.xlu2 %v2580_v40 }
 0x3ba   : > { %v2422_v52 = vpop.f32.mrf.mxu2  ;;  %2670 = vadd.xlane.f32.xlu1 %v2573_v30 }
 0x3bb   : > { %v2423_v47 = vadd.f32 %v4741_v58, %v2422_v52  ;;  %v3601_v53 = vpop.eup %3600 }
 0x3bc   : > { %v3603_v39 = vpop.eup %3602  ;;  %v2583_v7 = vmul.f32 %v4755_v56, %v3601_v53 }
 0x3bd   : > { %v2715_v54 = vpop.xlane.xlu2 %2714  ;;  %v2623_v34 = vpop.xlane.xlu1 %2622  ;;  %3604 = vtanh.f32 %v2423_v47  ;;  %v2576_v51 = vmul.f32 %v4755_v56, %v3603_v39 }
 0x3be   : > { %v2791_v25 = vadd.f32 %v4584_v46, %v2715_v54  ;;  %v2745_v6 = vadd.f32 %v4584_v46, %v2623_v34  ;;  %3606 = vtanh.f32 %v2410_v29 }
 0x3bf   : > { %3608 = vtanh.f32 %v2418_v23 }
 0x3c0   : > { %2856 = vst.msk [vmem:[%s4591_s25 + $0x1b8] sm:$0xff] %vm2800_vm0, %v2791_v25 }
 0x3c1   : > { %2810 = vst.msk [vmem:[%s4591_s25 + $0x48] sm:$0xff] %vm2800_vm0, %v2745_v6  ;;  %2686 = vadd.xlane.f32.xlu0 %v2581_v49  ;;  %2690 = vadd.xlane.f32.xlu2 %v2583_v7 }
 0x3c2   : > { %v2424_v41 = vpop.f32.mrf.mxu2  ;;  %2676 = vadd.xlane.f32.xlu1 %v2576_v51 }
 0x3c3   : > { %v3605_v60 = vpop.eup %3604  ;;  %v2425_v63 = vadd.f32 %v4741_v58, %v2424_v41 }
 0x3c4   : > { %v3607_v18 = vpop.eup %3606  ;;  %v2584_v19 = vmul.f32 %v4755_v56, %v3605_v60 }
 0x3c5   : > { %v2625_v11 = vpop.xlane.xlu2 %2624  ;;  %v2579_v37 = vmul.f32 %v4755_v56, %v3607_v18  ;;  %v3609_v12 = vpop.eup %3608 }
 0x3c6   : > { %v2746_v15 = vadd.f32 %v4584_v46, %v2625_v11  ;;  %v2582_v20 = vmul.f32 %v4755_v56, %v3609_v12 }
 0x3c8   : > { %2811 = vst.msk [vmem:[%s4591_s25 + $0x50] sm:$0xff] %vm2800_vm0, %v2746_v15 }
 0x3c9   : > { %2692 = vadd.xlane.f32.xlu0 %v2584_v19 }
 0x3ca   : > { %2682 = vadd.xlane.f32.xlu1 %v2579_v37  ;;  %v2427_v32 = vpop.f32.mrf.mxu2 }
 0x3cb   : > { %v2428_v14 = vadd.f32 %v4741_v58, %v2427_v32 }
 0x3cc   : > { %v2717_v17 = vpop.xlane.xlu0 %2716 }
 0x3cd   : > { %3610 = vtanh.f32 %v2428_v14  ;;  %v2792_v44 = vadd.f32 %v4584_v46, %v2717_v17 }
 0x3ce   : > { %3612 = vtanh.f32 %v2425_v63 }
 0x3cf   : > { %2857 = vst.msk [vmem:[%s4591_s25 + $0x1c0] sm:$0xff] %vm2800_vm0, %v2792_v44  ;;  %3614 = vtanh.f32 %v2465_v24 }
 0x3d2   : > { %2688 = vadd.xlane.f32.xlu1 %v2582_v20  ;;  %v2429_v5 = vpop.f32.mrf.mxu2 }
 0x3d3   : > { %v3611_v59 = vpop.eup %3610  ;;  %v2430_v13 = vadd.f32 %v4741_v58, %v2429_v5 }
 0x3d4   : > { %v2719_v22 = vpop.xlane.xlu1 %2718  ;;  %v2627_v31 = vpop.xlane.xlu0 %2626  ;;  %v2586_v3 = vmul.f32 %v4755_v56, %v3611_v59 }
 0x3d5   : > { %v3613_v26 = vpop.eup %3612  ;;  %3616 = vtanh.f32 %v2430_v13  ;;  %v2793_v45 = vadd.f32 %v4584_v46, %v2719_v22  ;;  %v2747_v10 = vadd.f32 %v4584_v46, %v2627_v31 }
 0x3d6   : > { %2696 = vadd.xlane.f32.xlu2 %v2586_v3  ;;  %3618 = vtanh.f32 %v2470_v1  ;;  %v2585_v42 = vmul.f32 %v4755_v56, %v3613_v26  ;;  %v3615_v16 = vpop.eup %3614 }
 0x3d7   : > { %2858 = vst.msk [vmem:[%s4591_s25 + $0x1c8] sm:$0xff] %vm2800_vm0, %v2793_v45  ;;  %3620 = vtanh.f32 %v2468_v4  ;;  %v2601_v61 = vmul.f32 %v4755_v56, %v3615_v16 }
 0x3d8   : > { %2812 = vst.msk [vmem:[%s4591_s25 + $0x58] sm:$0xff] %vm2800_vm0, %v2747_v10 }
 0x3da   : > { %2694 = vadd.xlane.f32.xlu1 %v2585_v42 }
 0x3db   : > { %v3617_v38 = vpop.eup %3616 }
 0x3dc   : > { %v2721_v62 = vpop.xlane.xlu2 %2720  ;;  %v2629_v57 = vpop.xlane.xlu1 %2628  ;;  %v2587_v46 = vmul.f32 %v4755_v56, %v3617_v38 }
 0x3dd   : > { %v3619_v58 = vpop.eup %3618  ;;  %v2794_v28 = vadd.f32 %v4897_v27, %v2721_v62  ;;  %v2748_v9 = vadd.f32 %v4897_v27, %v2629_v57 }
 0x3de   : > { %2698 = vadd.xlane.f32.xlu0 %v2587_v46  ;;  %2726 = vadd.xlane.f32.xlu2 %v2601_v61  ;;  %v2603_v0 = vmul.f32 %v4755_v56, %v3619_v58  ;;  %v3621_v21 = vpop.eup %3620 }
 0x3df   : > { %2859 = vst.msk [vmem:[%s4591_s25 + $0x1d0] sm:$0xff] %vm2800_vm0, %v2794_v28  ;;  %v2602_v33 = vmul.f32 %v4755_v56, %v3621_v21 }
 0x3e0   : > { %2813 = vst.msk [vmem:[%s4591_s25 + $0x60] sm:$0xff] %vm2800_vm0, %v2748_v9 }
 0x3e2   : > { %2730 = vadd.xlane.f32.xlu1 %v2603_v0 }
 0x3e4   : > { %v2631_v2 = vpop.xlane.xlu2 %2630  ;;  %v2723_v50 = vpop.xlane.xlu0 %2722 }
 0x3e5   : > { %v2749_v48 = vadd.f32 %v4897_v27, %v2631_v2  ;;  %v2795_v43 = vadd.f32 %v4897_v27, %v2723_v50 }
 0x3e6   : > { %2728 = vadd.xlane.f32.xlu0 %v2602_v33 }
 0x3e7   : > { %2814 = vst.msk [vmem:[%s4591_s25 + $0x68] sm:$0xff] %vm2800_vm0, %v2749_v48 }
 0x3e8   : > { %2860 = vst.msk [vmem:[%s4591_s25 + $0x1d8] sm:$0xff] %vm2800_vm0, %v2795_v43 }
 0x3ec   : > { %v2637_v40 = vpop.xlane.xlu2 %2636  ;;  %v2633_v30 = vpop.xlane.xlu0 %2632 }
 0x3ed   : > { %v2752_v52 = vadd.f32 %v4897_v27, %v2637_v40  ;;  %v2750_v36 = vadd.f32 %v4897_v27, %v2633_v30 }
 0x3ef   : > { %2817 = vst.msk [vmem:[%s4591_s25 + $0x80] sm:$0xff] %vm2800_vm0, %v2752_v52 }
 0x3f0   : > { %2815 = vst.msk [vmem:[%s4591_s25 + $0x70] sm:$0xff] %vm2800_vm0, %v2750_v36 }
 0x3f4   : > { %v2643_v56 = vpop.xlane.xlu2 %2642  ;;  %v2639_v29 = vpop.xlane.xlu0 %2638 }
 0x3f5   : > { %v2755_v47 = vadd.f32 %v4897_v27, %v2643_v56  ;;  %v2725_v53 = vpop.xlane.xlu1 %2724  ;;  %v2753_v39 = vadd.f32 %v4897_v27, %v2639_v29 }
 0x3f6   : > { %v2796_v54 = vadd.f32 %v4897_v27, %v2725_v53 }
 0x3f7   : > { %2820 = vst.msk [vmem:[%s4591_s25 + $0x98] sm:$0xff] %vm2800_vm0, %v2755_v47 }
 0x3f8   : > { %2861 = vst.msk [vmem:[%s4591_s25 + $0x1e0] sm:$0xff] %vm2800_vm0, %v2796_v54 }
 0x3f9   : > { %2818 = vst.msk [vmem:[%s4591_s25 + $0x88] sm:$0xff] %vm2800_vm0, %v2753_v39 }
 0x3fc   : > { %v2649_v34 = vpop.xlane.xlu2 %2648  ;;  %v2645_v8 = vpop.xlane.xlu0 %2644 }
 0x3fd   : > { %v2758_v25 = vadd.f32 %v4897_v27, %v2649_v34  ;;  %v2635_v6 = vpop.xlane.xlu1 %2634  ;;  %v2756_v49 = vadd.f32 %v4897_v27, %v2645_v8 }
 0x3fe   : > { %v2751_v7 = vadd.f32 %v4897_v27, %v2635_v6 }
 0x3ff   : > { %2823 = vst.msk [vmem:[%s4591_s25 + $0xb0] sm:$0xff] %vm2800_vm0, %v2758_v25 }
 0x400   : > { %2816 = vst.msk [vmem:[%s4591_s25 + $0x78] sm:$0xff] %vm2800_vm0, %v2751_v7 }
 0x401   : > { %2821 = vst.msk [vmem:[%s4591_s25 + $0xa0] sm:$0xff] %vm2800_vm0, %v2756_v49 }
 0x404   : > { %v2655_v51 = vpop.xlane.xlu2 %2654  ;;  %v2651_v41 = vpop.xlane.xlu0 %2650 }
 0x405   : > { %v2761_v23 = vadd.f32 %v4897_v27, %v2655_v51  ;;  %v2641_v60 = vpop.xlane.xlu1 %2640  ;;  %v2759_v18 = vadd.f32 %v4897_v27, %v2651_v41 }
 0x406   : > { %v2754_v11 = vadd.f32 %v4897_v27, %v2641_v60 }
 0x407   : > { %2826 = vst.msk [vmem:[%s4591_s25 + $0xc8] sm:$0xff] %vm2800_vm0, %v2761_v23 }
 0x408   : > { %2819 = vst.msk [vmem:[%s4591_s25 + $0x90] sm:$0xff] %vm2800_vm0, %v2754_v11 }
 0x409   : > { %2824 = vst.msk [vmem:[%s4591_s25 + $0xb8] sm:$0xff] %vm2800_vm0, %v2759_v18 }
 0x40c   : > { %v2661_v55 = vpop.xlane.xlu2 %2660  ;;  %v2657_v15 = vpop.xlane.xlu0 %2656 }
 0x40d   : > { %v2764_v19 = vadd.f32 %v4897_v27, %v2661_v55  ;;  %v2647_v37 = vpop.xlane.xlu1 %2646  ;;  %v2762_v32 = vadd.f32 %v4897_v27, %v2657_v15 }
 0x40e   : > { %v2757_v63 = vadd.f32 %v4897_v27, %v2647_v37 }
 0x40f   : > { %2829 = vst.msk [vmem:[%s4591_s25 + $0xe0] sm:$0xff] %vm2800_vm0, %v2764_v19 }
 0x410   : > { %2822 = vst.msk [vmem:[%s4591_s25 + $0xa8] sm:$0xff] %vm2800_vm0, %v2757_v63 }
 0x411   : > { %2827 = vst.msk [vmem:[%s4591_s25 + $0xd0] sm:$0xff] %vm2800_vm0, %v2762_v32 }
 0x414   : > { %v2667_v14 = vpop.xlane.xlu2 %2666  ;;  %v2663_v17 = vpop.xlane.xlu0 %2662 }
 0x415   : > { %v2767_v12 = vadd.f32 %v4897_v27, %v2667_v14  ;;  %v2653_v44 = vpop.xlane.xlu1 %2652  ;;  %v2765_v24 = vadd.f32 %v4897_v27, %v2663_v17 }
 0x416   : > { %v2760_v35 = vadd.f32 %v4897_v27, %v2653_v44 }
 0x417   : > { %2832 = vst.msk [vmem:[%s4591_s25 + $0xf8] sm:$0xff] %vm2800_vm0, %v2767_v12 }
 0x418   : > { %2825 = vst.msk [vmem:[%s4591_s25 + $0xc0] sm:$0xff] %vm2800_vm0, %v2760_v35 }
 0x419   : > { %2830 = vst.msk [vmem:[%s4591_s25 + $0xe8] sm:$0xff] %vm2800_vm0, %v2765_v24 }
 0x41c   : > { %v2673_v20 = vpop.xlane.xlu2 %2672  ;;  %v2669_v5 = vpop.xlane.xlu0 %2668 }
 0x41d   : > { %v2770_v59 = vadd.f32 %v4897_v27, %v2673_v20  ;;  %v2659_v1 = vpop.xlane.xlu1 %2658  ;;  %v2768_v13 = vadd.f32 %v4897_v27, %v2669_v5 }
 0x41e   : > { %v2763_v22 = vadd.f32 %v4897_v27, %v2659_v1 }
 0x41f   : > { %2835 = vst.msk [vmem:[%s4591_s25 + $0x110] sm:$0xff] %vm2800_vm0, %v2770_v59 }
 0x420   : > { %2828 = vst.msk [vmem:[%s4591_s25 + $0xd8] sm:$0xff] %vm2800_vm0, %v2763_v22 }
 0x421   : > { %2833 = vst.msk [vmem:[%s4591_s25 + $0x100] sm:$0xff] %vm2800_vm0, %v2768_v13 }
 0x424   : > { %v2679_v31 = vpop.xlane.xlu2 %2678  ;;  %v2675_v3 = vpop.xlane.xlu0 %2674 }
 0x425   : > { %v2773_v26 = vadd.f32 %v4897_v27, %v2679_v31  ;;  %v2665_v45 = vpop.xlane.xlu1 %2664  ;;  %v2771_v10 = vadd.f32 %v4897_v27, %v2675_v3 }
 0x426   : > { %v2766_v4 = vadd.f32 %v4897_v27, %v2665_v45 }
 0x427   : > { %2838 = vst.msk [vmem:[%s4591_s25 + $0x128] sm:$0xff] %vm2800_vm0, %v2773_v26 }
 0x428   : > { %2831 = vst.msk [vmem:[%s4591_s25 + $0xf0] sm:$0xff] %vm2800_vm0, %v2766_v4 }
 0x429   : > { %2836 = vst.msk [vmem:[%s4591_s25 + $0x118] sm:$0xff] %vm2800_vm0, %v2771_v10 }
 0x42c   : > { %v2685_v42 = vpop.xlane.xlu2 %2684  ;;  %v2681_v16 = vpop.xlane.xlu0 %2680 }
 0x42d   : > { %v2776_v38 = vadd.f32 %v4897_v27, %v2685_v42  ;;  %v2671_v62 = vpop.xlane.xlu1 %2670  ;;  %v2774_v57 = vadd.f32 %v4897_v27, %v2681_v16 }
 0x42e   : > { %v2769_v46 = vadd.f32 %v4897_v27, %v2671_v62 }
 0x42f   : > { %2841 = vst.msk [vmem:[%s4591_s25 + $0x140] sm:$0xff] %vm2800_vm0, %v2776_v38 }
 0x430   : > { %2834 = vst.msk [vmem:[%s4591_s25 + $0x108] sm:$0xff] %vm2800_vm0, %v2769_v46 }
 0x431   : > { %2839 = vst.msk [vmem:[%s4591_s25 + $0x130] sm:$0xff] %vm2800_vm0, %v2774_v57 }
 0x434   : > { %v2691_v61 = vpop.xlane.xlu2 %2690  ;;  %v2687_v58 = vpop.xlane.xlu0 %2686 }
 0x435   : > { %v2779_v28 = vadd.f32 %v4897_v27, %v2691_v61  ;;  %v2677_v9 = vpop.xlane.xlu1 %2676  ;;  %v2777_v0 = vadd.f32 %v4897_v27, %v2687_v58 }
 0x436   : > { %v2772_v21 = vadd.f32 %v4897_v27, %v2677_v9 }
 0x437   : > { %2844 = vst.msk [vmem:[%s4591_s25 + $0x158] sm:$0xff] %vm2800_vm0, %v2779_v28 }
 0x438   : > { %2837 = vst.msk [vmem:[%s4591_s25 + $0x120] sm:$0xff] %vm2800_vm0, %v2772_v21 }
 0x439   : > { %2842 = vst.msk [vmem:[%s4591_s25 + $0x148] sm:$0xff] %vm2800_vm0, %v2777_v0 }
 0x43c   : > { %v2693_v2 = vpop.xlane.xlu0 %2692 }
 0x43d   : > { %v2683_v50 = vpop.xlane.xlu1 %2682  ;;  %v2780_v33 = vadd.f32 %v4897_v27, %v2693_v2 }
 0x43e   : > { %v2775_v48 = vadd.f32 %v4897_v27, %v2683_v50 }
 0x43f   : > { %2845 = vst.msk [vmem:[%s4591_s25 + $0x160] sm:$0xff] %vm2800_vm0, %v2780_v33 }
 0x440   : > { %2840 = vst.msk [vmem:[%s4591_s25 + $0x138] sm:$0xff] %vm2800_vm0, %v2775_v48 }
 0x445   : > { %v2689_v43 = vpop.xlane.xlu1 %2688 }
 0x446   : > { %v2778_v40 = vadd.f32 %v4897_v27, %v2689_v43 }
 0x448   : > { %2843 = vst.msk [vmem:[%s4591_s25 + $0x150] sm:$0xff] %vm2800_vm0, %v2778_v40 }
 0x449   : > { %v2697_v30 = vpop.xlane.xlu2 %2696 }
 0x44a   : > { %v2782_v52 = vadd.f32 %v4897_v27, %v2697_v30 }
 0x44c   : > { %2847 = vst.msk [vmem:[%s4591_s25 + $0x170] sm:$0xff] %vm2800_vm0, %v2782_v52 }
 0x44d   : > { %v2695_v36 = vpop.xlane.xlu1 %2694 }
 0x44e   : > { %v2781_v56 = vadd.f32 %v4897_v27, %v2695_v36 }
 0x450   : > { %2846 = vst.msk [vmem:[%s4591_s25 + $0x168] sm:$0xff] %vm2800_vm0, %v2781_v56 }
 0x451   : > { %v2727_v29 = vpop.xlane.xlu2 %2726  ;;  %v2699_v47 = vpop.xlane.xlu0 %2698 }
 0x452   : > { %v2797_v53 = vadd.f32 %v4897_v27, %v2727_v29  ;;  %v2783_v39 = vadd.f32 %v4897_v27, %v2699_v47 }
 0x454   : > { %2862 = vst.msk [vmem:[%s4591_s25 + $0x1e8] sm:$0xff] %vm2800_vm0, %v2797_v53 }
 0x455   : > { %2848 = vst.msk [vmem:[%s4591_s25 + $0x178] sm:$0xff] %vm2800_vm0, %v2783_v39  ;;  %v2731_v54 = vpop.xlane.xlu1 %2730 }
 0x456   : > { %v2799_v34 = vadd.f32 %v4897_v27, %v2731_v54 }
 0x458   : > { %2864 = vst.msk [vmem:[%s4591_s25 + $0x1f8] sm:$0xff] %vm2800_vm0, %v2799_v34 }
 0x459   : > { %v2729_v8 = vpop.xlane.xlu0 %2728 }
 0x45a   : > { %v2798_v25 = vadd.f32 %v4897_v27, %v2729_v8 }
 0x45c   : > { %2863 = vst.msk [vmem:[%s4591_s25 + $0x1f0] sm:$0xff] %vm2800_vm0, %v2798_v25 }
 0x45d PF: > { %s24_s23 = sadd.s32 1, %s3636_s23  }
 0x45e   : > { %p21_p4 = scmp.ge.s32.totalorder %s24_s23, 4  }
 0x460   :  { %23 = sbr.rel (!%p21_p4) target bundleno = 3 (0x3), region = 101 }

</bundles_post_ra>
